<compile_context>
chip_gen: v7x
topology: tpu7x:2x2x1
jax: 0.10.0
libtpu: 0.0.40
codegen_flags: <defaults>
</compile_context>

<pallas_src>
import functools
import math

import jax
import jax.numpy as jnp
import numpy as np
from jax.experimental import pallas as pl
from jax.experimental.pallas import tpu as pltpu


def _mha_kernel(h, d_k, has_mask, causal, exact_softmax, compute_dtype, *refs):
    """Fused multi-head attention for one (batch, q-tile) grid step.

    refs (in order): [mask?], q, k, v, Wqkv, bqkv, Wo, bo, out, k_scr, v_scr
    q block (1, tq, D); k/v blocks (1, S, D); Wqkv (D, 3D); out (1, tq, D).
    """
    if has_mask:
        (mask_ref, q_ref, k_ref, v_ref, wqkv_ref, bqkv_ref, wo_ref, bo_ref,
         out_ref, k_scr, v_scr) = refs
    else:
        (q_ref, k_ref, v_ref, wqkv_ref, bqkv_ref, wo_ref, bo_ref,
         out_ref, k_scr, v_scr) = refs
        mask_ref = None

    D = h * d_k
    tq = q_ref.shape[1]
    S = k_scr.shape[0]

    # --- K / V projections: computed once per batch element (the inner q-tile
    #     axis resets to 0 when the batch index advances) and cached in VMEM.
    #     Correctness depends on grid axis 1 being sequential ("arbitrary").
    @pl.when(pl.program_id(1) == 0)
    def _():
        k_in = k_ref[0]                                              # (S, D)
        v_in = v_ref[0]
        kp = jnp.dot(k_in, wqkv_ref[:, D:2 * D],
                     preferred_element_type=jnp.float32) + bqkv_ref[:, D:2 * D]
        vp = jnp.dot(v_in, wqkv_ref[:, 2 * D:3 * D],
                     preferred_element_type=jnp.float32) + bqkv_ref[:, 2 * D:3 * D]
        k_scr[...] = kp.astype(compute_dtype)
        v_scr[...] = vp.astype(compute_dtype)

    # --- Q projection for this tile (1/sqrt(d_k) already folded into Wq/bq).
    q = jnp.dot(q_ref[0], wqkv_ref[:, 0:D],
                preferred_element_type=jnp.float32) + bqkv_ref[:, 0:D]
    q_c = q.astype(compute_dtype)                                    # (tq, D)

    # --- mask, hoisted out of the head loop.
    if mask_ref is not None:
        mzero = mask_ref[0].astype(jnp.float32) == 0.0               # (tq, S)
    elif causal:
        row = pl.program_id(1) * tq + jax.lax.broadcasted_iota(jnp.int32, (tq, S), 0)
        col = jax.lax.broadcasted_iota(jnp.int32, (tq, S), 1)
        mzero = col > row
    else:
        mzero = None

    # --- per-head attention with the output projection folded into the loop:
    #     acc += softmax(q_h k_h^T) v_h @ Wo[h*d_k:(h+1)*d_k, :].
    #     Every store stays lane-dense (no (tq, d_k) masked stores, no x_scr).
    acc = jnp.zeros((tq, D), jnp.float32)
    for hh in range(h):
        lo = hh * d_k
        qh = q_c[:, lo:lo + d_k]                                     # (tq, d_k)
        kh = k_scr[:, lo:lo + d_k]                                   # (S, d_k)
        vh = v_scr[:, lo:lo + d_k]                                   # (S, d_k)

        # QK^T without materializing a transpose of kh.
        scores = jax.lax.dot_general(
            qh, kh, (((1,), (1,)), ((), ())),
            preferred_element_type=jnp.float32)                      # (tq, S)
        if mzero is not None:
            scores = jnp.where(mzero, jnp.float32(-1e9), scores)

        # numerically-stable softmax in f32.
        m = jnp.max(scores, axis=-1, keepdims=True)
        e = jnp.exp(scores - m)
        denom = jnp.sum(e, axis=-1, keepdims=True)
        if exact_softmax:
            p = e / denom                          # exact-math (f32) path
        else:
            p = e * pl.reciprocal(denom, approx=True)   # EUP slot, ~free

        pv = jnp.dot(p.astype(compute_dtype), vh,
                     preferred_element_type=jnp.float32)             # (tq, d_k)
        acc = acc + jnp.dot(pv.astype(compute_dtype),
                            wo_ref[lo:lo + d_k, :],                  # row slab of Wo
                            preferred_element_type=jnp.float32)      # (tq, D)

    out_ref[0] = (acc + bo_ref[:, :]).astype(out_ref.dtype)


def _single_buffered(block_shape, index_map):
    """BlockSpec for grid-invariant operands (weights/biases): one pipeline buffer."""
    try:
        return pl.BlockSpec(block_shape, index_map, pipeline_mode=pl.Buffered(1))
    except Exception:                      # pipeline_mode/Buffered unavailable
        return pl.BlockSpec(block_shape, index_map)


def _vmem_limit_bytes():
    """~80% of physical VMEM per generation; never request the full 64 MiB on v7x."""
    try:
        cap = pltpu.get_tpu_info().vmem_capacity_bytes
    except Exception:
        cap = 64 * 1024 * 1024
    return int(cap * 0.8)


def multi_headed_attention(query, key, value, params, h, mask=None, *,
                           causal=False, q_tile=128, compute_dtype=jnp.bfloat16):
    """query/key/value: [B, S, D]. params: 4 (W [D_in,D_out], b [D_out]) pairs (q,k,v,o).

    mask: None, (S, S) shared across the batch, or (B, S, S); nonzero = keep.
    causal=True generates the causal mask in-kernel (no mask input at all).
    """
    B, S, D = query.shape
    assert D % h == 0
    assert not (causal and mask is not None), "pass either `mask` or causal=True"
    d_k = D // h
    (wq, bq), (wk, bk), (wv, bv), (wo, bo) = params
    out_dtype = query.dtype
    scale = 1.0 / math.sqrt(d_k)

    # Fuse the three input-projection weights/biases host-side and fold the
    # 1/sqrt(d_k) scale into the Q columns (free, outside the grid loop).
    w_qkv = jnp.concatenate([wq * scale, wk, wv], axis=1).astype(compute_dtype)  # (D, 3D)
    b_qkv = jnp.concatenate([bq * scale, bk, bv]).reshape(1, 3 * D).astype(jnp.float32)
    wo_c = wo.astype(compute_dtype)                                               # (D, D)
    bo_c = bo.reshape(1, D).astype(jnp.float32)

    # Activations cast to the MXU dtype host-side (halves DMA / resident VMEM).
    query = query.astype(compute_dtype)
    key = key.astype(compute_dtype)
    value = value.astype(compute_dtype)

    # q_tile can be raised to 256-512 on v5e/v6e (128 MiB VMEM); keep <=128 on v7x.
    tq = min(q_tile, S)
    assert S % tq == 0, "sequence length must be a multiple of the query tile"
    n_q = S // tq

    exact = bool(np.dtype(compute_dtype) == np.dtype(np.float32))
    kernel = functools.partial(_mha_kernel, h, d_k, mask is not None, causal,
                               exact, compute_dtype)

    in_specs, inputs = [], []
    if mask is not None:
        mask = jnp.asarray(mask)
        if mask.ndim == 2:                       # shared mask: ignore batch index
            mask_i8 = mask.astype(jnp.int8).reshape(1, S, S)
            mask_map = lambda b, i: (0, i, 0)
        else:
            assert mask.shape == (B, S, S)
            mask_i8 = mask.astype(jnp.int8)
            mask_map = lambda b, i: (b, i, 0)
        in_specs.append(pl.BlockSpec((1, tq, S), mask_map))
        inputs.append(mask_i8)

    in_specs += [
        pl.BlockSpec((1, tq, D), lambda b, i: (b, i, 0)),      # query tile
        pl.BlockSpec((1, S, D), lambda b, i: (b, 0, 0)),       # key (full seq)
        pl.BlockSpec((1, S, D), lambda b, i: (b, 0, 0)),       # value (full seq)
        _single_buffered((D, 3 * D), lambda b, i: (0, 0)),     # fused Wq|Wk|Wv
        _single_buffered((1, 3 * D), lambda b, i: (0, 0)),     # fused biases
        _single_buffered((D, D), lambda b, i: (0, 0)),         # Wo
        _single_buffered((1, D), lambda b, i: (0, 0)),         # bo
    ]
    inputs += [query, key, value, w_qkv, b_qkv, wo_c, bo_c]

    return pl.pallas_call(
        kernel,
        out_shape=jax.ShapeDtypeStruct((B, S, D), out_dtype),
        grid=(B, n_q),
        in_specs=in_specs,
        out_specs=pl.BlockSpec((1, tq, D), lambda b, i: (b, i, 0)),
        scratch_shapes=[
            pltpu.VMEM((S, D), compute_dtype),   # projected K (per batch element)
            pltpu.VMEM((S, D), compute_dtype),   # projected V (per batch element)
        ],
        compiler_params=pltpu.CompilerParams(
            # Axis 1 (q tiles) MUST stay "arbitrary": the K/V scratch is filled
            # at program_id(1)==0 and reused by later q tiles of the same batch.
            dimension_semantics=("parallel", "arbitrary"),
            vmem_limit_bytes=_vmem_limit_bytes(),
        ),
    )(*inputs)


def _reference(query, key, value, params, h, mask=None):
    """Pure-JAX f32 reference matching the PyTorch forward semantics."""
    (wq, bq), (wk, bk), (wv, bv), (wo, bo) = params
    B, S, D = query.shape
    d_k = D // h

    def proj(x, w, b):
        y = x @ w + b
        return y.reshape(B, S, h, d_k).transpose(0, 2, 1, 3)   # (B, h, S, d_k)

    q = proj(query, wq, bq)
    k = proj(key, wk, bk)
    v = proj(value, wv, bv)
    scores = jnp.einsum("bhqd,bhkd->bhqk", q, k) / math.sqrt(d_k)
    if mask is not None:
        scores = jnp.where(mask[:, None, :, :] == 0, -1e9, scores)
    p = jax.nn.softmax(scores, axis=-1)
    x = jnp.einsum("bhqk,bhkd->bhqd", p, v)
    x = x.transpose(0, 2, 1, 3).reshape(B, S, D)
    return x @ wo + bo


if __name__ == "__main__":
    # Small but lane-friendly config: D multiple of 128 keeps projections and
    # output stores lane-dense; 2 query tiles exercise the K/V caching path.
    B, S, D, H = 2, 256, 128, 4

    key0 = jax.random.PRNGKey(0)
    ks = jax.random.split(key0, 10)

    def linear_params(kw, kb):
        bound = 1.0 / math.sqrt(D)
        w = jax.random.uniform(kw, (D, D), jnp.float32, -bound, bound)
        b = jax.random.uniform(kb, (D,), jnp.float32, -bound, bound)
        return w, b

    params = tuple(linear_params(ks[2 * i], ks[2 * i + 1]) for i in range(4))

    x = jax.random.normal(ks[8], (B, S, D), jnp.float32)
    query = key = value = x                       # self-attention style inputs
    tril = jnp.tril(jnp.ones((S, S), jnp.float32))
    causal_full = jnp.broadcast_to(tril, (B, S, S))

    # 1) exact-math path (f32 end to end), no mask — tight semantic check.
    out = jax.block_until_ready(
        multi_headed_attention(query, key, value, params, H,
                               compute_dtype=jnp.float32))
    ref = _reference(query, key, value, params, H)
    np.testing.assert_allclose(np.asarray(out), np.asarray(ref),
                               rtol=1e-2, atol=1e-3)

    ref_m = _reference(query, key, value, params, H, mask=causal_full)

    # 2) exact-math path, causal mask generated in-kernel (zero mask DMA).
    out = jax.block_until_ready(
        multi_headed_attention(query, key, value, params, H, causal=True,
                               compute_dtype=jnp.float32))
    np.testing.assert_allclose(np.asarray(out), np.asarray(ref_m),
                               rtol=1e-2, atol=1e-3)

    # 3) exact-math path, explicit (S, S) mask shared across batch (int8 DMA).
    out = jax.block_until_ready(
        multi_headed_attention(query, key, value, params, H, mask=tril,
                               compute_dtype=jnp.float32))
    np.testing.assert_allclose(np.asarray(out), np.asarray(ref_m),
                               rtol=1e-2, atol=1e-3)

    # 4) fast path: bf16 at the MXU, f32 accumulation/softmax, per-batch mask.
    out = jax.block_until_ready(
        multi_headed_attention(query, key, value, params, H, mask=causal_full,
                               compute_dtype=jnp.bfloat16))
    np.testing.assert_allclose(np.asarray(out).astype(np.float32),
                               np.asarray(ref_m), rtol=5e-2, atol=1e-2)

    print("KERNEL_OK")
</pallas_src>

<mosaic_0001>
module attributes {stable_mosaic.version = 11 : i64} {
  func.func @_mha_kernel(%arg0: i32, %arg1: i32, %arg2: memref<1x128x128xf32, #tpu.memory_space<vmem>>, %arg3: memref<1x256x128xf32, #tpu.memory_space<vmem>>, %arg4: memref<1x256x128xf32, #tpu.memory_space<vmem>>, %arg5: memref<128x384xf32, #tpu.memory_space<vmem>>, %arg6: memref<1x384xf32, #tpu.memory_space<vmem>>, %arg7: memref<128x128xf32, #tpu.memory_space<vmem>>, %arg8: memref<1x128xf32, #tpu.memory_space<vmem>>, %arg9: memref<1x128x128xf32, #tpu.memory_space<vmem>>, %arg10: memref<256x128xf32, #tpu.memory_space<vmem>>, %arg11: memref<256x128xf32, #tpu.memory_space<vmem>>) attributes {dimension_semantics = [#tpu.dimension_semantics<parallel>, #tpu.dimension_semantics<arbitrary>], iteration_bounds = array<i64: 2, 2>, scalar_prefetch = 0 : i64, scratch_operands = 2 : i64, tpu.core_type = #tpu.core_type<tc>, window_params = [{transform_indices = @transform_0, window_bounds = array<i64: 1, 128, 128>}, {transform_indices = @transform_1, window_bounds = array<i64: 1, 256, 128>}, {transform_indices = @transform_2, window_bounds = array<i64: 1, 256, 128>}, {pipeline_mode = #tpu.pipeline_mode<synchronous>, transform_indices = @transform_3, window_bounds = array<i64: 128, 384>}, {pipeline_mode = #tpu.pipeline_mode<synchronous>, transform_indices = @transform_4, window_bounds = array<i64: 1, 384>}, {pipeline_mode = #tpu.pipeline_mode<synchronous>, transform_indices = @transform_5, window_bounds = array<i64: 128, 128>}, {pipeline_mode = #tpu.pipeline_mode<synchronous>, transform_indices = @transform_6, window_bounds = array<i64: 1, 128>}, {transform_indices = @transform_7, window_bounds = array<i64: 1, 128, 128>}]} {
    %c0_i32 = arith.constant 0 : i32
    %0 = arith.cmpi eq, %arg1, %c0_i32 : i32
    %1 = arith.extui %0 : i1 to i32
    %c0_i32_0 = arith.constant 0 : i32
    %2 = arith.cmpi ne, %1, %c0_i32_0 : i32
    scf.if %2 {
      %c0_54 = arith.constant 0 : index
      %c0_55 = arith.constant 0 : index
      %c0_56 = arith.constant 0 : index
      %85 = vector.load %arg3[%c0_54, %c0_55, %c0_56] : memref<1x256x128xf32, #tpu.memory_space<vmem>>, vector<1x256x128xf32>
      %86 = vector.shape_cast %85 : vector<1x256x128xf32> to vector<256x128xf32>
      %c0_57 = arith.constant 0 : index
      %c0_58 = arith.constant 0 : index
      %c0_59 = arith.constant 0 : index
      %87 = vector.load %arg4[%c0_57, %c0_58, %c0_59] : memref<1x256x128xf32, #tpu.memory_space<vmem>>, vector<1x256x128xf32>
      %88 = vector.shape_cast %87 : vector<1x256x128xf32> to vector<256x128xf32>
      %c0_60 = arith.constant 0 : index
      %c128 = arith.constant 128 : index
      %89 = vector.load %arg5[%c0_60, %c128] : memref<128x384xf32, #tpu.memory_space<vmem>>, vector<128x128xf32>
      %cst_61 = arith.constant dense<0.000000e+00> : vector<256x128xf32>
      %90 = tpu.matmul %86, %89, %cst_61 {dimension_numbers = #tpu.dot_dimension_numbers<[1], [0], [0], [1], [0, 0, 1, 1], [], []>} : vector<256x128xf32>, vector<128x128xf32>, vector<256x128xf32> -> vector<256x128xf32>
      %c0_62 = arith.constant 0 : index
      %c128_63 = arith.constant 128 : index
      %91 = vector.load %arg6[%c0_62, %c128_63] : memref<1x384xf32, #tpu.memory_space<vmem>>, vector<1x128xf32>
      %92 = vector.broadcast %91 : vector<1x128xf32> to vector<256x128xf32>
      %93 = arith.addf %90, %92 : vector<256x128xf32>
      %c0_64 = arith.constant 0 : index
      %c256 = arith.constant 256 : index
      %94 = vector.load %arg5[%c0_64, %c256] : memref<128x384xf32, #tpu.memory_space<vmem>>, vector<128x128xf32>
      %cst_65 = arith.constant dense<0.000000e+00> : vector<256x128xf32>
      %95 = tpu.matmul %88, %94, %cst_65 {dimension_numbers = #tpu.dot_dimension_numbers<[1], [0], [0], [1], [0, 0, 1, 1], [], []>} : vector<256x128xf32>, vector<128x128xf32>, vector<256x128xf32> -> vector<256x128xf32>
      %c0_66 = arith.constant 0 : index
      %c256_67 = arith.constant 256 : index
      %96 = vector.load %arg6[%c0_66, %c256_67] : memref<1x384xf32, #tpu.memory_space<vmem>>, vector<1x128xf32>
      %97 = vector.broadcast %96 : vector<1x128xf32> to vector<256x128xf32>
      %98 = arith.addf %95, %97 : vector<256x128xf32>
      %c0_68 = arith.constant 0 : index
      %c0_69 = arith.constant 0 : index
      %99 = vector.load %arg10[%c0_68, %c0_69] : memref<256x128xf32, #tpu.memory_space<vmem>>, vector<256x128xf32>
      tpu.vector_store %arg10[%c0_68, %c0_69], %93 {strides = array<i32>} : memref<256x128xf32, #tpu.memory_space<vmem>>, vector<256x128xf32>,
      %c0_70 = arith.constant 0 : index
      %c0_71 = arith.constant 0 : index
      %100 = vector.load %arg11[%c0_70, %c0_71] : memref<256x128xf32, #tpu.memory_space<vmem>>, vector<256x128xf32>
      tpu.vector_store %arg11[%c0_70, %c0_71], %98 {strides = array<i32>} : memref<256x128xf32, #tpu.memory_space<vmem>>, vector<256x128xf32>,
    } else {
    }
    %c0 = arith.constant 0 : index
    %c0_1 = arith.constant 0 : index
    %c0_2 = arith.constant 0 : index
    %3 = vector.load %arg2[%c0, %c0_1, %c0_2] : memref<1x128x128xf32, #tpu.memory_space<vmem>>, vector<1x128x128xf32>
    %4 = vector.shape_cast %3 : vector<1x128x128xf32> to vector<128x128xf32>
    %c0_3 = arith.constant 0 : index
    %c0_4 = arith.constant 0 : index
    %5 = vector.load %arg5[%c0_3, %c0_4] : memref<128x384xf32, #tpu.memory_space<vmem>>, vector<128x128xf32>
    %cst = arith.constant dense<0.000000e+00> : vector<128x128xf32>
    %6 = tpu.matmul %4, %5, %cst {dimension_numbers = #tpu.dot_dimension_numbers<[1], [0], [0], [1], [0, 0, 1, 1], [], []>} : vector<128x128xf32>, vector<128x128xf32>, vector<128x128xf32> -> vector<128x128xf32>
    %c0_5 = arith.constant 0 : index
    %c0_6 = arith.constant 0 : index
    %7 = vector.load %arg6[%c0_5, %c0_6] : memref<1x384xf32, #tpu.memory_space<vmem>>, vector<1x128xf32>
    %8 = vector.broadcast %7 : vector<1x128xf32> to vector<128x128xf32>
    %9 = arith.addf %6, %8 : vector<128x128xf32>
    %cst_7 = arith.constant 0.000000e+00 : f32
    %10 = vector.broadcast %cst_7 : f32 to vector<128x128xf32>
    %11 = vector.extract_strided_slice %9 {offsets = [0, 0], sizes = [128, 32], strides = [1, 1]} : vector<128x128xf32> to vector<128x32xf32>
    %c0_8 = arith.constant 0 : index
    %c0_9 = arith.constant 0 : index
    %12 = vector.load %arg10[%c0_8, %c0_9] : memref<256x128xf32, #tpu.memory_space<vmem>>, vector<256x32xf32>
    %c0_10 = arith.constant 0 : index
    %c0_11 = arith.constant 0 : index
    %13 = vector.load %arg11[%c0_10, %c0_11] : memref<256x128xf32, #tpu.memory_space<vmem>>, vector<256x32xf32>
    %cst_12 = arith.constant dense<0.000000e+00> : vector<128x256xf32>
    %14 = tpu.matmul %11, %12, %cst_12 {dimension_numbers = #tpu.dot_dimension_numbers<[1], [1], [0], [0], [0, 0, 1, 0], [], []>} : vector<128x32xf32>, vector<256x32xf32>, vector<128x256xf32> -> vector<128x256xf32>
    %cst_13 = arith.constant dense<0xFF800000> : vector<128xf32>
    %15 = vector.multi_reduction <maximumf>, %14, %cst_13 [1] : vector<128x256xf32> to vector<128xf32>
    %16 = vector.shape_cast %15 : vector<128xf32> to vector<128x1xf32>
    %17 = vector.broadcast %16 : vector<128x1xf32> to vector<128x256xf32>
    %18 = arith.subf %14, %17 : vector<128x256xf32>
    %19 = math.exp %18 : vector<128x256xf32>
    %cst_14 = arith.constant dense<0.000000e+00> : vector<128xf32>
    %20 = vector.multi_reduction <add>, %19, %cst_14 [1] : vector<128x256xf32> to vector<128xf32>
    %21 = vector.shape_cast %20 : vector<128xf32> to vector<128x1xf32>
    %22 = vector.broadcast %21 : vector<128x1xf32> to vector<128x256xf32>
    %23 = arith.divf %19, %22 : vector<128x256xf32>
    %cst_15 = arith.constant dense<0.000000e+00> : vector<128x32xf32>
    %24 = tpu.matmul %23, %13, %cst_15 {dimension_numbers = #tpu.dot_dimension_numbers<[1], [0], [0], [1], [0, 0, 1, 1], [], []>} : vector<128x256xf32>, vector<256x32xf32>, vector<128x32xf32> -> vector<128x32xf32>
    %c0_16 = arith.constant 0 : index
    %c0_17 = arith.constant 0 : index
    %25 = vector.load %arg7[%c0_16, %c0_17] : memref<128x128xf32, #tpu.memory_space<vmem>>, vector<32x128xf32>
    %cst_18 = arith.constant dense<0.000000e+00> : vector<128x128xf32>
    %26 = tpu.matmul %24, %25, %cst_18 {dimension_numbers = #tpu.dot_dimension_numbers<[1], [0], [0], [1], [0, 0, 1, 1], [], []>} : vector<128x32xf32>, vector<32x128xf32>, vector<128x128xf32> -> vector<128x128xf32>
    %27 = arith.addf %10, %26 : vector<128x128xf32>
    %28 = vector.extract_strided_slice %9 {offsets = [0, 32], sizes = [128, 32], strides = [1, 1]} : vector<128x128xf32> to vector<128x32xf32>
    %c0_19 = arith.constant 0 : index
    %c32 = arith.constant 32 : index
    %29 = vector.load %arg10[%c0_19, %c32] : memref<256x128xf32, #tpu.memory_space<vmem>>, vector<256x32xf32>
    %c0_20 = arith.constant 0 : index
    %c32_21 = arith.constant 32 : index
    %30 = vector.load %arg11[%c0_20, %c32_21] : memref<256x128xf32, #tpu.memory_space<vmem>>, vector<256x32xf32>
    %cst_22 = arith.constant dense<0.000000e+00> : vector<128x256xf32>
    %31 = tpu.matmul %28, %29, %cst_22 {dimension_numbers = #tpu.dot_dimension_numbers<[1], [1], [0], [0], [0, 0, 1, 0], [], []>} : vector<128x32xf32>, vector<256x32xf32>, vector<128x256xf32> -> vector<128x256xf32>
    %cst_23 = arith.constant dense<0xFF800000> : vector<128xf32>
    %32 = vector.multi_reduction <maximumf>, %31, %cst_23 [1] : vector<128x256xf32> to vector<128xf32>
    %33 = vector.shape_cast %32 : vector<128xf32> to vector<128x1xf32>
    %34 = vector.broadcast %33 : vector<128x1xf32> to vector<128x256xf32>
    %35 = arith.subf %31, %34 : vector<128x256xf32>
    %36 = math.exp %35 : vector<128x256xf32>
    %cst_24 = arith.constant dense<0.000000e+00> : vector<128xf32>
    %37 = vector.multi_reduction <add>, %36, %cst_24 [1] : vector<128x256xf32> to vector<128xf32>
    %38 = vector.shape_cast %37 : vector<128xf32> to vector<128x1xf32>
    %39 = vector.broadcast %38 : vector<128x1xf32> to vector<128x256xf32>
    %40 = arith.divf %36, %39 : vector<128x256xf32>
    %cst_25 = arith.constant dense<0.000000e+00> : vector<128x32xf32>
    %41 = tpu.matmul %40, %30, %cst_25 {dimension_numbers = #tpu.dot_dimension_numbers<[1], [0], [0], [1], [0, 0, 1, 1], [], []>} : vector<128x256xf32>, vector<256x32xf32>, vector<128x32xf32> -> vector<128x32xf32>
    %c32_26 = arith.constant 32 : index
    %c0_27 = arith.constant 0 : index
    %42 = vector.load %arg7[%c32_26, %c0_27] : memref<128x128xf32, #tpu.memory_space<vmem>>, vector<32x128xf32>
    %cst_28 = arith.constant dense<0.000000e+00> : vector<128x128xf32>
    %43 = tpu.matmul %41, %42, %cst_28 {dimension_numbers = #tpu.dot_dimension_numbers<[1], [0], [0], [1], [0, 0, 1, 1], [], []>} : vector<128x32xf32>, vector<32x128xf32>, vector<128x128xf32> -> vector<128x128xf32>
    %44 = arith.addf %27, %43 : vector<128x128xf32>
    %45 = vector.extract_strided_slice %9 {offsets = [0, 64], sizes = [128, 32], strides = [1, 1]} : vector<128x128xf32> to vector<128x32xf32>
    %c0_29 = arith.constant 0 : index
    %c64 = arith.constant 64 : index
    %46 = vector.load %arg10[%c0_29, %c64] : memref<256x128xf32, #tpu.memory_space<vmem>>, vector<256x32xf32>
    %c0_30 = arith.constant 0 : index
    %c64_31 = arith.constant 64 : index
    %47 = vector.load %arg11[%c0_30, %c64_31] : memref<256x128xf32, #tpu.memory_space<vmem>>, vector<256x32xf32>
    %cst_32 = arith.constant dense<0.000000e+00> : vector<128x256xf32>
    %48 = tpu.matmul %45, %46, %cst_32 {dimension_numbers = #tpu.dot_dimension_numbers<[1], [1], [0], [0], [0, 0, 1, 0], [], []>} : vector<128x32xf32>, vector<256x32xf32>, vector<128x256xf32> -> vector<128x256xf32>
    %cst_33 = arith.constant dense<0xFF800000> : vector<128xf32>
    %49 = vector.multi_reduction <maximumf>, %48, %cst_33 [1] : vector<128x256xf32> to vector<128xf32>
    %50 = vector.shape_cast %49 : vector<128xf32> to vector<128x1xf32>
    %51 = vector.broadcast %50 : vector<128x1xf32> to vector<128x256xf32>
    %52 = arith.subf %48, %51 : vector<128x256xf32>
    %53 = math.exp %52 : vector<128x256xf32>
    %cst_34 = arith.constant dense<0.000000e+00> : vector<128xf32>
    %54 = vector.multi_reduction <add>, %53, %cst_34 [1] : vector<128x256xf32> to vector<128xf32>
    %55 = vector.shape_cast %54 : vector<128xf32> to vector<128x1xf32>
    %56 = vector.broadcast %55 : vector<128x1xf32> to vector<128x256xf32>
    %57 = arith.divf %53, %56 : vector<128x256xf32>
    %cst_35 = arith.constant dense<0.000000e+00> : vector<128x32xf32>
    %58 = tpu.matmul %57, %47, %cst_35 {dimension_numbers = #tpu.dot_dimension_numbers<[1], [0], [0], [1], [0, 0, 1, 1], [], []>} : vector<128x256xf32>, vector<256x32xf32>, vector<128x32xf32> -> vector<128x32xf32>
    %c64_36 = arith.constant 64 : index
    %c0_37 = arith.constant 0 : index
    %59 = vector.load %arg7[%c64_36, %c0_37] : memref<128x128xf32, #tpu.memory_space<vmem>>, vector<32x128xf32>
    %cst_38 = arith.constant dense<0.000000e+00> : vector<128x128xf32>
    %60 = tpu.matmul %58, %59, %cst_38 {dimension_numbers = #tpu.dot_dimension_numbers<[1], [0], [0], [1], [0, 0, 1, 1], [], []>} : vector<128x32xf32>, vector<32x128xf32>, vector<128x128xf32> -> vector<128x128xf32>
    %61 = arith.addf %44, %60 : vector<128x128xf32>
    %62 = vector.extract_strided_slice %9 {offsets = [0, 96], sizes = [128, 32], strides = [1, 1]} : vector<128x128xf32> to vector<128x32xf32>
    %c0_39 = arith.constant 0 : index
    %c96 = arith.constant 96 : index
    %63 = vector.load %arg10[%c0_39, %c96] : memref<256x128xf32, #tpu.memory_space<vmem>>, vector<256x32xf32>
    %c0_40 = arith.constant 0 : index
    %c96_41 = arith.constant 96 : index
    %64 = vector.load %arg11[%c0_40, %c96_41] : memref<256x128xf32, #tpu.memory_space<vmem>>, vector<256x32xf32>
    %cst_42 = arith.constant dense<0.000000e+00> : vector<128x256xf32>
    %65 = tpu.matmul %62, %63, %cst_42 {dimension_numbers = #tpu.dot_dimension_numbers<[1], [1], [0], [0], [0, 0, 1, 0], [], []>} : vector<128x32xf32>, vector<256x32xf32>, vector<128x256xf32> -> vector<128x256xf32>
    %cst_43 = arith.constant dense<0xFF800000> : vector<128xf32>
    %66 = vector.multi_reduction <maximumf>, %65, %cst_43 [1] : vector<128x256xf32> to vector<128xf32>
    %67 = vector.shape_cast %66 : vector<128xf32> to vector<128x1xf32>
    %68 = vector.broadcast %67 : vector<128x1xf32> to vector<128x256xf32>
    %69 = arith.subf %65, %68 : vector<128x256xf32>
    %70 = math.exp %69 : vector<128x256xf32>
    %cst_44 = arith.constant dense<0.000000e+00> : vector<128xf32>
    %71 = vector.multi_reduction <add>, %70, %cst_44 [1] : vector<128x256xf32> to vector<128xf32>
    %72 = vector.shape_cast %71 : vector<128xf32> to vector<128x1xf32>
    %73 = vector.broadcast %72 : vector<128x1xf32> to vector<128x256xf32>
    %74 = arith.divf %70, %73 : vector<128x256xf32>
    %cst_45 = arith.constant dense<0.000000e+00> : vector<128x32xf32>
    %75 = tpu.matmul %74, %64, %cst_45 {dimension_numbers = #tpu.dot_dimension_numbers<[1], [0], [0], [1], [0, 0, 1, 1], [], []>} : vector<128x256xf32>, vector<256x32xf32>, vector<128x32xf32> -> vector<128x32xf32>
    %c96_46 = arith.constant 96 : index
    %c0_47 = arith.constant 0 : index
    %76 = vector.load %arg7[%c96_46, %c0_47] : memref<128x128xf32, #tpu.memory_space<vmem>>, vector<32x128xf32>
    %cst_48 = arith.constant dense<0.000000e+00> : vector<128x128xf32>
    %77 = tpu.matmul %75, %76, %cst_48 {dimension_numbers = #tpu.dot_dimension_numbers<[1], [0], [0], [1], [0, 0, 1, 1], [], []>} : vector<128x32xf32>, vector<32x128xf32>, vector<128x128xf32> -> vector<128x128xf32>
    %78 = arith.addf %61, %77 : vector<128x128xf32>
    %c0_49 = arith.constant 0 : index
    %c0_50 = arith.constant 0 : index
    %79 = vector.load %arg8[%c0_49, %c0_50] : memref<1x128xf32, #tpu.memory_space<vmem>>, vector<1x128xf32>
    %80 = vector.broadcast %79 : vector<1x128xf32> to vector<128x128xf32>
    %81 = arith.addf %78, %80 : vector<128x128xf32>
    %c0_51 = arith.constant 0 : index
    %c0_52 = arith.constant 0 : index
    %c0_53 = arith.constant 0 : index
    %82 = vector.load %arg9[%c0_51, %c0_52, %c0_53] : memref<1x128x128xf32, #tpu.memory_space<vmem>>, vector<1x128x128xf32>
    %83 = vector.shape_cast %82 : vector<1x128x128xf32> to vector<128x128xf32>
    %84 = vector.shape_cast %81 : vector<128x128xf32> to vector<1x128x128xf32>
    tpu.vector_store %arg9[%c0_51, %c0_52, %c0_53], %84 {strides = array<i32>} : memref<1x128x128xf32, #tpu.memory_space<vmem>>, vector<1x128x128xf32>,
    return
  }
  func.func @transform_0(%arg0: i32, %arg1: i32) -> (i32, i32, i32) {
    %c0_i32 = arith.constant 0 : i32
    %c0_i32_0 = arith.constant 0 : i32
    return %arg0, %arg1, %c0_i32 : i32, i32, i32
  }
  func.func @transform_1(%arg0: i32, %arg1: i32) -> (i32, i32, i32) {
    %c0_i32 = arith.constant 0 : i32
    %c0_i32_0 = arith.constant 0 : i32
    %c0_i32_1 = arith.constant 0 : i32
    return %arg0, %c0_i32, %c0_i32_0 : i32, i32, i32
  }
  func.func @transform_2(%arg0: i32, %arg1: i32) -> (i32, i32, i32) {
    %c0_i32 = arith.constant 0 : i32
    %c0_i32_0 = arith.constant 0 : i32
    %c0_i32_1 = arith.constant 0 : i32
    return %arg0, %c0_i32, %c0_i32_0 : i32, i32, i32
  }
  func.func @transform_3(%arg0: i32, %arg1: i32) -> (i32, i32) {
    %c0_i32 = arith.constant 0 : i32
    %c0_i32_0 = arith.constant 0 : i32
    %c0_i32_1 = arith.constant 0 : i32
    return %c0_i32, %c0_i32_0 : i32, i32
  }
  func.func @transform_4(%arg0: i32, %arg1: i32) -> (i32, i32) {
    %c0_i32 = arith.constant 0 : i32
    %c0_i32_0 = arith.constant 0 : i32
    %c0_i32_1 = arith.constant 0 : i32
    return %c0_i32, %c0_i32_0 : i32, i32
  }
  func.func @transform_5(%arg0: i32, %arg1: i32) -> (i32, i32) {
    %c0_i32 = arith.constant 0 : i32
    %c0_i32_0 = arith.constant 0 : i32
    %c0_i32_1 = arith.constant 0 : i32
    return %c0_i32, %c0_i32_0 : i32, i32
  }
  func.func @transform_6(%arg0: i32, %arg1: i32) -> (i32, i32) {
    %c0_i32 = arith.constant 0 : i32
    %c0_i32_0 = arith.constant 0 : i32
    %c0_i32_1 = arith.constant 0 : i32
    return %c0_i32, %c0_i32_0 : i32, i32
  }
  func.func @transform_7(%arg0: i32, %arg1: i32) -> (i32, i32, i32) {
    %c0_i32 = arith.constant 0 : i32
    %c0_i32_0 = arith.constant 0 : i32
    return %arg0, %arg1, %c0_i32 : i32, i32, i32
  }
}

</mosaic_0001>

<bundles_post_ra>
// kernel: tpu_custom_call.1
= control target key start
LH: loop header
LB: loop body
LE: loop exit
PB: predicated region body
PF: predicated region fallthrough
CT: control target
= control target key end

     0   :  { %s11670_s0 = inlined_call_operand.hbm [shape: f32[2,256,128], index: 0, kind: input, shape index: {}]   ;;  %s11671_s1 = inlined_call_operand.hbm [shape: f32[2,256,128], index: 1, kind: input, shape index: {}]   ;;  %s11672_s2 = inlined_call_operand.hbm [shape: f32[2,256,128], index: 2, kind: input, shape index: {}]   ;;  %s11673_s3 = inlined_call_operand.hbm [shape: f32[128,384], index: 3, kind: input, shape index: {}]   ;;  %s11674_s4 = inlined_call_operand.vmem [shape: f32[1,384], index: 4, kind: input, shape index: {}]   ;;  %s11675_s5 = inlined_call_operand.hbm [shape: f32[128,128], index: 5, kind: input, shape index: {}]   ;;  %s11676_s6 = inlined_call_operand.vmem [shape: f32[1,128], index: 6, kind: input, shape index: {}]   ;;  %s11677_s7 = inlined_call_operand.hbm [shape: f32[2,256,128], index: 7, kind: output, shape index: {}]  }
   0x1   :  { %11796 = sst [smem:[#allocation69_spill]] %s11671_s1 }
   0x2   :  { %11797 = sst [smem:[#allocation70_spill]] %s11673_s3 }
   0x3   :  { %11798 = sst [smem:[#allocation71_spill]] %s11674_s4 }
   0x4   :  { %11799 = sst [smem:[#allocation72_spill]] %s11675_s5 }
   0x5   :  { %11800 = sst [smem:[#allocation73_spill]] %s11676_s6 }
   0x6   :  { %11801 = sst [smem:[#allocation74_spill]] %s11677_s7 }
   0x7   :  { %12 = vsyncpa [#allocation5], 0 }
   0x8   :  { %14 = vsyncpa [#allocation5 + $0x1], 0 }
   0x9   :  { %15 = vsyncpa [#allocation8], 0 }
   0xa   :  { %17 = vsyncpa [#allocation8 + $0x1], 0 }
   0xb   :  { %18 = vsyncpa [#allocation11], 0 }
   0xc   :  { %19 = vsyncpa [#allocation6], 0 }
   0xd   :  { %21 = vsyncpa [#allocation6 + $0x1], 0  ;;  %s8908_s24 = smov 0   ;;  %s8910_s25 = smov 0  }
   0xe   :  { %s8912_s26 = smov 0   ;;  %s8914_s27 = smov 0  }
   0xf   :  { %s8916_s28 = smov 0   ;;  %s8918_s29 = smov 0  }
  0x10   :  { %s8920_s30 = smov 0   ;;  %s8922_s8 = smov 0  }
  0x11   :  { %s8924_s9 = smov 0   ;;  %s8926_s10 = smov 0  }
  0x12   :  { %s8928_s11 = smov 0  }
  0x13 LB: > { %11802 = sst [smem:[#allocation18_spill]] %s8815_s25  ;;  %s8962_s12 = sadd.s32 4294967295, %s8851_s11   ;;  %s8851_s11 = sphi %s8928_s11, %s27_s11   ;;  %s8847_s10 = sphi %s8926_s10, %s12065_s10   ;;  %s8843_s9 = sphi %s8924_s9, %s12058_s9   ;;  %s8839_s8 = sphi %s8922_s8, %s12064_s8   ;;  %s8835_s30 = sphi %s8920_s30, %s12057_s30   ;;  %s8831_s29 = sphi %s8918_s29, %s12063_s29   ;;  %s8827_s28 = sphi %s8916_s28, %s12062_s28   ;;  %s8823_s27 = sphi %s8914_s27, %s12061_s27   ;;  %s8819_s26 = sphi %s8912_s26, %s12060_s26   ;;  %s8815_s25 = sphi %s8910_s25, %s12059_s25   ;;  %s8811_s24 = sphi %s8908_s24, %s12056_s24  }
  0x14   : > { %11803 = sst [smem:[#allocation19_spill]] %s8823_s27  ;;  %s5552_s13 = sadd.s32 4294967294, %s8851_s11  }
  0x15   : > { %11804 = sst [smem:[#allocation20_spill]] %s8835_s30  ;;  %p61_p0 = scmp.ne.s32.totalorder %s8827_s28, %s8823_s27 }
  0x16   : > { %11805 = sst [smem:[#allocation21_spill]] %s8839_s8  ;;  %p11680_p1 = scmp.eq.s32.totalorder %s8962_s12, 0 }
  0x17   : > { %11806 = sst [smem:[#allocation22_spill]] %s8843_s9  ;;  %p87_p2 = scmp.ne.s32.totalorder %s8815_s25, %s8811_s24 }
  0x18   : > { %p8971_p3 = por %p11680_p1, %p61_p0  ;;  %p229_p4 = scmp.eq.s32.totalorder %s5552_s13, 3 }
  0x19   : > { %p8977_p5 = por %p87_p2, %p11680_p1  ;;  %p5553_p6 = scmp.ge.s32.totalorder %s8851_s11, 1 }
  0x1a   : > { %s11807_s14 = scalar_select %p8971_p3, 1, 0 }
  0x1b   : > { %s11809_s15 = scalar_select %p8977_p5, 1, 0 }
  0x1c   : > { %11808 = sst [smem:[#allocation23_spill]] %s11807_s14  ;;  %p8982_p7 = por %p229_p4, %p61_p0 }
  0x1d   : > { %11810 = sst [smem:[#allocation24_spill]] %s11809_s15  ;;  %p236_p8 = scmp.lt.s32.totalorder %s8851_s11, 5 }
  0x1e   : > { %s11811_s16 = scalar_select %p8982_p7, 1, 0 }
  0x1f   : > { %p8987_p9 = pnand %p5553_p6, %p236_p8  ;;  %s8853_s18 = smov [#allocation10]  }
  0x20   : > { %11812 = sst [smem:[#allocation25_spill]] %s11811_s16  ;;  %s248_s19 = sshll.u32 %s8853_s18, 4  ;;  %s249_s19 = int_to_ptr.vmem [resolvable:$true] %s248_s19 }
  0x21   : > { %s11813_s17 = scalar_select %p8987_p9, 1, 0 }
  0x22   : > { %p7483_p10 = pneg %p8987_p9  ;;  %s11816_s3 = sld [smem:[#allocation70_spill]] }
  0x23   : > { %11814 = sst [smem:[#allocation26_spill]] %s11813_s17 }
  0x24   : > { %p8995_p11 = pnand %p7483_p10, %p11680_p1 }
  0x26   : > { %p11689_p0 = pneg %p8995_p11 }
  0x28   : > { %s8575_s23 = scalar_lea.hbm %s11816_s3, 6144 }
  0x29   : > { %p8576_p13 = scmp.ne.s32.totalorder %s11816_s3, %s8575_s23  ;;  %p8582_p6 = scmp.lt.u32.totalorder %s8575_s23, %s11816_s3 }
  0x2b   : > { %p8578_p2 = pnand %p11689_p0, %p8576_p13 }
  0x2d   : > { %p8579_p4 = pneg %p8578_p2 }
  0x2f   : > { %p8584_p8 = pnand %p8582_p6, %p8579_p4 }
  0x31   : > { %8587 = shalt.err (!%p8584_p8)
}
  0x32   : > { %s8588_s27 = scalar_lea.vmem %s249_s19, 6144  ;;  %p8596_p7 = scmp.lt.s32.totalorder %s249_s19, %s249_s19 }
  0x33   : > { %p8589_p10 = scmp.ne.s32.totalorder %s249_s19, %s8588_s27  ;;  %p8597_p5 = scmp.lt.s32.totalorder %s8588_s27, %s8588_s27 }
  0x35   : > { %p8591_p1 = pnand %p8589_p10, %p11689_p0  ;;  %p8598_p3 = por %p8597_p5, %p8596_p7 }
  0x37   : > { %p8592_p12 = pneg %p8591_p1 }
  0x39   : > { %p8599_p9 = pnand %p8598_p3, %p8592_p12 }
  0x3b   : > { %8602 = shalt.err (!%p8599_p9)
}
  0x3c   : > { %s8854_s21 = smov 384   ;;  %s8855_s16 = smov 24  }
  0x3d   : > { %7486 = dma.hbm_to_vmem [thread:$0]  (!%p8995_p11), %s11816_s3, 6144, %s249_s19, [#allocation11], %s8854_s21, %s8854_s21, %s8855_s16  }
  0x3e   : > { %p11688_p1 = scmp.eq.s32.totalorder %s8851_s11, 0  ;;  %p81_p3 = scmp.ne.s32.totalorder %s8819_s26, %s8815_s25 }
  0x3f   : > { %p11687_p5 = scmp.lt.s32.totalorder %s8851_s11, 4  ;;  %s304_s24 = sand.u32 1, %s8851_s11  }
  0x40   : > { %p83_p7 = por %p81_p3, %p11688_p1  ;;  %s306_s13 = sand.u32 1, %s8819_s26  }
  0x41   : > { %s9031_s18 = sshll.u32 %s306_s13, 8  ;;  %s11686_s7 = sshll.u32 %s8847_s10, 12 }
  0x42   : > { %s11817_s1 = sld [smem:[#allocation69_spill]]  ;;  %s308_s19 = scalar_lea.vmem [#allocation7], %s9031_s18 }
  0x43   : > { %s315_s21 = sshll.u32 %s308_s19, 4  ;;  %p9044_p9 = pnand %p11687_p5, %p83_p7  ;;  %s9049_s21 = int_to_ptr.vmem [resolvable:$true] %s315_s21 }
  0x44   : > { %s9051_s22 = scalar_lea.sflag [#allocation8], %s304_s24 }
  0x45   : > { %s11818_s16 = scalar_select %p9044_p9, 1, 0 }
  0x46   : > { %p11696_p13 = pneg %p9044_p9 }
  0x48   : > { %s9039_s4 = scalar_lea.hbm %s11817_s1, %s11686_s7  ;;  %s8608_s19 = scalar_lea.hbm %s11817_s1, 8192 }
  0x49   : > { %s8603_s6 = scalar_lea.hbm %s9039_s4, 4096  ;;  %p8609_p6 = scmp.lt.u32.totalorder %s9039_s4, %s11817_s1 }
  0x4a   : > { %p8604_p12 = scmp.ne.s32.totalorder %s9039_s4, %s8603_s6  ;;  %p8610_p8 = scmp.lt.u32.totalorder %s8608_s19, %s8603_s6 }
  0x4b   : > { %p8612_p3 = scmp.lt.u32.totalorder %s8603_s6, %s9039_s4 }
  0x4c   : > { %p8606_p2 = pnand %p11696_p13, %p8604_p12  ;;  %p8611_p10 = por %p8610_p8, %p8609_p6 }
  0x4e   : > { %p8607_p4 = pneg %p8606_p2  ;;  %p8613_p7 = por %p8612_p3, %p8611_p10 }
  0x50   : > { %p8614_p5 = pnand %p8613_p7, %p8607_p4 }
  0x52   : > { %8617 = shalt.err (!%p8614_p5)
}
  0x53   : > { %s8618_s24 = scalar_lea.vmem %s9049_s21, 4096  ;;  %s8856_s8 = smov [#allocation7]  }
  0x54   : > { %p8619_p12 = scmp.ne.s32.totalorder %s9049_s21, %s8618_s24  ;;  %s8623_s13 = sshll.u32 %s8856_s8, 4  ;;  %s8624_s13 = int_to_ptr.vmem [resolvable:$false] %s8623_s13 }
  0x55   : > { %s8625_s7 = scalar_lea.vmem %s8624_s13, 8192  ;;  %p8626_p0 = scmp.lt.s32.totalorder %s9049_s21, %s8624_s13 }
  0x56   : > { %p8621_p2 = pnand %p8619_p12, %p11696_p13  ;;  %p8627_p6 = scmp.lt.s32.totalorder %s8625_s7, %s8618_s24 }
  0x58   : > { %p8622_p1 = pneg %p8621_p2  ;;  %p8628_p8 = por %p8627_p6, %p8626_p0 }
  0x5a   : > { %p8629_p10 = pnand %p8628_p8, %p8622_p1 }
  0x5c   : > { %8632 = shalt.err (!%p8629_p10)
}
  0x5d   : > { %s11700_s23 = smov 128   ;;  %s11702_s6 = smov 8  }
  0x5e   : > { %7496 = dma.hbm_to_vmem [thread:$0]  (!%p9044_p9), %s9039_s4, 4096, %s9049_s21, %s9051_s22, %s11700_s23, %s11700_s23, %s11702_s6  }
  0x5f   : > { %s11819_s19 = sshll.u32 %s8847_s10, 12  ;;  %s329_s7 = scalar_lea.vmem [#allocation9], %s9031_s18 }
  0x60   : > { %s9087_s13 = scalar_lea.hbm %s11672_s2, %s11819_s19  ;;  %s336_s27 = sshll.u32 %s329_s7, 4  ;;  %s9113_s27 = int_to_ptr.vmem [resolvable:$true] %s336_s27 }
  0x61   : > { %s8859_s1 = smov [#allocation12]   ;;  %s11820_s5 = sld [smem:[#allocation72_spill]] }
  0x62   : > { %s264_s3 = sshll.u32 %s8859_s1, 4  ;;  %p11821_p1 = pneg %p8995_p11  ;;  %s265_s3 = int_to_ptr.vmem [resolvable:$true] %s264_s3 }
  0x67   : > { %s8633_s25 = scalar_lea.hbm %s11820_s5, 2048 }
  0x68   : > { %p8634_p0 = scmp.ne.s32.totalorder %s11820_s5, %s8633_s25  ;;  %p8640_p3 = scmp.lt.u32.totalorder %s8633_s25, %s11820_s5 }
  0x6a   : > { %p8636_p5 = pnand %p8634_p0, %p11821_p1 }
  0x6c   : > { %p8637_p4 = pneg %p8636_p5 }
  0x6e   : > { %p8642_p7 = pnand %p8640_p3, %p8637_p4 }
  0x70   : > { %8645 = shalt.err (!%p8642_p7)
}
  0x71   : > { %s8646_s1 = scalar_lea.vmem %s265_s3, 2048  ;;  %p11822_p2 = pmov %p11821_p1 }
  0x72   : > { %p8647_p12 = scmp.ne.s32.totalorder %s265_s3, %s8646_s1  ;;  %p8654_p10 = scmp.lt.s32.totalorder %s265_s3, %s265_s3 }
  0x73   : > { %p8655_p13 = scmp.lt.s32.totalorder %s8646_s1, %s8646_s1 }
  0x74   : > { %p8649_p6 = pnand %p8647_p12, %p11822_p2 }
  0x75   : > { %p8656_p9 = por %p8655_p13, %p8654_p10 }
  0x76   : > { %p8650_p8 = pneg %p8649_p6 }
  0x78   : > { %p8657_p0 = pnand %p8656_p9, %p8650_p8 }
  0x7a   : > { %8660 = shalt.err (!%p8657_p0)
}
  0x7b   : > { %7489 = dma.hbm_to_vmem [thread:$0]  (!%p8995_p11), %s11820_s5, 2048, %s265_s3, [#allocation11], %s11700_s23, %s11700_s23, %s11702_s6  }
  0x7c   : > { %s36_s14 = sadd.s32 1, %s8843_s9  ;;  %p55_p9 = scmp.ne.s32.totalorder %s8831_s29, %s8827_s28 }
  0x7d   : > { %p37_p13 = scmp.ge.s32.totalorder %s36_s14, 2  ;;  %s48_s15 = sadd.s32 1, %s8831_s29 }
  0x7e   : > { %p11823_p1 = scmp.eq.s32.totalorder %s8962_s12, 3  ;;  %s11699_s20 = sand.u32 1, %s8831_s29  }
  0x7f   : > { %s12067_s14 = smov (%p37_p13, %s36_s14), 0  ;;  %s11827_s18 = sadd.s32 1, %s8847_s10 }
  0x80   : > { %p9121_p5 = por %p11823_p1, %p55_p9  ;;  %11826 = sst [smem:[#allocation28_spill]] %s12067_s14 }
  0x81   : > { %s12069_s18 = smov (!%p37_p13, %s11827_s18), %s8847_s10  ;;  %s44_s3 = ssub.s32 %s8843_s9, %s12067_s14 }
  0x82   : > { %s11824_s17 = scalar_select %p9121_p5, 1, 0 }
  0x83   : > { %p11828_p11 = scmp.eq.s32.totalorder %s8851_s11, 0  ;;  %p41_p3 = scmp.ge.s32.totalorder %s12069_s18, 2 }
  0x84   : > { %11825 = sst [smem:[#allocation27_spill]] %s11824_s17  ;;  %s5557_s8 = sshll.u32 %s11699_s20, 7 }
  0x85   : > { %p9135_p4 = por %p11828_p11, %p55_p9  ;;  %s5558_s24 = sshll.u32 %s8843_s9, 4 }
  0x86   : > { %s12071_s18 = smov (%p41_p3, %s12069_s18), 0  ;;  %s5559_s7 = sshll.u32 %s8847_s10, 5 }
  0x87   : > { %s285_s4 = scalar_lea.vmem [#allocation4], %s5557_s8  ;;  %s43_s1 = ssub.s32 %s8847_s10, %s12071_s18 }
  0x88   : > { %s294_s21 = sshll.u32 %s285_s4, 4  ;;  %s291_s25 = sadd.s32 %s5559_s7, %s5558_s24  ;;  %s9160_s21 = int_to_ptr.vmem [resolvable:$true] %s294_s21 }
  0x89   : > { %s45_s30 = sor.u32 %s44_s3, %s43_s1  ;;  %p72_p7 = scmp.eq.s32.totalorder %s43_s1, 0 }
  0x8a   : > { %p46_p12 = scmp.eq.s32.totalorder %s45_s30, 0  ;;  %s5560_s20 = sshll.u32 %s291_s25, 7 }
  0x8b   : > { %s11830_s23 = sadd.s32 1, %s8819_s26  ;;  %s9158_s17 = scalar_lea.hbm %s11670_s0, %s5560_s20 }
  0x8c   : > { %s9150_s6 = scalar_select %p72_p7, %s8819_s26, %s11830_s23  }
  0x8d   : > { %s9153_s5 = scalar_select %p46_p12, %s8831_s29, %s48_s15  }
  0x8e   : > { %p11831_p2 = scmp.lt.s32.totalorder %s8851_s11, 4  ;;  %s8661_s8 = scalar_lea.hbm %s9087_s13, 4096 }
  0x8f   : > { %p8662_p8 = scmp.ne.s32.totalorder %s9087_s13, %s8661_s8  ;;  %p11833_p10 = scmp.ne.s32.totalorder %s11818_s16, 0 }
  0x90   : > { %p9166_p6 = pnand %p11831_p2, %p9135_p4  ;;  %s8666_s9 = scalar_lea.hbm %s11672_s2, 8192 }
  0x91   : > { %p11834_p0 = pneg %p11833_p10  ;;  %p8667_p1 = scmp.lt.u32.totalorder %s9087_s13, %s11672_s2 }
  0x92   : > { %p8668_p11 = scmp.lt.u32.totalorder %s8666_s9, %s8661_s8  ;;  %p8670_p4 = scmp.lt.u32.totalorder %s8661_s8, %s9087_s13 }
  0x93   : > { %p8664_p9 = pnand %p8662_p8, %p11834_p0 }
  0x94   : > { %p8669_p3 = por %p8668_p11, %p8667_p1 }
  0x95   : > { %p8665_p13 = pneg %p8664_p9 }
  0x96   : > { %p8671_p7 = por %p8670_p4, %p8669_p3 }
  0x98   : > { %p8672_p12 = pnand %p8671_p7, %p8665_p13 }
  0x9a   : > { %8675 = shalt.err (!%p8672_p12)
}
  0x9b   : > { %s8676_s19 = scalar_lea.vmem %s9113_s27, 4096  ;;  %p11835_p8 = pmov %p11834_p0 }
  0x9c   : > { %p8677_p2 = scmp.ne.s32.totalorder %s9113_s27, %s8676_s19  ;;  %s8860_s24 = smov [#allocation9]  }
  0x9d   : > { %s8681_s7 = sshll.u32 %s8860_s24, 4  ;;  %s8682_s7 = int_to_ptr.vmem [resolvable:$false] %s8681_s7 }
  0x9e   : > { %p8679_p0 = pnand %p8677_p2, %p11835_p8  ;;  %s8683_s4 = scalar_lea.vmem %s8682_s7, 8192 }
  0x9f   : > { %p8684_p5 = scmp.lt.s32.totalorder %s9113_s27, %s8682_s7  ;;  %p8685_p1 = scmp.lt.s32.totalorder %s8683_s4, %s8676_s19 }
  0xa0   : > { %p8680_p9 = pneg %p8679_p0 }
  0xa1   : > { %p8686_p11 = por %p8685_p1, %p8684_p5 }
  0xa3   : > { %p8687_p3 = pnand %p8686_p11, %p8680_p9 }
  0xa5   : > { %8690 = shalt.err (!%p8687_p3)
}
  0xa6   : > { %s11836_s1 = smov 8   ;;  %s11837_s25 = smov 128  }
  0xa7   : > { %7499 = dma.hbm_to_vmem [thread:$0]  (!%p11833_p10), %s9087_s13, 4096, %s9113_s27, %s9051_s22, %s11837_s25, %s11837_s25, %s11836_s1  }
  0xa8   : > { %s11838_s30 = sand.u32 1, %s8831_s29   ;;  %s8691_s23 = scalar_lea.hbm %s9158_s17, 2048 }
  0xa9   : > { %s9199_s8 = scalar_lea.sflag [#allocation5], %s11838_s30  ;;  %p8692_p5 = scmp.ne.s32.totalorder %s9158_s17, %s8691_s23 }
  0xaa   : > { %p8693_p13 = pneg %p9166_p6  ;;  %s8696_s9 = scalar_lea.hbm %s11670_s0, 8192 }
  0xab   : > { %p8697_p12 = scmp.lt.u32.totalorder %s9158_s17, %s11670_s0  ;;  %p8698_p10 = scmp.lt.u32.totalorder %s8696_s9, %s8691_s23 }
  0xac   : > { %p8694_p4 = pnand %p8693_p13, %p8692_p5  ;;  %p8700_p8 = scmp.lt.u32.totalorder %s8691_s23, %s9158_s17 }
  0xad   : > { %p8699_p2 = por %p8698_p10, %p8697_p12 }
  0xae   : > { %p8695_p7 = pneg %p8694_p4 }
  0xaf   : > { %p8701_p0 = por %p8700_p8, %p8699_p2 }
  0xb1   : > { %p8702_p9 = pnand %p8701_p0, %p8695_p7 }
  0xb3   : > { %8705 = shalt.err (!%p8702_p9)
}
  0xb4   : > { %s8706_s27 = scalar_lea.vmem %s9160_s21, 2048  ;;  %s8861_s22 = smov [#allocation4]  }
  0xb5   : > { %p8707_p1 = scmp.ne.s32.totalorder %s9160_s21, %s8706_s27  ;;  %s8711_s13 = sshll.u32 %s8861_s22, 4  ;;  %s8712_s13 = int_to_ptr.vmem [resolvable:$false] %s8711_s13 }
  0xb6   : > { %s8713_s19 = scalar_lea.vmem %s8712_s13, 4096  ;;  %p8714_p5 = scmp.lt.s32.totalorder %s9160_s21, %s8712_s13 }
  0xb7   : > { %p8709_p11 = pnand %p8707_p1, %p8693_p13  ;;  %p8715_p4 = scmp.lt.s32.totalorder %s8713_s19, %s8706_s27 }
  0xb9   : > { %p8710_p3 = pneg %p8709_p11  ;;  %p8716_p12 = por %p8715_p4, %p8714_p5 }
  0xbb   : > { %p8717_p10 = pnand %p8716_p12, %p8710_p3 }
  0xbd   : > { %8720 = shalt.err (!%p8717_p10)
}
  0xbe   : > { %7493 = dma.hbm_to_vmem [thread:$0]  (!%p9166_p6), %s9158_s17, 2048, %s9160_s21, %s9199_s8, %s11837_s25, %s11837_s25, %s11836_s1  }
  0xbf   : > { %s11839_s24 = sld [smem:[#allocation26_spill]] }
  0xc5   : > { %p11840_p13 = scmp.ne.s32.totalorder %s11839_s24, 0 }
  0xc7   : > { %348 = sbr.rel (%p11840_p13) target bundleno = 3260 (0xcbc), region = 48 }
  0xce   : > { %s11841_s7 = sld [smem:[#allocation23_spill]]  ;;  %s9233_s4 = sand.u32 1, %s8827_s28  }
  0xcf   : > { %s5568_s30 = sshll.u32 %s9233_s4, 7  ;;  %s351_s23 = scalar_lea.sflag [#allocation5], %s9233_s4 }
  0xd0   : > { %s9237_s16 = scalar_lea.vmem [#allocation4], %s5568_s30 }
  0xd4   : > { %p11842_p7 = scmp.ne.s32.totalorder %s11841_s7, 0 }
  0xd6   : > { %8794 = dma.done.wait (%p11842_p7), %s351_s23, 2048  }
  0xd7   : > { %8796 = vsyncadd (%p11842_p7), %s351_s23, 4294965248  ;;  %s11843_s17 = sld [smem:[#allocation18_spill]]  ;;  %s11844_s21 = sld [smem:[#allocation24_spill]] }
  0xd8   : > { %s359_s3 = sand.u32 1, %s8962_s12  }
  0xd9   : > { %s360_s8 = scalar_lea.sflag [#allocation8], %s359_s3 }
  0xdd   : > { %s361_s1 = sand.u32 1, %s11843_s17   ;;  %p11845_p6 = scmp.ne.s32.totalorder %s11844_s21, 0 }
  0xde   : > { %s5569_s25 = sshll.u32 %s361_s1, 8 }
  0xdf   : > { %s9245_s15 = scalar_lea.vmem [#allocation7], %s5569_s25 }
  0xe0   : > { %8798 = dma.done.wait (%p11845_p6), %s360_s8, 8192  }
  0xe1   : > { %8800 = vsyncadd (%p11845_p6), %s360_s8, 4294959104  ;;  %s9251_s9 = scalar_lea.vmem [#allocation9], %s5569_s25  ;;  %p11846_p2 = scmp.eq.s32.totalorder %s8962_s12, 0 }
  0xe3   : > { %8802 = dma.done.wait (%p11846_p2), [#allocation11], 8192   ;;  %p11847_p8 = pmov %p11846_p2 }
  0xe4   : > { %s9257_s14 = scalar_lea.vmem [#allocation13], %s5568_s30  ;;  %s11848_s20 = sld [smem:[#allocation20_spill]] }
  0xe5   : > { %8804 = vsyncadd (%p11847_p8), [#allocation11], 4294959104 }
  0xea   : > { %p5574_p0 = scmp.ne.s32.totalorder %s11848_s20, 0 }
  0xeb   : > { %v491_v0 = vld [vmem:[#allocation10 + $0x8] sm:$0xff] (!%p5574_p0)  ;;  %v492_v1 = vld [vmem:[#allocation10 + $0x20] sm:$0xff] (!%p5574_p0)  ;;  %v739_v2 = vld [vmem:[#allocation10 + $0x10] sm:$0xff] (!%p5574_p0)  ;;  %s11849_s22 = sld [smem:[#allocation71_spill]] (!%p5574_p0) }
  0xec   : > { %426 = sbr.rel (%p5574_p0) target bundleno = 547 (0x223), region = 72  ;;  %v6971_v3 = vpack.c.bf16 (!%p5574_p0), %v492_v1, %v491_v0  ;;  %v740_v4 = vld [vmem:[#allocation10 + $0x28] sm:$0xff] (!%p5574_p0)  ;;  %v493_v5 = vld [vmem:[#allocation10 + $0x38] sm:$0xff] (!%p5574_p0)  ;;  %v494_v6 = vld [vmem:[#allocation10 + $0x50] sm:$0xff] (!%p5574_p0) }
  0xed   : > { %v7003_v7 = vpack.c.bf16 (!%p5574_p0), %v740_v4, %v739_v2  ;;  %v6975_v8 = vpack.c.bf16 (!%p5574_p0), %v494_v6, %v493_v5  ;;  %v741_v9 = vld [vmem:[#allocation10 + $0x40] sm:$0xff] (!%p5574_p0)  ;;  %v742_v10 = vld [vmem:[#allocation10 + $0x58] sm:$0xff] (!%p5574_p0)  ;;  %v495_v11 = vld [vmem:[#allocation10 + $0x68] sm:$0xff] (!%p5574_p0) }
  0xee   : > { %6972 = vmatprep.subr.bf16.mxu0 (!%p5574_p0), %v6971_v3  ;;  %v7007_v12 = vpack.c.bf16 (!%p5574_p0), %v742_v10, %v741_v9  ;;  %v496_v13 = vld [vmem:[#allocation10 + $0x80] sm:$0xff] (!%p5574_p0)  ;;  %v743_v14 = vld [vmem:[#allocation10 + $0x70] sm:$0xff] (!%p5574_p0)  ;;  %v744_v15 = vld [vmem:[#allocation10 + $0x88] sm:$0xff] (!%p5574_p0) }
  0xef   : > { %7004 = vmatprep.subr.bf16.mxu1 (!%p5574_p0), %v7003_v7  ;;  %6974 = vmatpush3.bf16.msra.mxu0 (!%p5574_p0), %v6971_v3  ;;  %v6979_v16 = vpack.c.bf16 (!%p5574_p0), %v496_v13, %v495_v11  ;;  %v7011_v17 = vpack.c.bf16 (!%p5574_p0), %v744_v15, %v743_v14  ;;  %v497_v18 = vld [vmem:[#allocation10 + $0x98] sm:$0xff] (!%p5574_p0)  ;;  %v498_v19 = vld [vmem:[#allocation10 + $0xb0] sm:$0xff] (!%p5574_p0)  ;;  %v745_v20 = vld [vmem:[#allocation10 + $0xa0] sm:$0xff] (!%p5574_p0) }
  0xf0   : > { %7006 = vmatpush3.bf16.msra.mxu1 (!%p5574_p0), %v7003_v7  ;;  %6976 = vmatprep.subr.bf16.mxu0 (!%p5574_p0), %v6975_v8  ;;  %v746_v21 = vld [vmem:[#allocation10 + $0xb8] sm:$0xff] (!%p5574_p0)  ;;  %v6983_v22 = vpack.c.bf16 (!%p5574_p0), %v498_v19, %v497_v18  ;;  %v499_v24 = vld [vmem:[#allocation10 + $0xc8] sm:$0xff] (!%p5574_p0)  ;;  %v500_v25 = vld [vmem:[#allocation10 + $0xe0] sm:$0xff] (!%p5574_p0) }
  0xf1   : > { %7008 = vmatprep.subr.bf16.mxu1 (!%p5574_p0), %v7007_v12  ;;  %v7015_v23 = vpack.c.bf16 (!%p5574_p0), %v746_v21, %v745_v20  ;;  %v427_v26 = vld [vmem:[%s9245_s15] sm:$0xff] (!%p5574_p0)  ;;  %v747_v27 = vld [vmem:[#allocation10 + $0xd0] sm:$0xff] (!%p5574_p0)  ;;  %v748_v28 = vld [vmem:[#allocation10 + $0xe8] sm:$0xff] (!%p5574_p0)  ;;  %v6987_v30 = vpack.c.bf16 (!%p5574_p0), %v500_v25, %v499_v24 }
  0xf2   : > { %6659 = vmatprep.mubr.f32.mxu0 (!%p5574_p0), %v427_v26  ;;  %v459_v29 = vld [vmem:[%s9251_s9] sm:$0xff] (!%p5574_p0)  ;;  %v7019_v31 = vpack.c.bf16 (!%p5574_p0), %v748_v28, %v747_v27  ;;  %v501_v32 = vld [vmem:[#allocation10 + $0xf8] sm:$0xff] (!%p5574_p0)  ;;  %v502_v33 = vld [vmem:[#allocation10 + $0x110] sm:$0xff] (!%p5574_p0) }
  0xf3   : > { %6978 = vmatpush3.bf16.msra.mxu0 %v6975_v8  ;;  %6739 = vmatprep.mubr.f32.mxu1 %v459_v29  ;;  %v749_v34 = vld [vmem:[#allocation10 + $0x100] sm:$0xff]  ;;  %v750_v35 = vld [vmem:[#allocation10 + $0x118] sm:$0xff]  ;;  %v6991_v36 = vpack.c.bf16 %v502_v33, %v501_v32  ;;  %v503_v38 = vld [vmem:[#allocation10 + $0x128] sm:$0xff] }
  0xf4   : > { %7010 = vmatpush3.bf16.msra.mxu1 %v7007_v12  ;;  %6980 = vmatprep.subr.bf16.mxu0 %v6979_v16  ;;  %v7023_v37 = vpack.c.bf16 %v750_v35, %v749_v34  ;;  %v504_v39 = vld [vmem:[#allocation10 + $0x140] sm:$0xff]  ;;  %v751_v40 = vld [vmem:[#allocation10 + $0x130] sm:$0xff]  ;;  %v752_v41 = vld [vmem:[#allocation10 + $0x148] sm:$0xff] }
  0xf5   : > { %7012 = vmatprep.subr.bf16.mxu1 %v7011_v17  ;;  %v6995_v42 = vpack.c.bf16 %v504_v39, %v503_v38  ;;  %v7027_v43 = vpack.c.bf16 %v752_v41, %v751_v40  ;;  %v505_v44 = vld [vmem:[#allocation10 + $0x158] sm:$0xff]  ;;  %v506_v45 = vld [vmem:[#allocation10 + $0x170] sm:$0xff]  ;;  %v753_v46 = vld [vmem:[#allocation10 + $0x160] sm:$0xff] }
  0xf6   : > { %v754_v47 = vld [vmem:[#allocation10 + $0x178] sm:$0xff]  ;;  %v6999_v48 = vpack.c.bf16 %v506_v45, %v505_v44  ;;  %v428_v50 = vld [vmem:[%s9245_s15 + $0x8] sm:$0xff]  ;;  %v429_v52 = vld [vmem:[%s9245_s15 + $0x10] sm:$0xff] }
  0xf7   : > { %6982 = vmatpush3.bf16.msra.mxu0 %v6979_v16  ;;  %v7031_v49 = vpack.c.bf16 %v754_v47, %v753_v46  ;;  %v460_v51 = vld [vmem:[%s9251_s9 + $0x8] sm:$0xff]  ;;  %v461_v53 = vld [vmem:[%s9251_s9 + $0x10] sm:$0xff]  ;;  %v430_v54 = vld [vmem:[%s9245_s15 + $0x18] sm:$0xff] }
  0xf8   : > { %7014 = vmatpush3.bf16.msra.mxu1 %v7011_v17  ;;  %6984 = vmatprep.subr.bf16.mxu0 %v6983_v22  ;;  %v462_v55 = vld [vmem:[%s9251_s9 + $0x18] sm:$0xff]  ;;  %v431_v56 = vld [vmem:[%s9245_s15 + $0x20] sm:$0xff]  ;;  %v432_v58 = vld [vmem:[%s9245_s15 + $0x28] sm:$0xff] }
  0xf9   : > { %7016 = vmatprep.subr.bf16.mxu1 %v7015_v23  ;;  %v463_v57 = vld [vmem:[%s9251_s9 + $0x20] sm:$0xff]  ;;  %v464_v59 = vld [vmem:[%s9251_s9 + $0x28] sm:$0xff]  ;;  %v433_v60 = vld [vmem:[%s9245_s15 + $0x30] sm:$0xff] }
  0xfa   : > { %v465_v61 = vld [vmem:[%s9251_s9 + $0x30] sm:$0xff]  ;;  %v434_v62 = vld [vmem:[%s9245_s15 + $0x38] sm:$0xff]  ;;  %v435_v0 = vld [vmem:[%s9245_s15 + $0x40] sm:$0xff] }
  0xfb   : > { %6986 = vmatpush3.bf16.msra.mxu0 %v6983_v22  ;;  %v466_v63 = vld [vmem:[%s9251_s9 + $0x38] sm:$0xff]  ;;  %v467_v1 = vld [vmem:[%s9251_s9 + $0x40] sm:$0xff]  ;;  %v436_v2 = vld [vmem:[%s9245_s15 + $0x48] sm:$0xff] }
  0xfc   : > { %7018 = vmatpush3.bf16.msra.mxu1 %v7015_v23  ;;  %6988 = vmatprep.subr.bf16.mxu0 %v6987_v30  ;;  %v468_v3 = vld [vmem:[%s9251_s9 + $0x48] sm:$0xff]  ;;  %v437_v4 = vld [vmem:[%s9245_s15 + $0x50] sm:$0xff]  ;;  %v438_v6 = vld [vmem:[%s9245_s15 + $0x58] sm:$0xff] }
  0xfd   : > { %7020 = vmatprep.subr.bf16.mxu1 %v7019_v31  ;;  %v469_v5 = vld [vmem:[%s9251_s9 + $0x50] sm:$0xff]  ;;  %v470_v7 = vld [vmem:[%s9251_s9 + $0x58] sm:$0xff]  ;;  %v439_v8 = vld [vmem:[%s9245_s15 + $0x60] sm:$0xff] }
  0xfe   : > { %v471_v9 = vld [vmem:[%s9251_s9 + $0x60] sm:$0xff]  ;;  %v440_v10 = vld [vmem:[%s9245_s15 + $0x68] sm:$0xff]  ;;  %v441_v12 = vld [vmem:[%s9245_s15 + $0x70] sm:$0xff] }
  0xff   : > { %6990 = vmatpush3.bf16.msra.mxu0 %v6987_v30  ;;  %v472_v11 = vld [vmem:[%s9251_s9 + $0x68] sm:$0xff]  ;;  %v473_v13 = vld [vmem:[%s9251_s9 + $0x70] sm:$0xff]  ;;  %v442_v14 = vld [vmem:[%s9245_s15 + $0x78] sm:$0xff] }
 0x100   : > { %7022 = vmatpush3.bf16.msra.mxu1 %v7019_v31  ;;  %6992 = vmatprep.subr.bf16.mxu0 %v6991_v36  ;;  %v474_v15 = vld [vmem:[%s9251_s9 + $0x78] sm:$0xff]  ;;  %v443_v16 = vld [vmem:[%s9245_s15 + $0x80] sm:$0xff]  ;;  %v444_v18 = vld [vmem:[%s9245_s15 + $0x88] sm:$0xff] }
 0x101   : > { %7024 = vmatprep.subr.bf16.mxu1 %v7023_v37  ;;  %v475_v17 = vld [vmem:[%s9251_s9 + $0x80] sm:$0xff]  ;;  %v476_v19 = vld [vmem:[%s9251_s9 + $0x88] sm:$0xff]  ;;  %v445_v20 = vld [vmem:[%s9245_s15 + $0x90] sm:$0xff] }
 0x102   : > { %v477_v21 = vld [vmem:[%s9251_s9 + $0x90] sm:$0xff]  ;;  %v446_v22 = vld [vmem:[%s9245_s15 + $0x98] sm:$0xff]  ;;  %v447_v24 = vld [vmem:[%s9245_s15 + $0xa0] sm:$0xff] }
 0x103   : > { %6994 = vmatpush3.bf16.msra.mxu0 %v6991_v36  ;;  %v478_v23 = vld [vmem:[%s9251_s9 + $0x98] sm:$0xff]  ;;  %v479_v25 = vld [vmem:[%s9251_s9 + $0xa0] sm:$0xff]  ;;  %v448_v26 = vld [vmem:[%s9245_s15 + $0xa8] sm:$0xff] }
 0x104   : > { %7026 = vmatpush3.bf16.msra.mxu1 %v7023_v37  ;;  %6996 = vmatprep.subr.bf16.mxu0 %v6995_v42  ;;  %v480_v27 = vld [vmem:[%s9251_s9 + $0xa8] sm:$0xff]  ;;  %v449_v28 = vld [vmem:[%s9245_s15 + $0xb0] sm:$0xff]  ;;  %v450_v30 = vld [vmem:[%s9245_s15 + $0xb8] sm:$0xff] }
 0x105   : > { %7028 = vmatprep.subr.bf16.mxu1 %v7027_v43  ;;  %v481_v29 = vld [vmem:[%s9251_s9 + $0xb0] sm:$0xff]  ;;  %v482_v31 = vld [vmem:[%s9251_s9 + $0xb8] sm:$0xff]  ;;  %v451_v32 = vld [vmem:[%s9245_s15 + $0xc0] sm:$0xff] }
 0x106   : > { %v483_v33 = vld [vmem:[%s9251_s9 + $0xc0] sm:$0xff]  ;;  %v452_v34 = vld [vmem:[%s9245_s15 + $0xc8] sm:$0xff]  ;;  %v453_v36 = vld [vmem:[%s9245_s15 + $0xd0] sm:$0xff] }
 0x107   : > { %6998 = vmatpush3.bf16.msra.mxu0 %v6995_v42  ;;  %v484_v35 = vld [vmem:[%s9251_s9 + $0xc8] sm:$0xff]  ;;  %v485_v37 = vld [vmem:[%s9251_s9 + $0xd0] sm:$0xff]  ;;  %v454_v38 = vld [vmem:[%s9245_s15 + $0xd8] sm:$0xff] }
 0x108   : > { %7030 = vmatpush3.bf16.msra.mxu1 %v7027_v43  ;;  %7000 = vmatprep.subr.bf16.mxu0 %v6999_v48  ;;  %v486_v39 = vld [vmem:[%s9251_s9 + $0xd8] sm:$0xff]  ;;  %v455_v40 = vld [vmem:[%s9245_s15 + $0xe0] sm:$0xff]  ;;  %v456_v42 = vld [vmem:[%s9245_s15 + $0xe8] sm:$0xff] }
 0x109   : > { %7032 = vmatprep.subr.bf16.mxu1 %v7031_v49  ;;  %v487_v41 = vld [vmem:[%s9251_s9 + $0xe0] sm:$0xff]  ;;  %v488_v43 = vld [vmem:[%s9251_s9 + $0xe8] sm:$0xff]  ;;  %v457_v44 = vld [vmem:[%s9245_s15 + $0xf0] sm:$0xff] }
 0x10a   : > { %v489_v45 = vld [vmem:[%s9251_s9 + $0xf0] sm:$0xff]  ;;  %v458_v46 = vld [vmem:[%s9245_s15 + $0xf8] sm:$0xff] }
 0x10b   : > { %7002 = vmatpush3.bf16.msra.mxu0 %v6999_v48  ;;  %v490_v47 = vld [vmem:[%s9251_s9 + $0xf8] sm:$0xff]  ;;  %v9327_v48 = vld [vmem:[%s11849_s22 + $0x1] ss:$0 sm:$0xff] }
 0x10c   : > { %7034 = vmatpush3.bf16.msra.mxu1 %v7031_v49  ;;  %v9332_v49 = vld [vmem:[%s11849_s22 + $0x2] ss:$0 sm:$0xff] }
 0x10e   : > { %6660 = vmatmul.mubr.f32.vlgmr.msra.gmra.mrb[0].mxu0 %v428_v50 }
 0x10f   : > { %6740 = vmatmul.mubr.f32.vlgmr.msra.gmra.mrb[0].mxu1 %v460_v51  ;;  %6662 = vmatprep.mubr.f32.mxu0 %v429_v52 }
 0x110   : > { %6742 = vmatprep.mubr.f32.mxu1 %v461_v53 }
 0x112   : > { %6663 = vmatmul.mubr.f32.gmra.mrb[2].mxu0 %v430_v54 }
 0x113   : > { %6743 = vmatmul.mubr.f32.gmra.mrb[2].mxu1 %v462_v55  ;;  %6665 = vmatprep.mubr.f32.mxu0 %v431_v56 }
 0x114   : > { %6745 = vmatprep.mubr.f32.mxu1 %v463_v57 }
 0x116   : > { %6666 = vmatmul.mubr.f32.gmra.mrb[4].mxu0 %v432_v58 }
 0x117   : > { %6746 = vmatmul.mubr.f32.gmra.mrb[4].mxu1 %v464_v59  ;;  %6668 = vmatprep.mubr.f32.mxu0 %v433_v60 }
 0x118   : > { %6748 = vmatprep.mubr.f32.mxu1 %v465_v61 }
 0x11a   : > { %6669 = vmatmul.mubr.f32.gmra.mrb[6].mxu0 %v434_v62 }
 0x11b   : > { %6749 = vmatmul.mubr.f32.gmra.mrb[6].mxu1 %v466_v63  ;;  %6671 = vmatprep.mubr.f32.mxu0 %v435_v0 }
 0x11c   : > { %6751 = vmatprep.mubr.f32.mxu1 %v467_v1 }
 0x11e   : > { %6672 = vmatmul.mubr.f32.gmra.mrb[8].mxu0 %v436_v2 }
 0x11f   : > { %6752 = vmatmul.mubr.f32.gmra.mrb[8].mxu1 %v468_v3  ;;  %6674 = vmatprep.mubr.f32.mxu0 %v437_v4 }
 0x120   : > { %6754 = vmatprep.mubr.f32.mxu1 %v469_v5 }
 0x122   : > { %6675 = vmatmul.mubr.f32.gmra.mrb[10].mxu0 %v438_v6 }
 0x123   : > { %6755 = vmatmul.mubr.f32.gmra.mrb[10].mxu1 %v470_v7  ;;  %6677 = vmatprep.mubr.f32.mxu0 %v439_v8 }
 0x124   : > { %6757 = vmatprep.mubr.f32.mxu1 %v471_v9 }
 0x126   : > { %6678 = vmatmul.mubr.f32.gmra.mrb[12].mxu0 %v440_v10 }
 0x127   : > { %6758 = vmatmul.mubr.f32.gmra.mrb[12].mxu1 %v472_v11  ;;  %6680 = vmatprep.mubr.f32.mxu0 %v441_v12 }
 0x128   : > { %6760 = vmatprep.mubr.f32.mxu1 %v473_v13 }
 0x12a   : > { %6681 = vmatmul.mubr.f32.gmra.mrb[14].mxu0 %v442_v14 }
 0x12b   : > { %6761 = vmatmul.mubr.f32.gmra.mrb[14].mxu1 %v474_v15  ;;  %6683 = vmatprep.mubr.f32.mxu0 %v443_v16 }
 0x12c   : > { %6763 = vmatprep.mubr.f32.mxu1 %v475_v17 }
 0x12e   : > { %6684 = vmatmul.mubr.f32.gmra.mrb[16].mxu0 %v444_v18 }
 0x12f   : > { %6764 = vmatmul.mubr.f32.gmra.mrb[16].mxu1 %v476_v19  ;;  %6686 = vmatprep.mubr.f32.mxu0 %v445_v20 }
 0x130   : > { %6766 = vmatprep.mubr.f32.mxu1 %v477_v21 }
 0x132   : > { %6687 = vmatmul.mubr.f32.gmra.mrb[18].mxu0 %v446_v22 }
 0x133   : > { %6767 = vmatmul.mubr.f32.gmra.mrb[18].mxu1 %v478_v23  ;;  %6689 = vmatprep.mubr.f32.mxu0 %v447_v24 }
 0x134   : > { %6769 = vmatprep.mubr.f32.mxu1 %v479_v25 }
 0x136   : > { %6690 = vmatmul.mubr.f32.gmra.mrb[20].mxu0 %v448_v26 }
 0x137   : > { %6770 = vmatmul.mubr.f32.gmra.mrb[20].mxu1 %v480_v27  ;;  %6692 = vmatprep.mubr.f32.mxu0 %v449_v28 }
 0x138   : > { %6772 = vmatprep.mubr.f32.mxu1 %v481_v29 }
 0x13a   : > { %6693 = vmatmul.mubr.f32.gmra.mrb[22].mxu0 %v450_v30 }
 0x13b   : > { %6773 = vmatmul.mubr.f32.gmra.mrb[22].mxu1 %v482_v31  ;;  %6695 = vmatprep.mubr.f32.mxu0 %v451_v32 }
 0x13c   : > { %6775 = vmatprep.mubr.f32.mxu1 %v483_v33 }
 0x13e   : > { %6696 = vmatmul.mubr.f32.gmra.mrb[24].mxu0 %v452_v34 }
 0x13f   : > { %6776 = vmatmul.mubr.f32.gmra.mrb[24].mxu1 %v484_v35  ;;  %6698 = vmatprep.mubr.f32.mxu0 %v453_v36 }
 0x140   : > { %6778 = vmatprep.mubr.f32.mxu1 %v485_v37 }
 0x142   : > { %6699 = vmatmul.mubr.f32.gmra.mrb[26].mxu0 %v454_v38 }
 0x143   : > { %6779 = vmatmul.mubr.f32.gmra.mrb[26].mxu1 %v486_v39  ;;  %6701 = vmatprep.mubr.f32.mxu0 %v455_v40 }
 0x144   : > { %6781 = vmatprep.mubr.f32.mxu1 %v487_v41 }
 0x146   : > { %6702 = vmatmul.mubr.f32.gmra.mrb[28].mxu0 %v456_v42 }
 0x147   : > { %6782 = vmatmul.mubr.f32.gmra.mrb[28].mxu1 %v488_v43  ;;  %6704 = vmatprep.mubr.f32.mxu0 %v457_v44 }
 0x148   : > { %6784 = vmatprep.mubr.f32.mxu1 %v489_v45 }
 0x14a   : > { %6705 = vmatmul.mubr.f32.gmra.mrb[30].mxu0 %v458_v46 }
 0x14b   : > { %6785 = vmatmul.mubr.f32.gmra.mrb[30].mxu1 %v490_v47 }
 0x1e1   : > { %v6661_v50 = vpop.f32.mrb[0].mxu0 }
 0x1e2   : > { %v586_v51 = vadd.f32 %v6661_v50, %v9327_v48  ;;  %v6741_v52 = vpop.f32.mrb[0].mxu1  ;;  %v580_v53 = vpop.f32.mrb[1].mxu0 }
 0x1e3   : > { %v834_v54 = vadd.f32 %v6741_v52, %v9332_v49  ;;  %v581_v55 = vadd.f32 %v9327_v48, %v580_v53  ;;  %v828_v56 = vpop.f32.mrb[1].mxu1 }
 0x1e4   : > { %988 = vst [vmem:[#allocation2 + $0x8] sm:$0xff] %v586_v51  ;;  %v829_v57 = vadd.f32 %v9332_v49, %v828_v56 }
 0x1e5   : > { %1020 = vst [vmem:[#allocation3 + $0x8] sm:$0xff] %v834_v54  ;;  %987 = vst [vmem:[#allocation2] sm:$0xff] %v581_v55  ;;  %v6664_v58 = vpop.f32.mrb[2].mxu0 }
 0x1e6   : > { %1019 = vst [vmem:[#allocation3] sm:$0xff] %v829_v57  ;;  %v596_v59 = vadd.f32 %v6664_v58, %v9327_v48  ;;  %v6744_v60 = vpop.f32.mrb[2].mxu1  ;;  %v590_v61 = vpop.f32.mrb[3].mxu0 }
 0x1e7   : > { %v844_v62 = vadd.f32 %v6744_v60, %v9332_v49  ;;  %v591_v63 = vadd.f32 %v9327_v48, %v590_v61  ;;  %v838_v0 = vpop.f32.mrb[3].mxu1 }
 0x1e8   : > { %990 = vst [vmem:[#allocation2 + $0x18] sm:$0xff] %v596_v59  ;;  %v839_v1 = vadd.f32 %v9332_v49, %v838_v0 }
 0x1e9   : > { %1022 = vst [vmem:[#allocation3 + $0x18] sm:$0xff] %v844_v62  ;;  %989 = vst [vmem:[#allocation2 + $0x10] sm:$0xff] %v591_v63  ;;  %v6667_v2 = vpop.f32.mrb[4].mxu0 }
 0x1ea   : > { %1021 = vst [vmem:[#allocation3 + $0x10] sm:$0xff] %v839_v1  ;;  %v606_v3 = vadd.f32 %v6667_v2, %v9327_v48  ;;  %v6747_v4 = vpop.f32.mrb[4].mxu1  ;;  %v600_v5 = vpop.f32.mrb[5].mxu0 }
 0x1eb   : > { %v854_v6 = vadd.f32 %v6747_v4, %v9332_v49  ;;  %v601_v7 = vadd.f32 %v9327_v48, %v600_v5  ;;  %v848_v8 = vpop.f32.mrb[5].mxu1 }
 0x1ec   : > { %992 = vst [vmem:[#allocation2 + $0x28] sm:$0xff] %v606_v3  ;;  %v849_v9 = vadd.f32 %v9332_v49, %v848_v8 }
 0x1ed   : > { %1024 = vst [vmem:[#allocation3 + $0x28] sm:$0xff] %v854_v6  ;;  %991 = vst [vmem:[#allocation2 + $0x20] sm:$0xff] %v601_v7  ;;  %v6670_v10 = vpop.f32.mrb[6].mxu0 }
 0x1ee   : > { %1023 = vst [vmem:[#allocation3 + $0x20] sm:$0xff] %v849_v9  ;;  %v616_v11 = vadd.f32 %v6670_v10, %v9327_v48  ;;  %v6750_v12 = vpop.f32.mrb[6].mxu1  ;;  %v610_v13 = vpop.f32.mrb[7].mxu0 }
 0x1ef   : > { %v864_v14 = vadd.f32 %v6750_v12, %v9332_v49  ;;  %v611_v15 = vadd.f32 %v9327_v48, %v610_v13  ;;  %v858_v16 = vpop.f32.mrb[7].mxu1 }
 0x1f0   : > { %994 = vst [vmem:[#allocation2 + $0x38] sm:$0xff] %v616_v11  ;;  %v859_v17 = vadd.f32 %v9332_v49, %v858_v16 }
 0x1f1   : > { %1026 = vst [vmem:[#allocation3 + $0x38] sm:$0xff] %v864_v14  ;;  %993 = vst [vmem:[#allocation2 + $0x30] sm:$0xff] %v611_v15  ;;  %v6673_v18 = vpop.f32.mrb[8].mxu0 }
 0x1f2   : > { %1025 = vst [vmem:[#allocation3 + $0x30] sm:$0xff] %v859_v17  ;;  %v626_v19 = vadd.f32 %v6673_v18, %v9327_v48  ;;  %v6753_v20 = vpop.f32.mrb[8].mxu1  ;;  %v620_v21 = vpop.f32.mrb[9].mxu0 }
 0x1f3   : > { %v874_v22 = vadd.f32 %v6753_v20, %v9332_v49  ;;  %v621_v23 = vadd.f32 %v9327_v48, %v620_v21  ;;  %v868_v24 = vpop.f32.mrb[9].mxu1 }
 0x1f4   : > { %996 = vst [vmem:[#allocation2 + $0x48] sm:$0xff] %v626_v19  ;;  %v869_v25 = vadd.f32 %v9332_v49, %v868_v24 }
 0x1f5   : > { %1028 = vst [vmem:[#allocation3 + $0x48] sm:$0xff] %v874_v22  ;;  %995 = vst [vmem:[#allocation2 + $0x40] sm:$0xff] %v621_v23  ;;  %v6676_v26 = vpop.f32.mrb[10].mxu0 }
 0x1f6   : > { %1027 = vst [vmem:[#allocation3 + $0x40] sm:$0xff] %v869_v25  ;;  %v636_v27 = vadd.f32 %v6676_v26, %v9327_v48  ;;  %v6756_v28 = vpop.f32.mrb[10].mxu1  ;;  %v630_v29 = vpop.f32.mrb[11].mxu0 }
 0x1f7   : > { %v884_v30 = vadd.f32 %v6756_v28, %v9332_v49  ;;  %v631_v31 = vadd.f32 %v9327_v48, %v630_v29  ;;  %v878_v32 = vpop.f32.mrb[11].mxu1 }
 0x1f8   : > { %998 = vst [vmem:[#allocation2 + $0x58] sm:$0xff] %v636_v27  ;;  %v879_v33 = vadd.f32 %v9332_v49, %v878_v32 }
 0x1f9   : > { %1030 = vst [vmem:[#allocation3 + $0x58] sm:$0xff] %v884_v30  ;;  %997 = vst [vmem:[#allocation2 + $0x50] sm:$0xff] %v631_v31  ;;  %v6679_v34 = vpop.f32.mrb[12].mxu0 }
 0x1fa   : > { %1029 = vst [vmem:[#allocation3 + $0x50] sm:$0xff] %v879_v33  ;;  %v646_v35 = vadd.f32 %v6679_v34, %v9327_v48  ;;  %v6759_v36 = vpop.f32.mrb[12].mxu1  ;;  %v640_v37 = vpop.f32.mrb[13].mxu0 }
 0x1fb   : > { %v894_v38 = vadd.f32 %v6759_v36, %v9332_v49  ;;  %v641_v39 = vadd.f32 %v9327_v48, %v640_v37  ;;  %v888_v40 = vpop.f32.mrb[13].mxu1 }
 0x1fc   : > { %1000 = vst [vmem:[#allocation2 + $0x68] sm:$0xff] %v646_v35  ;;  %v889_v41 = vadd.f32 %v9332_v49, %v888_v40 }
 0x1fd   : > { %1032 = vst [vmem:[#allocation3 + $0x68] sm:$0xff] %v894_v38  ;;  %999 = vst [vmem:[#allocation2 + $0x60] sm:$0xff] %v641_v39  ;;  %v6682_v42 = vpop.f32.mrb[14].mxu0 }
 0x1fe   : > { %1031 = vst [vmem:[#allocation3 + $0x60] sm:$0xff] %v889_v41  ;;  %v656_v43 = vadd.f32 %v6682_v42, %v9327_v48  ;;  %v6762_v44 = vpop.f32.mrb[14].mxu1  ;;  %v650_v45 = vpop.f32.mrb[15].mxu0 }
 0x1ff   : > { %v904_v46 = vadd.f32 %v6762_v44, %v9332_v49  ;;  %v651_v47 = vadd.f32 %v9327_v48, %v650_v45  ;;  %v898_v50 = vpop.f32.mrb[15].mxu1 }
 0x200   : > { %1002 = vst [vmem:[#allocation2 + $0x78] sm:$0xff] %v656_v43  ;;  %v899_v51 = vadd.f32 %v9332_v49, %v898_v50 }
 0x201   : > { %1034 = vst [vmem:[#allocation3 + $0x78] sm:$0xff] %v904_v46  ;;  %1001 = vst [vmem:[#allocation2 + $0x70] sm:$0xff] %v651_v47  ;;  %v6685_v52 = vpop.f32.mrb[16].mxu0 }
 0x202   : > { %1033 = vst [vmem:[#allocation3 + $0x70] sm:$0xff] %v899_v51  ;;  %v666_v53 = vadd.f32 %v6685_v52, %v9327_v48  ;;  %v6765_v54 = vpop.f32.mrb[16].mxu1  ;;  %v660_v55 = vpop.f32.mrb[17].mxu0 }
 0x203   : > { %v914_v56 = vadd.f32 %v6765_v54, %v9332_v49  ;;  %v661_v57 = vadd.f32 %v9327_v48, %v660_v55  ;;  %v908_v58 = vpop.f32.mrb[17].mxu1 }
 0x204   : > { %1004 = vst [vmem:[#allocation2 + $0x88] sm:$0xff] %v666_v53  ;;  %v909_v59 = vadd.f32 %v9332_v49, %v908_v58 }
 0x205   : > { %1036 = vst [vmem:[#allocation3 + $0x88] sm:$0xff] %v914_v56  ;;  %1003 = vst [vmem:[#allocation2 + $0x80] sm:$0xff] %v661_v57  ;;  %v6688_v60 = vpop.f32.mrb[18].mxu0 }
 0x206   : > { %1035 = vst [vmem:[#allocation3 + $0x80] sm:$0xff] %v909_v59  ;;  %v676_v61 = vadd.f32 %v6688_v60, %v9327_v48  ;;  %v6768_v62 = vpop.f32.mrb[18].mxu1  ;;  %v670_v63 = vpop.f32.mrb[19].mxu0 }
 0x207   : > { %v924_v0 = vadd.f32 %v6768_v62, %v9332_v49  ;;  %v671_v1 = vadd.f32 %v9327_v48, %v670_v63  ;;  %v918_v2 = vpop.f32.mrb[19].mxu1 }
 0x208   : > { %1006 = vst [vmem:[#allocation2 + $0x98] sm:$0xff] %v676_v61  ;;  %v919_v3 = vadd.f32 %v9332_v49, %v918_v2 }
 0x209   : > { %1038 = vst [vmem:[#allocation3 + $0x98] sm:$0xff] %v924_v0  ;;  %1005 = vst [vmem:[#allocation2 + $0x90] sm:$0xff] %v671_v1  ;;  %v6691_v4 = vpop.f32.mrb[20].mxu0 }
 0x20a   : > { %1037 = vst [vmem:[#allocation3 + $0x90] sm:$0xff] %v919_v3  ;;  %v686_v5 = vadd.f32 %v6691_v4, %v9327_v48  ;;  %v6771_v6 = vpop.f32.mrb[20].mxu1  ;;  %v680_v7 = vpop.f32.mrb[21].mxu0 }
 0x20b   : > { %v934_v8 = vadd.f32 %v6771_v6, %v9332_v49  ;;  %v681_v9 = vadd.f32 %v9327_v48, %v680_v7  ;;  %v928_v10 = vpop.f32.mrb[21].mxu1 }
 0x20c   : > { %1008 = vst [vmem:[#allocation2 + $0xa8] sm:$0xff] %v686_v5  ;;  %v929_v11 = vadd.f32 %v9332_v49, %v928_v10 }
 0x20d   : > { %1040 = vst [vmem:[#allocation3 + $0xa8] sm:$0xff] %v934_v8  ;;  %1007 = vst [vmem:[#allocation2 + $0xa0] sm:$0xff] %v681_v9  ;;  %v6694_v12 = vpop.f32.mrb[22].mxu0 }
 0x20e   : > { %1039 = vst [vmem:[#allocation3 + $0xa0] sm:$0xff] %v929_v11  ;;  %v696_v13 = vadd.f32 %v6694_v12, %v9327_v48  ;;  %v6774_v14 = vpop.f32.mrb[22].mxu1  ;;  %v690_v15 = vpop.f32.mrb[23].mxu0 }
 0x20f   : > { %v944_v16 = vadd.f32 %v6774_v14, %v9332_v49  ;;  %v691_v17 = vadd.f32 %v9327_v48, %v690_v15  ;;  %v938_v18 = vpop.f32.mrb[23].mxu1 }
 0x210   : > { %1010 = vst [vmem:[#allocation2 + $0xb8] sm:$0xff] %v696_v13  ;;  %v939_v19 = vadd.f32 %v9332_v49, %v938_v18 }
 0x211   : > { %1042 = vst [vmem:[#allocation3 + $0xb8] sm:$0xff] %v944_v16  ;;  %1009 = vst [vmem:[#allocation2 + $0xb0] sm:$0xff] %v691_v17  ;;  %v6697_v20 = vpop.f32.mrb[24].mxu0 }
 0x212   : > { %1041 = vst [vmem:[#allocation3 + $0xb0] sm:$0xff] %v939_v19  ;;  %v706_v21 = vadd.f32 %v6697_v20, %v9327_v48  ;;  %v6777_v22 = vpop.f32.mrb[24].mxu1  ;;  %v700_v23 = vpop.f32.mrb[25].mxu0 }
 0x213   : > { %v954_v24 = vadd.f32 %v6777_v22, %v9332_v49  ;;  %v701_v25 = vadd.f32 %v9327_v48, %v700_v23  ;;  %v948_v26 = vpop.f32.mrb[25].mxu1 }
 0x214   : > { %1012 = vst [vmem:[#allocation2 + $0xc8] sm:$0xff] %v706_v21  ;;  %v949_v27 = vadd.f32 %v9332_v49, %v948_v26 }
 0x215   : > { %1044 = vst [vmem:[#allocation3 + $0xc8] sm:$0xff] %v954_v24  ;;  %1011 = vst [vmem:[#allocation2 + $0xc0] sm:$0xff] %v701_v25  ;;  %v6700_v28 = vpop.f32.mrb[26].mxu0 }
 0x216   : > { %1043 = vst [vmem:[#allocation3 + $0xc0] sm:$0xff] %v949_v27  ;;  %v716_v29 = vadd.f32 %v6700_v28, %v9327_v48  ;;  %v6780_v30 = vpop.f32.mrb[26].mxu1  ;;  %v710_v31 = vpop.f32.mrb[27].mxu0 }
 0x217   : > { %v964_v32 = vadd.f32 %v6780_v30, %v9332_v49  ;;  %v711_v33 = vadd.f32 %v9327_v48, %v710_v31  ;;  %v958_v34 = vpop.f32.mrb[27].mxu1 }
 0x218   : > { %1014 = vst [vmem:[#allocation2 + $0xd8] sm:$0xff] %v716_v29  ;;  %v959_v35 = vadd.f32 %v9332_v49, %v958_v34 }
 0x219   : > { %1046 = vst [vmem:[#allocation3 + $0xd8] sm:$0xff] %v964_v32  ;;  %1013 = vst [vmem:[#allocation2 + $0xd0] sm:$0xff] %v711_v33  ;;  %v6703_v36 = vpop.f32.mrb[28].mxu0 }
 0x21a   : > { %1045 = vst [vmem:[#allocation3 + $0xd0] sm:$0xff] %v959_v35  ;;  %v726_v37 = vadd.f32 %v6703_v36, %v9327_v48  ;;  %v6783_v38 = vpop.f32.mrb[28].mxu1  ;;  %v720_v39 = vpop.f32.mrb[29].mxu0 }
 0x21b   : > { %v974_v40 = vadd.f32 %v6783_v38, %v9332_v49  ;;  %v721_v41 = vadd.f32 %v9327_v48, %v720_v39  ;;  %v968_v42 = vpop.f32.mrb[29].mxu1 }
 0x21c   : > { %1016 = vst [vmem:[#allocation2 + $0xe8] sm:$0xff] %v726_v37  ;;  %v969_v43 = vadd.f32 %v9332_v49, %v968_v42 }
 0x21d   : > { %1048 = vst [vmem:[#allocation3 + $0xe8] sm:$0xff] %v974_v40  ;;  %1015 = vst [vmem:[#allocation2 + $0xe0] sm:$0xff] %v721_v41  ;;  %v6706_v44 = vpop.f32.mrb[30].mxu0 }
 0x21e   : > { %1047 = vst [vmem:[#allocation3 + $0xe0] sm:$0xff] %v969_v43  ;;  %v736_v45 = vadd.f32 %v6706_v44, %v9327_v48  ;;  %v6786_v46 = vpop.f32.mrb[30].mxu1  ;;  %v730_v47 = vpop.f32.mrb[31].mxu0 }
 0x21f   : > { %v984_v50 = vadd.f32 %v6786_v46, %v9332_v49  ;;  %v731_v51 = vadd.f32 %v9327_v48, %v730_v47  ;;  %v978_v52 = vpop.f32.mrb[31].mxu1 }
 0x220   : > { %1018 = vst [vmem:[#allocation2 + $0xf8] sm:$0xff] %v736_v45  ;;  %v979_v53 = vadd.f32 %v9332_v49, %v978_v52 }
 0x221   : > { %1050 = vst [vmem:[#allocation3 + $0xf8] sm:$0xff] %v984_v50  ;;  %1017 = vst [vmem:[#allocation2 + $0xf0] sm:$0xff] %v731_v51 }
 0x222   : > { %1049 = vst [vmem:[#allocation3 + $0xf0] sm:$0xff] %v979_v53 }
 0x223 PF: > { %v1067_v54 = vld [vmem:[#allocation10] sm:$0xff]  ;;  %v1068_v55 = vld [vmem:[#allocation10 + $0x18] sm:$0xff]  ;;  %v1069_v56 = vld [vmem:[#allocation10 + $0x30] sm:$0xff]  ;;  %vm1299_vm0 = vcmask 261120   ;;  %v11850_v5 = vmov 0  ;;  %s8862_s24 = smov 96  }
 0x224   : > { %v7035_v57 = vpack.c.bf16 %v1068_v55, %v1067_v54  ;;  %v1070_v58 = vld [vmem:[#allocation10 + $0x48] sm:$0xff]  ;;  %v1071_v60 = vld [vmem:[#allocation10 + $0x60] sm:$0xff]  ;;  %v1072_v61 = vld [vmem:[#allocation10 + $0x78] sm:$0xff]  ;;  %s11855_s23 = sld [smem:[#allocation71_spill]]  ;;  %s8864_s17 = smov 32  }
 0x225   : > { %v7039_v59 = vpack.c.bf16 %v1070_v58, %v1069_v56  ;;  %v7043_v48 = vpack.c.bf16 %v1072_v61, %v1071_v60  ;;  %v1051_v62 = vld [vmem:[%s9237_s16] sm:$0xff]  ;;  %v1073_v63 = vld [vmem:[#allocation10 + $0x90] sm:$0xff]  ;;  %v1074_v49 = vld [vmem:[#allocation10 + $0xa8] sm:$0xff]  ;;  %s12046_s1 = sld [smem:[#allocation73_spill]]  ;;  %s12047_s25 = sld [smem:[#allocation20_spill]] }
 0x226   : > { %7036 = vmatprep.subr.bf16.mxu0 %v7035_v57  ;;  %6819 = vmatprep.mubr.f32.mxu0 %v1051_v62  ;;  %v7047_v0 = vpack.c.bf16 %v1074_v49, %v1073_v63  ;;  %v1075_v1 = vld [vmem:[#allocation10 + $0xc0] sm:$0xff]  ;;  %v1076_v2 = vld [vmem:[#allocation10 + $0xd8] sm:$0xff]  ;;  %v9401_v4 = vld [vmem:[#allocation2 + $0x88] sm:$0xff]  ;;  %s12048_s8 = sld [smem:[#allocation21_spill]]  ;;  %s12049_s12 = sld [smem:[#allocation27_spill]] }
 0x227   : > { %7038 = vmatpush3.bf16.msra.mxu0 %v7035_v57  ;;  %v9399_v3 = vld [vmem:[#allocation2 + $0x80] sm:$0xff]  ;;  %vm9405_vm1 = vmpackc.low %vm1299_vm0, %vm1299_vm0  ;;  %v9413_v8 = vld [vmem:[#allocation2 + $0x8] sm:$0xff]  ;;  %v7051_v11 = vpack.c.bf16 %v1076_v2, %v1075_v1  ;;  %s5399_s22 = sshll.u32 %s9257_s14, 4  ;;  %s11605_s22 = int_to_ptr.vmem [resolvable:$true] %s5399_s22 }
 0x228   : > { %7040 = vmatprep.subr.bf16.mxu0 %v7039_v59  ;;  %v11851_v5 = vsel %vm9405_vm1, 4294967295, %v11850_v5  ;;  %v9409_v6 = vld [vmem:[#allocation2] sm:$0xff]  ;;  %v7067_v7 = vpack.c.bf16 %v9401_v4, %v9399_v3  ;;  %v9415_v9 = vld [vmem:[#allocation2 + $0x90] sm:$0xff]  ;;  %v9417_v10 = vld [vmem:[#allocation2 + $0x98] sm:$0xff] }
 0x229   : > { %11852 = vst [vmem:[#allocation29_spill] sm:$0xff] %v11851_v5  ;;  %v7070_v12 = vpack.c.bf16 %v9413_v8, %v9409_v6  ;;  %v7073_v13 = vpack.c.bf16 %v9417_v10, %v9415_v9  ;;  %v1077_v14 = vld [vmem:[#allocation10 + $0xf0] sm:$0xff]  ;;  %v1078_v15 = vld [vmem:[#allocation10 + $0x108] sm:$0xff]  ;;  %v9431_v17 = vld [vmem:[#allocation2 + $0x18] sm:$0xff] }
 0x22a   : > { %7069 = vmatprep.subr.msk.bf16.mxu1 %vm9405_vm1, %v7067_v7  ;;  %v9429_v16 = vld [vmem:[#allocation2 + $0x10] sm:$0xff]  ;;  %v7055_v18 = vpack.c.bf16 %v1078_v15, %v1077_v14  ;;  %v9433_v19 = vld [vmem:[#allocation2 + $0xa0] sm:$0xff]  ;;  %v9435_v20 = vld [vmem:[#allocation2 + $0xa8] sm:$0xff] }
 0x22b   : > { %7042 = vmatpush3.bf16.msra.mxu0 %v7039_v59  ;;  %7072 = vmatpush3.bf16.xpose.msk.msra.mxu1 %vm9405_vm1, %v7070_v12  ;;  %v1079_v21 = vld [vmem:[#allocation10 + $0x120] sm:$0xff]  ;;  %v1080_v22 = vld [vmem:[#allocation10 + $0x138] sm:$0xff]  ;;  %v7076_v23 = vpack.c.bf16 %v9431_v17, %v9429_v16  ;;  %v7079_v24 = vpack.c.bf16 %v9435_v20, %v9433_v19  ;;  %v1081_v26 = vld [vmem:[#allocation10 + $0x150] sm:$0xff]  ;;  %s5836_s15 = sshll.u32 %s12047_s25, 4 }
 0x22c   : > { %7044 = vmatprep.subr.bf16.mxu0 %v7043_v48  ;;  %7075 = vmatprep.subr.msk.bf16.mxu1 %vm9405_vm1, %v7073_v13  ;;  %v7059_v25 = vpack.c.bf16 %v1080_v22, %v1079_v21  ;;  %v1082_v27 = vld [vmem:[#allocation10 + $0x168] sm:$0xff]  ;;  %v9445_v28 = vld [vmem:[#allocation2 + $0x20] sm:$0xff]  ;;  %v9449_v31 = vld [vmem:[#allocation2 + $0xb0] sm:$0xff]  ;;  %s5837_s9 = sshll.u32 %s12048_s8, 5  ;;  %p12052_p1 = scmp.ne.s32.totalorder %s12049_s12, 0 }
 0x22d   : > { %v9447_v29 = vld [vmem:[#allocation2 + $0x28] sm:$0xff]  ;;  %v7063_v30 = vpack.c.bf16 %v1082_v27, %v1081_v26  ;;  %v9451_v32 = vld [vmem:[#allocation2 + $0xb8] sm:$0xff]  ;;  %v9462_v36 = vld [vmem:[#allocation2 + $0x30] sm:$0xff]  ;;  %v7624_v26 = vpack.i.bf16 %v9431_v17, %v9429_v16  ;;  %v7619_v27 = vpack.i.bf16 %v9417_v10, %v9415_v9  ;;  %s5396_s20 = sadd.s32 %s5837_s9, %s5836_s15 }
 0x22e   : > { %v7082_v33 = vpack.c.bf16 %v9447_v29, %v9445_v28  ;;  %v7085_v34 = vpack.c.bf16 %v9451_v32, %v9449_v31  ;;  %v1052_v35 = vld [vmem:[%s9237_s16 + $0x8] sm:$0xff]  ;;  %v9464_v37 = vld [vmem:[#allocation2 + $0x38] sm:$0xff]  ;;  %v1053_v38 = vld [vmem:[%s9237_s16 + $0x10] sm:$0xff]  ;;  %s5838_s27 = sshll.u32 %s5396_s20, 7 }
 0x22f   : > { %7046 = vmatpush3.bf16.msra.mxu0 %v7043_v48  ;;  %v9467_v39 = vld [vmem:[#allocation2 + $0xc0] sm:$0xff]  ;;  %v9469_v40 = vld [vmem:[#allocation2 + $0xc8] sm:$0xff]  ;;  %v7088_v41 = vpack.c.bf16 %v9464_v37, %v9462_v36  ;;  %v1054_v42 = vld [vmem:[%s9237_s16 + $0x18] sm:$0xff] }
 0x230   : > { %7048 = vmatprep.subr.bf16.mxu0 %v7047_v0  ;;  %v7091_v43 = vpack.c.bf16 %v9469_v40, %v9467_v39  ;;  %v1055_v44 = vld [vmem:[%s9237_s16 + $0x20] sm:$0xff]  ;;  %v1056_v45 = vld [vmem:[%s9237_s16 + $0x28] sm:$0xff]  ;;  %v1057_v50 = vld [vmem:[%s9237_s16 + $0x30] sm:$0xff] }
 0x231   : > { %v9482_v46 = vld [vmem:[#allocation2 + $0x40] sm:$0xff]  ;;  %v9484_v47 = vld [vmem:[#allocation2 + $0x48] sm:$0xff]  ;;  %v9487_v51 = vld [vmem:[#allocation2 + $0xd0] sm:$0xff] }
 0x232   : > { %v9489_v52 = vld [vmem:[#allocation2 + $0xd8] sm:$0xff]  ;;  %v7094_v53 = vpack.c.bf16 %v9484_v47, %v9482_v46  ;;  %v1059_v56 = vld [vmem:[%s9237_s16 + $0x40] sm:$0xff]  ;;  %v1060_v57 = vld [vmem:[%s9237_s16 + $0x48] sm:$0xff] }
 0x233   : > { %7050 = vmatpush3.bf16.msra.mxu0 %v7047_v0  ;;  %7078 = vmatpush3.bf16.xpose.msk.msra.mxu1 %vm9405_vm1, %v7076_v23  ;;  %v1058_v54 = vld [vmem:[%s9237_s16 + $0x38] sm:$0xff]  ;;  %v7097_v55 = vpack.c.bf16 %v9489_v52, %v9487_v51  ;;  %v9502_v58 = vld [vmem:[#allocation2 + $0x50] sm:$0xff]  ;;  %v9507_v61 = vld [vmem:[#allocation2 + $0xe0] sm:$0xff] }
 0x234   : > { %7052 = vmatprep.subr.bf16.mxu0 %v7051_v11  ;;  %7081 = vmatprep.subr.msk.bf16.mxu1 %vm9405_vm1, %v7079_v24  ;;  %v9504_v59 = vld [vmem:[#allocation2 + $0x58] sm:$0xff]  ;;  %v1061_v60 = vld [vmem:[%s9237_s16 + $0x50] sm:$0xff]  ;;  %v9509_v48 = vld [vmem:[#allocation2 + $0xe8] sm:$0xff]  ;;  %v7614_v24 = vpack.i.bf16 %v9413_v8, %v9409_v6  ;;  %v7634_v6 = vpack.i.bf16 %v9447_v29, %v9445_v28 }
 0x235   : > { %v7100_v62 = vpack.c.bf16 %v9504_v59, %v9502_v58  ;;  %v1062_v63 = vld [vmem:[%s9237_s16 + $0x58] sm:$0xff]  ;;  %v7103_v49 = vpack.c.bf16 %v9509_v48, %v9507_v61  ;;  %v1063_v0 = vld [vmem:[%s9237_s16 + $0x60] sm:$0xff]  ;;  %v1064_v1 = vld [vmem:[%s9237_s16 + $0x68] sm:$0xff] }
 0x236   : > { %v9522_v2 = vld [vmem:[#allocation2 + $0x60] sm:$0xff]  ;;  %v9524_v7 = vld [vmem:[#allocation2 + $0x68] sm:$0xff]  ;;  %v9527_v12 = vld [vmem:[#allocation2 + $0xf0] sm:$0xff]  ;;  %7615 = vrot.lane.b32.xlu0 %v7614_v24, %s8862_s24 }
 0x237   : > { %7054 = vmatpush3.bf16.msra.mxu0 %v7051_v11  ;;  %v1065_v11 = vld [vmem:[%s9237_s16 + $0x70] sm:$0xff]  ;;  %v9529_v13 = vld [vmem:[#allocation2 + $0xf8] sm:$0xff]  ;;  %v7106_v14 = vpack.c.bf16 %v9524_v7, %v9522_v2  ;;  %v1268_v24 = vld [vmem:[#allocation3 + $0x8] sm:$0xff] }
 0x238   : > { %7056 = vmatprep.subr.bf16.mxu0 %v7055_v18  ;;  %v1066_v15 = vld [vmem:[%s9237_s16 + $0x78] sm:$0xff]  ;;  %v9540_v21 = vld [vmem:[#allocation2 + $0x70] sm:$0xff]  ;;  %s8863_s16 = smov 64  }
 0x239   : > { %11853 = vst [vmem:[#allocation30_spill] sm:$0xff] %v9540_v21  ;;  %v9542_v22 = vld [vmem:[#allocation2 + $0x78] sm:$0xff] }
 0x23a   : > { %11854 = vst [vmem:[#allocation31_spill] sm:$0xff] %v9542_v22  ;;  %v7112_v23 = vpack.c.bf16 %v9542_v22, %v9540_v21  ;;  %7625 = vrot.lane.b32.xlu0 %v7624_v26, %s8862_s24  ;;  %v1286_v26 = vld [vmem:[#allocation3 + $0x98] sm:$0xff] }
 0x23b   : > { %7058 = vmatpush3.bf16.msra.mxu0 %v7055_v18  ;;  %7084 = vmatpush3.bf16.xpose.msk.msra.mxu1 %vm9405_vm1, %v7082_v33  ;;  %v7109_v18 = vpack.c.bf16 %v9529_v13, %v9527_v12 }
 0x23c   : > { %7060 = vmatprep.subr.bf16.mxu0 %v7059_v25  ;;  %7087 = vmatprep.subr.msk.bf16.mxu1 %vm9405_vm1, %v7085_v34 }
 0x23e   : > { %7635 = vrot.lane.b32.xlu0 %v7634_v6, %s8862_s24 }
 0x23f   : > { %7062 = vmatpush3.bf16.msra.mxu0 %v7059_v25  ;;  %v7609_v25 = vpack.i.bf16 %v9401_v4, %v9399_v3  ;;  %v7629_v3 = vpack.i.bf16 %v9435_v20, %v9433_v19  ;;  %v5577_v4 = vld [vmem:[%s11855_s23] ss:$0 sm:$0xff]  ;;  %s5384_s23 = scalar_lea.sflag [#allocation6], %s9233_s4 }
 0x240   : > { %7064 = vmatprep.subr.bf16.mxu0 %v7063_v30 }
 0x241   : > { %7610 = vrot.lane.b32.xlu1 %v7609_v25, %s8862_s24  ;;  %v1285_v25 = vld [vmem:[#allocation3 + $0x90] sm:$0xff] }
 0x242   : > { %v7119_v6 = vpack.c.bf16 %v1286_v26, %v1285_v25  ;;  %v1277_v26 = vld [vmem:[#allocation3 + $0x50] sm:$0xff] }
 0x243   : > { %7066 = vmatpush3.bf16.msra.mxu0 %v7063_v30  ;;  %7090 = vmatpush3.bf16.xpose.msk.msra.mxu1 %vm9405_vm1, %v7088_v41 }
 0x244   : > { %7093 = vmatprep.subr.msk.bf16.mxu1 %vm9405_vm1, %v7091_v43 }
 0x245   : > { %7620 = vrot.lane.b32.xlu1 %v7619_v27, %s8862_s24 }
 0x246   : > { %6820 = vmatmul.mubr.f32.vlgmr.msra.gmra.mrb[0].mxu0 %v1052_v35 }
 0x247   : > { %6822 = vmatprep.mubr.f32.mxu0 %v1053_v38 }
 0x249   : > { %7630 = vrot.lane.b32.xlu1 %v7629_v3, %s8862_s24  ;;  %v1269_v3 = vld [vmem:[#allocation3 + $0x10] sm:$0xff] }
 0x24a   : > { %6823 = vmatmul.mubr.f32.gmra.mrb[2].mxu0 %v1054_v42 }
 0x24b   : > { %6825 = vmatprep.mubr.f32.mxu0 %v1055_v44  ;;  %7096 = vmatpush3.bf16.xpose.msk.msra.mxu1 %vm9405_vm1, %v7094_v53 }
 0x24c   : > { %7099 = vmatprep.subr.msk.bf16.mxu1 %vm9405_vm1, %v7097_v55 }
 0x24e   : > { %6826 = vmatmul.mubr.f32.gmra.mrb[4].mxu0 %v1056_v45 }
 0x24f   : > { %6828 = vmatprep.mubr.f32.mxu0 %v1057_v50 }
 0x252   : > { %6829 = vmatmul.mubr.f32.gmra.mrb[6].mxu0 %v1058_v54 }
 0x253   : > { %6831 = vmatprep.mubr.f32.mxu0 %v1059_v56  ;;  %7102 = vmatpush3.bf16.xpose.msk.msra.mxu1 %vm9405_vm1, %v7100_v62 }
 0x254   : > { %7105 = vmatprep.subr.msk.bf16.mxu1 %vm9405_vm1, %v7103_v49 }
 0x256   : > { %6832 = vmatmul.mubr.f32.gmra.mrb[8].mxu0 %v1060_v57 }
 0x257   : > { %6834 = vmatprep.mubr.f32.mxu0 %v1061_v60 }
 0x25a   : > { %6835 = vmatmul.mubr.f32.gmra.mrb[10].mxu0 %v1062_v63 }
 0x25b   : > { %6837 = vmatprep.mubr.f32.mxu0 %v1063_v0  ;;  %7108 = vmatpush3.bf16.xpose.msk.msra.mxu1 %vm9405_vm1, %v7106_v14  ;;  %v1283_v14 = vld [vmem:[#allocation3 + $0x80] sm:$0xff] }
 0x25c   : > { %7111 = vmatprep.subr.msk.bf16.mxu1 %vm9405_vm1, %v7109_v18  ;;  %v1267_v18 = vld [vmem:[#allocation3] sm:$0xff] }
 0x25d   : > { %v7117_v27 = vpack.c.bf16 %v1268_v24, %v1267_v18  ;;  %v1293_v18 = vld [vmem:[#allocation3 + $0xd0] sm:$0xff] }
 0x25e   : > { %6838 = vmatmul.mubr.f32.gmra.mrb[12].mxu0 %v1064_v1 }
 0x25f   : > { %6840 = vmatprep.mubr.f32.mxu0 %v1065_v11 }
 0x262   : > { %6841 = vmatmul.mubr.f32.gmra.mrb[14].mxu0 %v1066_v15  ;;  %v1284_v15 = vld [vmem:[#allocation3 + $0x88] sm:$0xff] }
 0x263   : > { %7114 = vmatpush3.bf16.xpose.msk.msra.mxu1 %vm9405_vm1, %v7112_v23  ;;  %v7115_v23 = vpack.c.bf16 %v1284_v15, %v1283_v14  ;;  %v1275_v14 = vld [vmem:[#allocation3 + $0x40] sm:$0xff]  ;;  %v1276_v15 = vld [vmem:[#allocation3 + $0x48] sm:$0xff] }
 0x264   : > { %v7133_v24 = vpack.c.bf16 %v1276_v15, %v1275_v14 }
 0x265   : > { %7116 = vmatprep.subr.bf16.mxu0 %v7115_v23  ;;  %v1294_v23 = vld [vmem:[#allocation3 + $0xd8] sm:$0xff] }
 0x266   : > { %7118 = vmatpush3.bf16.msra.mxu0 %v7117_v27  ;;  %v7135_v25 = vpack.c.bf16 %v1294_v23, %v1293_v18  ;;  %v1278_v27 = vld [vmem:[#allocation3 + $0x58] sm:$0xff] }
 0x267   : > { %7120 = vmatprep.subr.bf16.mxu0 %v7119_v6  ;;  %v1295_v6 = vld [vmem:[#allocation3 + $0xe0] sm:$0xff] }
 0x319   : > { %v6821_v8 = vpop.f32.mrb[0].mxu0 }
 0x31a   : > { %v1156_v9 = vpop.f32.mrb[1].mxu0  ;;  %v9571_v16 = vadd.f32 %v6821_v8, %v5577_v4  ;;  %v1287_v8 = vld [vmem:[#allocation3 + $0xa0] sm:$0xff] }
 0x31b   : > { %v9569_v10 = vadd.f32 %v5577_v4, %v1156_v9  ;;  %v1288_v9 = vld [vmem:[#allocation3 + $0xa8] sm:$0xff] }
 0x31d   : > { %11856 = vst [vmem:[#allocation32_spill] sm:$0xff] %v9569_v10  ;;  %6003 = vmatprep.mubr.msk.f32.mxu1 %vm1299_vm0, %v9569_v10  ;;  %v6824_v17 = vpop.f32.mrb[2].mxu0 }
 0x31e   : > { %6004 = vmatmul.mubr.msk.f32.vlgmr.msra.gmra.mrb[0].mxu1 %vm1299_vm0, %v9569_v10  ;;  %v1166_v19 = vpop.f32.mrb[3].mxu0  ;;  %v9585_v30 = vadd.f32 %v6824_v17, %v5577_v4 }
 0x31f   : > { %6005 = vmatprep.mubr.msk.f32.mxu1 %vm1299_vm0, %v9571_v16  ;;  %v9579_v20 = vadd.f32 %v5577_v4, %v1166_v19  ;;  %v7123_v19 = vpack.c.bf16 %v1288_v9, %v1287_v8  ;;  %v1279_v9 = vld [vmem:[#allocation3 + $0x60] sm:$0xff] }
 0x320   : > { %11858 = vst [vmem:[#allocation34_spill] sm:$0xff] %v9585_v30 }
 0x321   : > { %11857 = vst [vmem:[#allocation33_spill] sm:$0xff] %v9579_v20  ;;  %v6827_v28 = vpop.f32.mrb[4].mxu0 }
 0x322   : > { %6006 = vmatmul.mubr.msk.f32.gmra.mrb[2].mxu1 %vm1299_vm0, %v9571_v16  ;;  %v1176_v29 = vpop.f32.mrb[5].mxu0  ;;  %v9597_v42 = vadd.f32 %v6827_v28, %v5577_v4  ;;  %v1271_v28 = vld [vmem:[#allocation3 + $0x20] sm:$0xff] }
 0x323   : > { %6007 = vmatprep.mubr.msk.f32.mxu1 %vm1299_vm0, %v9579_v20  ;;  %v9591_v35 = vadd.f32 %v5577_v4, %v1176_v29  ;;  %v1272_v29 = vld [vmem:[#allocation3 + $0x28] sm:$0xff] }
 0x324   : > { %11860 = vst [vmem:[#allocation36_spill] sm:$0xff] %v9597_v42 }
 0x325   : > { %v6830_v33 = vpop.f32.mrb[6].mxu0  ;;  %11859 = vst [vmem:[#allocation35_spill] sm:$0xff] %v9591_v35 }
 0x326   : > { %6008 = vmatmul.mubr.msk.f32.gmra.mrb[4].mxu1 %vm1299_vm0, %v9579_v20  ;;  %v1186_v34 = vpop.f32.mrb[7].mxu0  ;;  %v9609_v54 = vadd.f32 %v6830_v33, %v5577_v4  ;;  %v1289_v33 = vld [vmem:[#allocation3 + $0xb0] sm:$0xff]  ;;  %v9769_v20 = vpop.permute.xlu0 %7615 }
 0x327   : > { %6009 = vmatprep.mubr.msk.f32.mxu1 %vm1299_vm0, %v9585_v30  ;;  %v9603_v45 = vadd.f32 %v5577_v4, %v1186_v34  ;;  %v1290_v34 = vld [vmem:[#allocation3 + $0xb8] sm:$0xff]  ;;  %11870 = vst [vmem:[#allocation46_spill] sm:$0xff] %v9769_v20 }
 0x329   : > { %v6833_v38 = vpop.f32.mrb[8].mxu0  ;;  %11861 = vst [vmem:[#allocation37_spill] sm:$0xff] %v9603_v45 }
 0x32a   : > { %6010 = vmatmul.mubr.msk.f32.gmra.mrb[6].mxu1 %vm1299_vm0, %v9585_v30  ;;  %v1196_v41 = vpop.f32.mrb[9].mxu0  ;;  %v9621_v60 = vadd.f32 %v6833_v38, %v5577_v4  ;;  %v7125_v38 = vpack.c.bf16 %v1272_v29, %v1271_v28  ;;  %v1297_v28 = vld [vmem:[#allocation3 + $0xf0] sm:$0xff]  ;;  %v1298_v29 = vld [vmem:[#allocation3 + $0xf8] sm:$0xff]  ;;  %v7639_v30 = vpack.i.bf16 %v9451_v32, %v9449_v31 }
 0x32b   : > { %6011 = vmatprep.mubr.msk.f32.mxu1 %vm1299_vm0, %v9591_v35  ;;  %v9615_v57 = vadd.f32 %v5577_v4, %v1196_v41  ;;  %v7127_v41 = vpack.c.bf16 %v1290_v34, %v1289_v33 }
 0x32c   : > { %11863 = vst [vmem:[#allocation39_spill] sm:$0xff] %v9621_v60 }
 0x32d   : > { %v6836_v43 = vpop.f32.mrb[10].mxu0  ;;  %11862 = vst [vmem:[#allocation38_spill] sm:$0xff] %v9615_v57 }
 0x32e   : > { %6012 = vmatmul.mubr.msk.f32.gmra.mrb[8].mxu1 %vm1299_vm0, %v9591_v35  ;;  %v1206_v44 = vpop.f32.mrb[11].mxu0  ;;  %v9633_v63 = vadd.f32 %v6836_v43, %v5577_v4  ;;  %v1273_v43 = vld [vmem:[#allocation3 + $0x30] sm:$0xff] }
 0x32f   : > { %6013 = vmatprep.mubr.msk.f32.mxu1 %vm1299_vm0, %v9597_v42  ;;  %v9627_v62 = vadd.f32 %v5577_v4, %v1206_v44  ;;  %v1274_v44 = vld [vmem:[#allocation3 + $0x38] sm:$0xff] }
 0x330   : > { %11865 = vst [vmem:[#allocation41_spill] sm:$0xff] %v9633_v63 }
 0x331   : > { %v6839_v50 = vpop.f32.mrb[12].mxu0  ;;  %11864 = vst [vmem:[#allocation40_spill] sm:$0xff] %v9627_v62 }
 0x332   : > { %6014 = vmatmul.mubr.msk.f32.gmra.mrb[10].mxu1 %vm1299_vm0, %v9597_v42  ;;  %v1216_v53 = vpop.f32.mrb[13].mxu0  ;;  %v9645_v0 = vadd.f32 %v6839_v50, %v5577_v4  ;;  %v1291_v50 = vld [vmem:[#allocation3 + $0xc0] sm:$0xff] }
 0x333   : > { %6015 = vmatprep.mubr.msk.f32.mxu1 %vm1299_vm0, %v9603_v45  ;;  %v9639_v49 = vadd.f32 %v5577_v4, %v1216_v53  ;;  %v1292_v53 = vld [vmem:[#allocation3 + $0xc8] sm:$0xff] }
 0x334   : > { %11867 = vst [vmem:[#allocation43_spill] sm:$0xff] %v9645_v0 }
 0x335   : > { %v6842_v55 = vpop.f32.mrb[14].mxu0  ;;  %11866 = vst [vmem:[#allocation42_spill] sm:$0xff] %v9639_v49 }
 0x336   : > { %6016 = vmatmul.mubr.msk.f32.gmra.mrb[12].mxu1 %vm1299_vm0, %v9603_v45  ;;  %v1226_v56 = vpop.f32.mrb[15].mxu0  ;;  %v9655_v11 = vadd.f32 %v6842_v55, %v5577_v4  ;;  %v7129_v55 = vpack.c.bf16 %v1274_v44, %v1273_v43  ;;  %v1281_v43 = vld [vmem:[#allocation3 + $0x70] sm:$0xff]  ;;  %v1282_v44 = vld [vmem:[#allocation3 + $0x78] sm:$0xff] }
 0x337   : > { %6017 = vmatprep.mubr.msk.f32.mxu1 %vm1299_vm0, %v9609_v54  ;;  %v9651_v1 = vadd.f32 %v5577_v4, %v1226_v56  ;;  %v1270_v4 = vld [vmem:[#allocation3 + $0x18] sm:$0xff]  ;;  %v7131_v56 = vpack.c.bf16 %v1292_v53, %v1291_v50  ;;  %v7145_v50 = vpack.c.bf16 %v1282_v44, %v1281_v43 }
 0x338   : > { %11869 = vst [vmem:[#allocation45_spill] sm:$0xff] %v9655_v11  ;;  %v7121_v17 = vpack.c.bf16 %v1270_v4, %v1269_v3  ;;  %v1296_v3 = vld [vmem:[#allocation3 + $0xe8] sm:$0xff]  ;;  %v7137_v4 = vpack.c.bf16 %v1278_v27, %v1277_v26 }
 0x339   : > { %11868 = vst [vmem:[#allocation44_spill] sm:$0xff] %v9651_v1  ;;  %v7139_v8 = vpack.c.bf16 %v1296_v3, %v1295_v6 }
 0x33a   : > { %6018 = vmatmul.mubr.msk.f32.gmra.mrb[14].mxu1 %vm1299_vm0, %v9609_v54  ;;  %7122 = vmatpush3.bf16.msra.mxu0 %v7121_v17  ;;  %v1280_v17 = vld [vmem:[#allocation3 + $0x68] sm:$0xff] }
 0x33b   : > { %6019 = vmatprep.mubr.msk.f32.mxu1 %vm1299_vm0, %v9615_v57  ;;  %7124 = vmatprep.subr.bf16.mxu0 %v7123_v19  ;;  %v7611_v19 = vpop.permute.xlu1 %7610  ;;  %v7141_v33 = vpack.c.bf16 %v1280_v17, %v1279_v9 }
 0x33c   : > { %v7613_v34 = vunpack.i.h.bf16 %v7611_v19 }
 0x33e   : > { %6020 = vmatmul.mubr.msk.f32.gmra.mrb[16].mxu1 %vm1299_vm0, %v9615_v57  ;;  %7126 = vmatpush3.bf16.msra.mxu0 %v7125_v38  ;;  %v7612_v38 = vunpack.i.l.bf16 %v7611_v19 }
 0x33f   : > { %6021 = vmatprep.mubr.msk.f32.mxu1 %vm1299_vm0, %v9621_v60  ;;  %7128 = vmatprep.subr.bf16.mxu0 %v7127_v41  ;;  %v7143_v41 = vpack.c.bf16 %v1298_v29, %v1297_v28 }
 0x340   : > { %v7147_v53 = vpack.c.bf16 %v7613_v34, %v7612_v38 }
 0x342   : > { %6022 = vmatmul.mubr.msk.f32.gmra.mrb[18].mxu1 %vm1299_vm0, %v9621_v60  ;;  %7130 = vmatpush3.bf16.msra.mxu0 %v7129_v55 }
 0x343   : > { %6023 = vmatprep.mubr.msk.f32.mxu1 %vm1299_vm0, %v9627_v62  ;;  %7132 = vmatprep.subr.bf16.mxu0 %v7131_v56 }
 0x346   : > { %6024 = vmatmul.mubr.msk.f32.gmra.mrb[20].mxu1 %vm1299_vm0, %v9627_v62  ;;  %7134 = vmatpush3.bf16.msra.mxu0 %v7133_v24 }
 0x347   : > { %6025 = vmatprep.mubr.msk.f32.mxu1 %vm1299_vm0, %v9633_v63  ;;  %7136 = vmatprep.subr.bf16.mxu0 %v7135_v25 }
 0x34a   : > { %6026 = vmatmul.mubr.msk.f32.gmra.mrb[22].mxu1 %vm1299_vm0, %v9633_v63  ;;  %7138 = vmatpush3.bf16.msra.mxu0 %v7137_v4 }
 0x34b   : > { %6027 = vmatprep.mubr.msk.f32.mxu1 %vm1299_vm0, %v9639_v49  ;;  %7140 = vmatprep.subr.bf16.mxu0 %v7139_v8 }
 0x34e   : > { %6028 = vmatmul.mubr.msk.f32.gmra.mrb[24].mxu1 %vm1299_vm0, %v9639_v49  ;;  %7142 = vmatpush3.bf16.msra.mxu0 %v7141_v33 }
 0x34f   : > { %6029 = vmatprep.mubr.msk.f32.mxu1 %vm1299_vm0, %v9645_v0  ;;  %7144 = vmatprep.subr.bf16.mxu0 %v7143_v41 }
 0x352   : > { %6030 = vmatmul.mubr.msk.f32.gmra.mrb[26].mxu1 %vm1299_vm0, %v9645_v0  ;;  %7146 = vmatpush3.bf16.msra.mxu0 %v7145_v50 }
 0x353   : > { %6031 = vmatprep.mubr.msk.f32.mxu1 %vm1299_vm0, %v9651_v1  ;;  %7149 = vmatprep.subr.msk.bf16.mxu0 %vm9405_vm1, %v7147_v53 }
 0x356   : > { %6032 = vmatmul.mubr.msk.f32.gmra.mrb[28].mxu1 %vm1299_vm0, %v9651_v1 }
 0x357   : > { %6033 = vmatprep.mubr.msk.f32.mxu1 %vm1299_vm0, %v9655_v11 }
 0x35a   : > { %6034 = vmatmul.mubr.msk.f32.gmra.mrb[30].mxu1 %vm1299_vm0, %v9655_v11  ;;  %v9775_v11 = vpop.permute.xlu1 %7620 }
 0x35b   : > { %11873 = vst [vmem:[#allocation49_spill] sm:$0xff] %v9775_v11 }
 0x3f1   : > { %v9667_v55 = vpop.f32.mrb[0].mxu1 }
 0x3f2   : > { %v9669_v56 = vpop.f32.mrb[1].mxu1 }
 0x3f3   : > { %v1605_v14 = vmax.f32 %v9667_v55, %v9669_v56 }
 0x3f5   : > { %1606 = vmax.xlane.f32.xlu0 %v1605_v14  ;;  %v9673_v15 = vpop.f32.mrb[2].mxu1 }
 0x3f6   : > { %v9675_v18 = vpop.f32.mrb[3].mxu1 }
 0x3f7   : > { %v1608_v23 = vmax.f32 %v9673_v15, %v9675_v18 }
 0x3f9   : > { %1609 = vmax.xlane.f32.xlu0 %v1608_v23  ;;  %v9679_v24 = vpop.f32.mrb[4].mxu1 }
 0x3fa   : > { %v9681_v25 = vpop.f32.mrb[5].mxu1 }
 0x3fb   : > { %v1611_v26 = vmax.f32 %v9679_v24, %v9681_v25 }
 0x3fd   : > { %1612 = vmax.xlane.f32.xlu1 %v1611_v26  ;;  %v9685_v27 = vpop.f32.mrb[6].mxu1 }
 0x3fe   : > { %v9687_v6 = vpop.f32.mrb[7].mxu1 }
 0x3ff   : > { %v1614_v3 = vmax.f32 %v9685_v27, %v9687_v6 }
 0x401   : > { %1615 = vmax.xlane.f32.xlu1 %v1614_v3  ;;  %v9691_v4 = vpop.f32.mrb[8].mxu1 }
 0x402   : > { %v9693_v8 = vpop.f32.mrb[9].mxu1 }
 0x403   : > { %v1617_v9 = vmax.f32 %v9691_v4, %v9693_v8 }
 0x405   : > { %1618 = vmax.xlane.f32.xlu0 %v1617_v9  ;;  %v9697_v17 = vpop.f32.mrb[10].mxu1 }
 0x406   : > { %v9699_v19 = vpop.f32.mrb[11].mxu1 }
 0x407   : > { %v1620_v28 = vmax.f32 %v9697_v17, %v9699_v19 }
 0x409   : > { %1621 = vmax.xlane.f32.xlu1 %v1620_v28  ;;  %v9703_v29 = vpop.f32.mrb[12].mxu1 }
 0x40a   : > { %v9705_v33 = vpop.f32.mrb[13].mxu1 }
 0x40b   : > { %v1623_v34 = vmax.f32 %v9703_v29, %v9705_v33 }
 0x40d   : > { %1624 = vmax.xlane.f32.xlu0 %v1623_v34  ;;  %v9709_v38 = vpop.f32.mrb[14].mxu1 }
 0x40e   : > { %v9711_v41 = vpop.f32.mrb[15].mxu1 }
 0x40f   : > { %v1626_v43 = vmax.f32 %v9709_v38, %v9711_v41 }
 0x411   : > { %1627 = vmax.xlane.f32.xlu1 %v1626_v43  ;;  %v9715_v44 = vpop.f32.mrb[16].mxu1 }
 0x412   : > { %v9717_v50 = vpop.f32.mrb[17].mxu1 }
 0x413   : > { %v1629_v53 = vmax.f32 %v9715_v44, %v9717_v50 }
 0x415   : > { %1630 = vmax.xlane.f32.xlu0 %v1629_v53  ;;  %v9721_v14 = vpop.f32.mrb[18].mxu1 }
 0x416   : > { %v9723_v23 = vpop.f32.mrb[19].mxu1 }
 0x417   : > { %v1632_v26 = vmax.f32 %v9721_v14, %v9723_v23 }
 0x419   : > { %1633 = vmax.xlane.f32.xlu1 %v1632_v26  ;;  %v9727_v3 = vpop.f32.mrb[20].mxu1 }
 0x41a   : > { %v9729_v9 = vpop.f32.mrb[21].mxu1 }
 0x41b   : > { %v1635_v28 = vmax.f32 %v9727_v3, %v9729_v9 }
 0x41d   : > { %1636 = vmax.xlane.f32.xlu0 %v1635_v28  ;;  %v9733_v34 = vpop.f32.mrb[22].mxu1 }
 0x41e   : > { %v9735_v43 = vpop.f32.mrb[23].mxu1 }
 0x41f   : > { %v1638_v53 = vmax.f32 %v9733_v34, %v9735_v43 }
 0x421   : > { %1639 = vmax.xlane.f32.xlu1 %v1638_v53  ;;  %v9739_v1 = vpop.f32.mrb[24].mxu1 }
 0x422   : > { %v9741_v49 = vpop.f32.mrb[25].mxu1 }
 0x423   : > { %v1641_v26 = vmax.f32 %v9739_v1, %v9741_v49 }
 0x425   : > { %1642 = vmax.xlane.f32.xlu0 %v1641_v26  ;;  %v9745_v62 = vpop.f32.mrb[26].mxu1 }
 0x426   : > { %v9747_v57 = vpop.f32.mrb[27].mxu1 }
 0x427   : > { %v1644_v28 = vmax.f32 %v9745_v62, %v9747_v57 }
 0x429   : > { %1645 = vmax.xlane.f32.xlu1 %v1644_v28  ;;  %v9751_v45 = vpop.f32.mrb[28].mxu1  ;;  %v7644_v28 = vpack.i.bf16 %v9464_v37, %v9462_v36  ;;  %v9779_v36 = vpop.permute.xlu1 %7630 }
 0x42a   : > { %v9753_v42 = vpop.f32.mrb[29].mxu1 }
 0x42b   : > { %v1647_v53 = vmax.f32 %v9751_v45, %v9753_v42 }
 0x42d   : > { %1648 = vmax.xlane.f32.xlu0 %v1647_v53  ;;  %v9757_v35 = vpop.f32.mrb[30].mxu1  ;;  %v9771_v53 = vpop.permute.xlu0 %7625 }
 0x42e   : > { %v9759_v5 = vpop.f32.mrb[31].mxu1  ;;  %11871 = vst [vmem:[#allocation47_spill] sm:$0xff] %v9771_v53 }
 0x42f   : > { %v1650_v26 = vmax.f32 %v9757_v35, %v9759_v5 }
 0x431   : > { %1651 = vmax.xlane.f32.xlu1 %v1650_v26  ;;  %v9773_v10 = vpop.permute.xlu0 %7635 }
 0x432   : > { %11872 = vst [vmem:[#allocation48_spill] sm:$0xff] %v9773_v10 }
 0x442   : > { %7640 = vrot.lane.b32.xlu1 %v7639_v30, %s8862_s24 }
 0x443   : > { %7645 = vrot.lane.b32.xlu0 %v7644_v28, %s8862_s24 }
 0x482   : > { %v1607_v22 = vpop.xlane.xlu0 %1606 }
 0x483   : > { %v1653_v26 = vsub.f32 %v9667_v55, %v1607_v22  ;;  %v1654_v31 = vsub.f32 %v9669_v56, %v1607_v22 }
 0x485   : > { %v1685_v32 = vmul.f32 1.442695, %v1653_v26  ;;  %v1687_v21 = vmul.f32 1.442695, %v1654_v31 }
 0x486   : > { %v1610_v37 = vpop.xlane.xlu0 %1609 }
 0x487   : > { %8089 = vpow2.f32 %v1685_v32  ;;  %v1655_v30 = vsub.f32 %v9673_v15, %v1610_v37  ;;  %v1656_v28 = vsub.f32 %v9675_v18, %v1610_v37 }
 0x488   : > { %8091 = vpow2.f32 %v1687_v21 }
 0x489   : > { %v1689_v53 = vmul.f32 1.442695, %v1655_v30  ;;  %v1691_v10 = vmul.f32 1.442695, %v1656_v28 }
 0x48a   : > { %v1613_v20 = vpop.xlane.xlu1 %1612 }
 0x48b   : > { %8093 = vpow2.f32 %v1689_v53  ;;  %v1657_v11 = vsub.f32 %v9679_v24, %v1613_v20  ;;  %v1658_v55 = vsub.f32 %v9681_v25, %v1613_v20 }
 0x48c   : > { %8095 = vpow2.f32 %v1691_v10 }
 0x48d   : > { %v1693_v22 = vmul.f32 1.442695, %v1657_v11  ;;  %v1695_v56 = vmul.f32 1.442695, %v1658_v55 }
 0x48e   : > { %v1616_v26 = vpop.xlane.xlu1 %1615 }
 0x48f   : > { %8097 = vpow2.f32 %v1693_v22  ;;  %v1659_v31 = vsub.f32 %v9685_v27, %v1616_v26  ;;  %v1660_v15 = vsub.f32 %v9687_v6, %v1616_v26 }
 0x490   : > { %8099 = vpow2.f32 %v1695_v56 }
 0x491   : > { %v9787_v18 = vpop.eup %8089  ;;  %v1697_v21 = vmul.f32 1.442695, %v1659_v31  ;;  %v1699_v32 = vmul.f32 1.442695, %v1660_v15 }
 0x492   : > { %v9789_v37 = vpop.eup %8091  ;;  %v1619_v53 = vpop.xlane.xlu0 %1618 }
 0x493   : > { %8101 = vpow2.f32 %v1697_v21  ;;  %v1661_v20 = vsub.f32 %v9691_v4, %v1619_v53  ;;  %v1662_v10 = vsub.f32 %v9693_v8, %v1619_v53  ;;  %v1749_v11 = vadd.f32 %v9789_v37, %v9787_v18 }
 0x494   : > { %8103 = vpow2.f32 %v1699_v32 }
 0x495   : > { %v9795_v24 = vpop.eup %8093  ;;  %v1701_v25 = vmul.f32 1.442695, %v1661_v20  ;;  %v1703_v27 = vmul.f32 1.442695, %v1662_v10  ;;  %1750 = vadd.xlane.f32.xlu0 %v1749_v11 }
 0x496   : > { %v9797_v6 = vpop.eup %8095  ;;  %v1622_v30 = vpop.xlane.xlu1 %1621 }
 0x497   : > { %8105 = vpow2.f32 %v1701_v25  ;;  %v1663_v28 = vsub.f32 %v9697_v17, %v1622_v30  ;;  %v1664_v55 = vsub.f32 %v9699_v19, %v1622_v30  ;;  %v1752_v4 = vadd.f32 %v9797_v6, %v9795_v24 }
 0x498   : > { %8107 = vpow2.f32 %v1703_v27 }
 0x499   : > { %v9803_v8 = vpop.eup %8097  ;;  %v1705_v22 = vmul.f32 1.442695, %v1663_v28  ;;  %v1707_v56 = vmul.f32 1.442695, %v1664_v55  ;;  %1753 = vadd.xlane.f32.xlu1 %v1752_v4 }
 0x49a   : > { %v9805_v26 = vpop.eup %8099  ;;  %v1625_v31 = vpop.xlane.xlu0 %1624 }
 0x49b   : > { %8109 = vpow2.f32 %v1705_v22  ;;  %v1665_v15 = vsub.f32 %v9703_v29, %v1625_v31  ;;  %v1666_v21 = vsub.f32 %v9705_v33, %v1625_v31  ;;  %v1755_v17 = vadd.f32 %v9805_v26, %v9803_v8 }
 0x49c   : > { %8111 = vpow2.f32 %v1707_v56 }
 0x49d   : > { %v9811_v19 = vpop.eup %8101  ;;  %v1709_v32 = vmul.f32 1.442695, %v1665_v15  ;;  %v1711_v53 = vmul.f32 1.442695, %v1666_v21  ;;  %1756 = vadd.xlane.f32.xlu0 %v1755_v17 }
 0x49e   : > { %v9813_v20 = vpop.eup %8103  ;;  %v1628_v10 = vpop.xlane.xlu1 %1627 }
 0x49f   : > { %8113 = vpow2.f32 %v1709_v32  ;;  %v1667_v11 = vsub.f32 %v9709_v38, %v1628_v10  ;;  %v1668_v25 = vsub.f32 %v9711_v41, %v1628_v10  ;;  %v1758_v29 = vadd.f32 %v9813_v20, %v9811_v19 }
 0x4a0   : > { %8115 = vpow2.f32 %v1711_v53 }
 0x4a1   : > { %v9819_v33 = vpop.eup %8105  ;;  %v1713_v27 = vmul.f32 1.442695, %v1667_v11  ;;  %v1715_v30 = vmul.f32 1.442695, %v1668_v25  ;;  %1759 = vadd.xlane.f32.xlu1 %v1758_v29 }
 0x4a2   : > { %v9821_v28 = vpop.eup %8107  ;;  %v1631_v55 = vpop.xlane.xlu0 %1630 }
 0x4a3   : > { %8117 = vpow2.f32 %v1713_v27  ;;  %v1669_v4 = vsub.f32 %v9715_v44, %v1631_v55  ;;  %v1670_v22 = vsub.f32 %v9717_v50, %v1631_v55  ;;  %v1761_v38 = vadd.f32 %v9821_v28, %v9819_v33 }
 0x4a4   : > { %8119 = vpow2.f32 %v1715_v30 }
 0x4a5   : > { %v9827_v41 = vpop.eup %8109  ;;  %v1717_v56 = vmul.f32 1.442695, %v1669_v4  ;;  %v1719_v31 = vmul.f32 1.442695, %v1670_v22  ;;  %1762 = vadd.xlane.f32.xlu0 %v1761_v38 }
 0x4a6   : > { %v9829_v15 = vpop.eup %8111  ;;  %v1634_v21 = vpop.xlane.xlu1 %1633 }
 0x4a7   : > { %8121 = vpow2.f32 %v1717_v56  ;;  %v1671_v17 = vsub.f32 %v9721_v14, %v1634_v21  ;;  %v1672_v32 = vsub.f32 %v9723_v23, %v1634_v21  ;;  %v1764_v44 = vadd.f32 %v9829_v15, %v9827_v41 }
 0x4a8   : > { %8123 = vpow2.f32 %v1719_v31 }
 0x4a9   : > { %v9835_v50 = vpop.eup %8113  ;;  %v1721_v53 = vmul.f32 1.442695, %v1671_v17  ;;  %v1723_v10 = vmul.f32 1.442695, %v1672_v32  ;;  %1765 = vadd.xlane.f32.xlu1 %v1764_v44 }
 0x4aa   : > { %v9837_v11 = vpop.eup %8115  ;;  %v1637_v25 = vpop.xlane.xlu0 %1636 }
 0x4ab   : > { %8125 = vpow2.f32 %v1721_v53  ;;  %v1673_v29 = vsub.f32 %v9727_v3, %v1637_v25  ;;  %v1674_v27 = vsub.f32 %v9729_v9, %v1637_v25  ;;  %v1767_v14 = vadd.f32 %v9837_v11, %v9835_v50 }
 0x4ac   : > { %8127 = vpow2.f32 %v1723_v10 }
 0x4ad   : > { %v9843_v23 = vpop.eup %8117  ;;  %v1725_v30 = vmul.f32 1.442695, %v1673_v29  ;;  %v1727_v55 = vmul.f32 1.442695, %v1674_v27  ;;  %1768 = vadd.xlane.f32.xlu0 %v1767_v14 }
 0x4ae   : > { %v9845_v4 = vpop.eup %8119  ;;  %v1640_v22 = vpop.xlane.xlu1 %1639 }
 0x4af   : > { %8129 = vpow2.f32 %v1725_v30  ;;  %v1675_v38 = vsub.f32 %v9733_v34, %v1640_v22  ;;  %v1676_v56 = vsub.f32 %v9735_v43, %v1640_v22  ;;  %v1770_v3 = vadd.f32 %v9845_v4, %v9843_v23 }
 0x4b0   : > { %8131 = vpow2.f32 %v1727_v55 }
 0x4b1   : > { %v9851_v9 = vpop.eup %8121  ;;  %v1729_v31 = vmul.f32 1.442695, %v1675_v38  ;;  %v1731_v21 = vmul.f32 1.442695, %v1676_v56  ;;  %1771 = vadd.xlane.f32.xlu1 %v1770_v3 }
 0x4b2   : > { %v9853_v17 = vpop.eup %8123  ;;  %v1643_v32 = vpop.xlane.xlu0 %1642 }
 0x4b3   : > { %8133 = vpow2.f32 %v1729_v31  ;;  %v1677_v44 = vsub.f32 %v9739_v1, %v1643_v32  ;;  %v1678_v53 = vsub.f32 %v9741_v49, %v1643_v32  ;;  %v1773_v34 = vadd.f32 %v9853_v17, %v9851_v9 }
 0x4b4   : > { %8135 = vpow2.f32 %v1731_v21 }
 0x4b5   : > { %v9859_v43 = vpop.eup %8125  ;;  %v1733_v10 = vmul.f32 1.442695, %v1677_v44  ;;  %v1735_v25 = vmul.f32 1.442695, %v1678_v53  ;;  %1774 = vadd.xlane.f32.xlu0 %v1773_v34 }
 0x4b6   : > { %v9861_v29 = vpop.eup %8127  ;;  %v1646_v27 = vpop.xlane.xlu1 %1645 }
 0x4b7   : > { %8137 = vpow2.f32 %v1733_v10  ;;  %v1679_v14 = vsub.f32 %v9745_v62, %v1646_v27  ;;  %v1680_v30 = vsub.f32 %v9747_v57, %v1646_v27  ;;  %v1776_v49 = vadd.f32 %v9861_v29, %v9859_v43 }
 0x4b8   : > { %8139 = vpow2.f32 %v1735_v25  ;;  %v7649_v10 = vpack.i.bf16 %v9469_v40, %v9467_v39  ;;  %v7654_v25 = vpack.i.bf16 %v9484_v47, %v9482_v46  ;;  %v7659_v27 = vpack.i.bf16 %v9489_v52, %v9487_v51 }
 0x4b9   : > { %v9867_v1 = vpop.eup %8129  ;;  %v1737_v55 = vmul.f32 1.442695, %v1679_v14  ;;  %v1739_v22 = vmul.f32 1.442695, %v1680_v30  ;;  %1777 = vadd.xlane.f32.xlu1 %v1776_v49  ;;  %v7664_v14 = vpack.i.bf16 %v9504_v59, %v9502_v58  ;;  %v7669_v39 = vpack.i.bf16 %v9509_v48, %v9507_v61 }
 0x4ba   : > { %v9869_v38 = vpop.eup %8131  ;;  %v7674_v47 = vpack.i.bf16 %v9524_v7, %v9522_v2  ;;  %v7679_v58 = vpack.i.bf16 %v9529_v13, %v9527_v12  ;;  %v1649_v59 = vpop.xlane.xlu0 %1648 }
 0x4bb   : > { %8141 = vpow2.f32 %v1737_v55  ;;  %v1779_v56 = vadd.f32 %v9869_v38, %v9867_v1  ;;  %v1681_v61 = vsub.f32 %v9751_v45, %v1649_v59  ;;  %v11874_v55 = vld [vmem:[#allocation30_spill] sm:$0xff] }
 0x4bc   : > { %8143 = vpow2.f32 %v1739_v22  ;;  %v11875_v22 = vld [vmem:[#allocation31_spill] sm:$0xff] }
 0x4bd   : > { %v9873_v3 = vpop.eup %8133  ;;  %1780 = vadd.xlane.f32.xlu0 %v1779_v56  ;;  %v1741_v2 = vmul.f32 1.442695, %v1681_v61  ;;  %v7684_v56 = vpack.i.bf16 %v11875_v22, %v11874_v55 }
 0x4be   : > { %v9875_v57 = vpop.eup %8135  ;;  %v1652_v30 = vpop.xlane.xlu1 %1651 }
 0x4bf   : > { %v1782_v62 = vadd.f32 %v9875_v57, %v9873_v3  ;;  %v1683_v40 = vsub.f32 %v9757_v35, %v1652_v30  ;;  %v1684_v46 = vsub.f32 %v9759_v5, %v1652_v30  ;;  %v1682_v5 = vsub.f32 %v9753_v42, %v1649_v59  ;;  %v9936_v42 = vpop.permute.xlu0 %7645 }
 0x4c1   : > { %v9879_v31 = vpop.eup %8137  ;;  %1783 = vadd.xlane.f32.xlu1 %v1782_v62  ;;  %v1745_v51 = vmul.f32 1.442695, %v1683_v40  ;;  %v1747_v52 = vmul.f32 1.442695, %v1684_v46  ;;  %v1743_v7 = vmul.f32 1.442695, %v1682_v5 }
 0x4c2   : > { %v9881_v21 = vpop.eup %8139  ;;  %v9942_v62 = vpop.permute.xlu1 %7640  ;;  %v11879_v40 = vld [vmem:[#allocation33_spill] sm:$0xff] }
 0x4c3   : > { %v1785_v32 = vadd.f32 %v9881_v21, %v9879_v31  ;;  %8145 = vpow2.f32 %v1745_v51 }
 0x4c4   : > { %8147 = vpow2.f32 %v1747_v52 }
 0x4c5   : > { %v9885_v44 = vpop.eup %8141  ;;  %1786 = vadd.xlane.f32.xlu0 %v1785_v32  ;;  %8149 = vpow2.f32 %v1741_v2  ;;  %v11881_v2 = vld [vmem:[#allocation34_spill] sm:$0xff] }
 0x4c6   : > { %v9887_v53 = vpop.eup %8143  ;;  %8151 = vpow2.f32 %v1743_v7 }
 0x4c7   : > { %v1788_v34 = vadd.f32 %v9887_v53, %v9885_v44 }
 0x4c9   : > { %1789 = vadd.xlane.f32.xlu1 %v1788_v34  ;;  %v11876_v34 = vld [vmem:[#allocation45_spill] sm:$0xff] }
 0x4cd   : > { %v9916_v48 = vpop.eup %8145 }
 0x4ce   : > { %v9918_v35 = vpop.eup %8147 }
 0x4cf   : > { %v1794_v49 = vadd.f32 %v9918_v35, %v9916_v48  ;;  %v9922_v12 = vpop.eup %8149 }
 0x4d0   : > { %v9924_v13 = vpop.eup %8151 }
 0x4d1   : > { %v1791_v45 = vadd.f32 %v9924_v13, %v9922_v12 }
 0x4da   : > { %7650 = vrot.lane.b32.xlu1 %v7649_v10, %s8862_s24 }
 0x4db   : > { %7655 = vrot.lane.b32.xlu0 %v7654_v25, %s8862_s24  ;;  %v11877_v25 = vld [vmem:[#allocation32_spill] sm:$0xff] }
 0x4df   : > { %7660 = vrot.lane.b32.xlu0 %v7659_v27, %s8862_s24 }
 0x4e3   : > { %7665 = vrot.lane.b32.xlu0 %v7664_v14, %s8862_s24  ;;  %v11878_v14 = vld [vmem:[#allocation46_spill] sm:$0xff] }
 0x4e4   : > { %v7618_v30 = vunpack.i.h.bf16 %v11878_v14 }
 0x4e7   : > { %7670 = vrot.lane.b32.xlu0 %v7669_v39, %s8862_s24  ;;  %v7617_v39 = vunpack.i.l.bf16 %v11878_v14  ;;  %v7633_v14 = vunpack.i.h.bf16 %v9779_v36 }
 0x4e9   : > { %v7150_v5 = vpack.c.bf16 %v7618_v30, %v7617_v39  ;;  %v7632_v30 = vunpack.i.l.bf16 %v9779_v36 }
 0x4eb   : > { %7675 = vrot.lane.b32.xlu0 %v7674_v47, %s8862_s24  ;;  %v11880_v47 = vld [vmem:[#allocation49_spill] sm:$0xff] }
 0x4ec   : > { %v7623_v51 = vunpack.i.h.bf16 %v11880_v47  ;;  %v7622_v52 = vunpack.i.l.bf16 %v11880_v47  ;;  %v11885_v47 = vld [vmem:[#allocation36_spill] sm:$0xff] }
 0x4ef   : > { %7680 = vrot.lane.b32.xlu0 %v7679_v58, %s8862_s24 }
 0x4fe   : > { %1795 = vadd.xlane.f32.xlu1 %v1794_v49  ;;  %v7153_v49 = vpack.c.bf16 %v7623_v51, %v7622_v52  ;;  %v7159_v52 = vpack.c.bf16 %v7633_v14, %v7632_v30  ;;  %v11889_v30 = vld [vmem:[#allocation40_spill] sm:$0xff] }
 0x50e   : > { %1792 = vadd.xlane.f32.xlu0 %v1791_v45 }
 0x50f   : > { %1996 = vrot.lane.b32.xlu1 %v9571_v16, %s8862_s24 }
 0x513   : > { %2008 = vrot.lane.b32.xlu1 %v9609_v54, %s8862_s24 }
 0x517   : > { %2012 = vrot.lane.b32.xlu1 %v9621_v60, %s8862_s24 }
 0x51b   : > { %2016 = vrot.lane.b32.xlu1 %v9633_v63, %s8862_s24  ;;  %v8532_v63 = vld [vmem:[#allocation2 + $0x68] sm:$0xff] }
 0x51f   : > { %2020 = vrot.lane.b32.xlu1 %v9645_v0, %s8862_s24  ;;  %v8530_v0 = vld [vmem:[#allocation2 + $0xe8] sm:$0xff] }
 0x522   : > { %v1751_v32 = vpop.xlane.xlu0 %1750 }
 0x523   : > { %8153 = vrcp.f32 %v1751_v32  ;;  %2024 = vrot.lane.b32.xlu1 %v11876_v34, %s8862_s24  ;;  %v8528_v34 = vld [vmem:[#allocation2 + $0x58] sm:$0xff] }
 0x524   : > { %7685 = vrot.lane.b32.xlu0 %v7684_v56, %s8862_s24 }
 0x526   : > { %v1754_v10 = vpop.xlane.xlu1 %1753 }
 0x527   : > { %8155 = vrcp.f32 %v1754_v10  ;;  %v11884_v10 = vld [vmem:[#allocation35_spill] sm:$0xff] }
 0x528   : > { %1994 = vrot.lane.b32.xlu0 %v11877_v25, %s8862_s24 }
 0x52a   : > { %v1757_v27 = vpop.xlane.xlu0 %1756 }
 0x52b   : > { %8157 = vrcp.f32 %v1757_v27 }
 0x52c   : > { %1998 = vrot.lane.b32.xlu0 %v11879_v40, %s8862_s24 }
 0x52d   : > { %v8154_v46 = vpop.eup %8153 }
 0x52e   : > { %v1760_v58 = vpop.xlane.xlu1 %1759  ;;  %v1799_v59 = vmul.f32 %v8154_v46, %v9789_v37  ;;  %v1798_v61 = vmul.f32 %v8154_v46, %v9787_v18  ;;  %v11883_v18 = vld [vmem:[#allocation47_spill] sm:$0xff] }
 0x52f   : > { %8159 = vrcp.f32 %v1760_v58  ;;  %v7628_v37 = vunpack.i.h.bf16 %v11883_v18  ;;  %v7627_v32 = vunpack.i.l.bf16 %v11883_v18  ;;  %v11888_v18 = vld [vmem:[#allocation38_spill] sm:$0xff] }
 0x530   : > { %2000 = vrot.lane.b32.xlu0 %v11881_v2, %s8862_s24  ;;  %1909 = vmatprep.mubr.f32.mxu0 %v1799_v59 }
 0x531   : > { %v8156_v7 = vpop.eup %8155  ;;  %1910 = vmatmul.mubr.f32.vlgmr.msra.gmra.mrb[16].mxu0 %v1798_v61  ;;  %v7156_v46 = vpack.c.bf16 %v7628_v37, %v7627_v32 }
 0x532   : > { %7152 = vmatpush3.bf16.xpose.msk.msra.mxu0 %vm9405_vm1, %v7150_v5  ;;  %v1763_v55 = vpop.xlane.xlu0 %1762  ;;  %v1802_v22 = vmul.f32 %v8156_v7, %v9797_v6  ;;  %v1801_v56 = vmul.f32 %v8156_v7, %v9795_v24  ;;  %v11887_v5 = vld [vmem:[#allocation37_spill] sm:$0xff] }
 0x533   : > { %7155 = vmatprep.subr.msk.bf16.mxu0 %vm9405_vm1, %v7153_v49  ;;  %8161 = vrcp.f32 %v1763_v55  ;;  %v7643_v49 = vunpack.i.h.bf16 %v9942_v62  ;;  %v7642_v55 = vunpack.i.l.bf16 %v9942_v62 }
 0x534   : > { %2002 = vrot.lane.b32.xlu0 %v11884_v10, %s8862_s24  ;;  %1914 = vmatprep.mubr.f32.mxu0 %v1802_v22 }
 0x535   : > { %v8158_v27 = vpop.eup %8157  ;;  %1915 = vmatmul.mubr.f32.gmra.mrb[18].mxu0 %v1801_v56  ;;  %v7165_v32 = vpack.c.bf16 %v7643_v49, %v7642_v55 }
 0x536   : > { %v1766_v6 = vpop.xlane.xlu1 %1765  ;;  %v1805_v24 = vmul.f32 %v8158_v27, %v9805_v26  ;;  %v1804_v39 = vmul.f32 %v8158_v27, %v9803_v8  ;;  %v11886_v8 = vld [vmem:[#allocation48_spill] sm:$0xff] }
 0x537   : > { %8163 = vrcp.f32 %v1766_v6  ;;  %v7638_v26 = vunpack.i.h.bf16 %v11886_v8  ;;  %v7637_v61 = vunpack.i.l.bf16 %v11886_v8 }
 0x538   : > { %2004 = vrot.lane.b32.xlu0 %v11885_v47, %s8862_s24  ;;  %1919 = vmatprep.mubr.f32.mxu0 %v1805_v24 }
 0x539   : > { %v8160_v51 = vpop.eup %8159  ;;  %1920 = vmatmul.mubr.f32.gmra.mrb[20].mxu0 %v1804_v39  ;;  %v7162_v56 = vpack.c.bf16 %v7638_v26, %v7637_v61 }
 0x53a   : > { %7158 = vmatpush3.bf16.xpose.msk.msra.mxu0 %vm9405_vm1, %v7156_v46  ;;  %v1769_v58 = vpop.xlane.xlu0 %1768  ;;  %v1808_v36 = vmul.f32 %v8160_v51, %v9813_v20  ;;  %v1807_v59 = vmul.f32 %v8160_v51, %v9811_v19  ;;  %v11890_v46 = vld [vmem:[#allocation42_spill] sm:$0xff] }
 0x53b   : > { %7161 = vmatprep.subr.msk.bf16.mxu0 %vm9405_vm1, %v7159_v52  ;;  %8165 = vrcp.f32 %v1769_v58 }
 0x53c   : > { %2006 = vrot.lane.b32.xlu0 %v11887_v5, %s8862_s24  ;;  %1924 = vmatprep.mubr.f32.mxu0 %v1808_v36 }
 0x53d   : > { %v8162_v7 = vpop.eup %8161  ;;  %1925 = vmatmul.mubr.f32.gmra.mrb[22].mxu0 %v1807_v59 }
 0x53e   : > { %v1772_v20 = vpop.xlane.xlu1 %1771  ;;  %v1811_v19 = vmul.f32 %v8162_v7, %v9821_v28  ;;  %v1810_v22 = vmul.f32 %v8162_v7, %v9819_v33  ;;  %v7648_v33 = vunpack.i.h.bf16 %v9936_v42  ;;  %v7647_v28 = vunpack.i.l.bf16 %v9936_v42 }
 0x53f   : > { %8167 = vrcp.f32 %v1772_v20 }
 0x540   : > { %2010 = vrot.lane.b32.xlu0 %v11888_v18, %s8862_s24  ;;  %1929 = vmatprep.mubr.f32.mxu0 %v1811_v19 }
 0x541   : > { %v8164_v37 = vpop.eup %8163  ;;  %1930 = vmatmul.mubr.f32.gmra.mrb[24].mxu0 %v1810_v22 }
 0x542   : > { %7164 = vmatpush3.bf16.xpose.msk.msra.mxu0 %vm9405_vm1, %v7162_v56  ;;  %v1775_v27 = vpop.xlane.xlu0 %1774  ;;  %v1814_v62 = vmul.f32 %v8164_v37, %v9829_v15  ;;  %v1813_v14 = vmul.f32 %v8164_v37, %v9827_v41  ;;  %v7168_v41 = vpack.c.bf16 %v7648_v33, %v7647_v28 }
 0x543   : > { %8169 = vrcp.f32 %v1775_v27  ;;  %7167 = vmatprep.subr.msk.bf16.mxu0 %vm9405_vm1, %v7165_v32 }
 0x544   : > { %2014 = vrot.lane.b32.xlu0 %v11889_v30, %s8862_s24  ;;  %1934 = vmatprep.mubr.f32.mxu0 %v1814_v62 }
 0x545   : > { %v8166_v6 = vpop.eup %8165  ;;  %1935 = vmatmul.mubr.f32.gmra.mrb[26].mxu0 %v1813_v14 }
 0x546   : > { %v1778_v24 = vpop.xlane.xlu1 %1777  ;;  %v1817_v39 = vmul.f32 %v8166_v6, %v9837_v11  ;;  %v1816_v15 = vmul.f32 %v8166_v6, %v9835_v50  ;;  %v11891_v11 = vld [vmem:[#allocation44_spill] sm:$0xff] }
 0x547   : > { %8171 = vrcp.f32 %v1778_v24 }
 0x548   : > { %2018 = vrot.lane.b32.xlu0 %v11890_v46, %s8862_s24  ;;  %1939 = vmatprep.mubr.f32.mxu0 %v1817_v39 }
 0x549   : > { %v8168_v51 = vpop.eup %8167  ;;  %1940 = vmatmul.mubr.f32.gmra.mrb[28].mxu0 %v1816_v15 }
 0x54a   : > { %7170 = vmatpush3.bf16.xpose.msk.msra.mxu0 %vm9405_vm1, %v7168_v41  ;;  %v1781_v42 = vpop.xlane.xlu0 %1780  ;;  %v1820_v52 = vmul.f32 %v8168_v51, %v9845_v4  ;;  %v1819_v58 = vmul.f32 %v8168_v51, %v9843_v23 }
 0x54b   : > { %8173 = vrcp.f32 %v1781_v42 }
 0x54c   : > { %2022 = vrot.lane.b32.xlu0 %v11891_v11, %s8862_s24  ;;  %1944 = vmatprep.mubr.f32.mxu0 %v1820_v52 }
 0x54d   : > { %v8170_v50 = vpop.eup %8169  ;;  %1945 = vmatmul.mubr.f32.gmra.mrb[30].mxu0 %v1819_v58 }
 0x54e   : > { %v1784_v36 = vpop.xlane.xlu1 %1783  ;;  %v1823_v59 = vmul.f32 %v8170_v50, %v9853_v17  ;;  %v1822_v8 = vmul.f32 %v8170_v50, %v9851_v9 }
 0x54f   : > { %8175 = vrcp.f32 %v1784_v36 }
 0x550   : > { %1949 = vmatprep.mubr.f32.mxu0 %v1823_v59 }
 0x551   : > { %v8172_v26 = vpop.eup %8171  ;;  %1950 = vmatmul.mubr.f32.gmra.mrb[32].mxu0 %v1822_v8 }
 0x552   : > { %v1787_v61 = vpop.xlane.xlu0 %1786  ;;  %v1826_v4 = vmul.f32 %v8172_v26, %v9861_v29  ;;  %v1825_v23 = vmul.f32 %v8172_v26, %v9859_v43 }
 0x553   : > { %8177 = vrcp.f32 %v1787_v61 }
 0x554   : > { %1954 = vmatprep.mubr.f32.mxu0 %v1826_v4 }
 0x555   : > { %v8174_v7 = vpop.eup %8173  ;;  %1955 = vmatmul.mubr.f32.gmra.mrb[34].mxu0 %v1825_v23 }
 0x556   : > { %v7656_v49 = vpop.permute.xlu0 %7655  ;;  %v1790_v55 = vpop.xlane.xlu1 %1789  ;;  %v1829_v20 = vmul.f32 %v8174_v7, %v9869_v38  ;;  %v1828_v17 = vmul.f32 %v8174_v7, %v9867_v1 }
 0x557   : > { %8179 = vrcp.f32 %v1790_v55  ;;  %v7658_v19 = vunpack.i.h.bf16 %v7656_v49  ;;  %v7657_v22 = vunpack.i.l.bf16 %v7656_v49 }
 0x558   : > { %1959 = vmatprep.mubr.f32.mxu0 %v1829_v20 }
 0x559   : > { %v8176_v9 = vpop.eup %8175  ;;  %1960 = vmatmul.mubr.f32.gmra.mrb[36].mxu0 %v1828_v17  ;;  %v7174_v1 = vpack.c.bf16 %v7658_v19, %v7657_v22 }
 0x55a   : > { %v7661_v56 = vpop.permute.xlu0 %7660  ;;  %v7651_v29 = vpop.permute.xlu1 %7650  ;;  %v1832_v43 = vmul.f32 %v8176_v9, %v9875_v57  ;;  %v1831_v37 = vmul.f32 %v8176_v9, %v9873_v3 }
 0x55b   : > { %v7663_v32 = vunpack.i.h.bf16 %v7661_v56  ;;  %v7662_v27 = vunpack.i.l.bf16 %v7661_v56  ;;  %v7653_v62 = vunpack.i.h.bf16 %v7651_v29  ;;  %v7652_v14 = vunpack.i.l.bf16 %v7651_v29 }
 0x55c   : > { %1964 = vmatprep.mubr.f32.mxu0 %v1832_v43 }
 0x55d   : > { %v8178_v38 = vpop.eup %8177  ;;  %v7171_v33 = vpack.c.bf16 %v7653_v62, %v7652_v14  ;;  %1965 = vmatmul.mubr.f32.gmra.mrb[38].mxu0 %v1831_v37  ;;  %v7177_v39 = vpack.c.bf16 %v7663_v32, %v7662_v27  ;;  %v8473_v37 = vld [vmem:[#allocation3 + $0x80] sm:$0xff]  ;;  %v8474_v32 = vld [vmem:[#allocation3 + $0x88] sm:$0xff]  ;;  %v8476_v14 = vld [vmem:[#allocation3 + $0x98] sm:$0xff] }
 0x55e   : > { %v7666_v28 = vpop.permute.xlu0 %7665  ;;  %v1835_v6 = vmul.f32 %v8178_v38, %v9881_v21  ;;  %v1834_v24 = vmul.f32 %v8178_v38, %v9879_v31  ;;  %v7689_v27 = vpack.i.bf16 %v8474_v32, %v8473_v37  ;;  %v8500_v37 = vld [vmem:[#allocation3 + $0x58] sm:$0xff] }
 0x55f   : > { %7173 = vmatprep.subr.msk.bf16.mxu0 %vm9405_vm1, %v7171_v33  ;;  %v7668_v57 = vunpack.i.h.bf16 %v7666_v28  ;;  %v7667_v15 = vunpack.i.l.bf16 %v7666_v28  ;;  %v8478_v33 = vld [vmem:[#allocation3 + $0x18] sm:$0xff]  ;;  %v8479_v28 = vld [vmem:[#allocation3 + $0x20] sm:$0xff] }
 0x560   : > { %1969 = vmatprep.mubr.f32.mxu0 %v1835_v6  ;;  %7176 = vmatpush3.bf16.xpose.msk.msra.mxu0 %vm9405_vm1, %v7174_v1  ;;  %v8480_v6 = vld [vmem:[#allocation3 + $0x28] sm:$0xff] }
 0x561   : > { %v8180_v3 = vpop.eup %8179  ;;  %1970 = vmatmul.mubr.f32.gmra.mrb[40].mxu0 %v1834_v24  ;;  %7179 = vmatprep.subr.msk.bf16.mxu0 %vm9405_vm1, %v7177_v39  ;;  %v7180_v52 = vpack.c.bf16 %v7668_v57, %v7667_v15  ;;  %v7714_v24 = vpack.i.bf16 %v8480_v6, %v8479_v28  ;;  %v8482_v57 = vld [vmem:[#allocation3 + $0xb8] sm:$0xff]  ;;  %v8507_v6 = vld [vmem:[#allocation3 + $0xf0] sm:$0xff] }
 0x562   : > { %v7671_v41 = vpop.permute.xlu0 %7670  ;;  %v1838_v21 = vmul.f32 %v8180_v3, %v9887_v53  ;;  %v1837_v31 = vmul.f32 %v8180_v3, %v9885_v44  ;;  %7690 = vrot.lane.b32.xlu1 %v7689_v27, %s8862_s24  ;;  %v8481_v3 = vld [vmem:[#allocation3 + $0xb0] sm:$0xff]  ;;  %v8501_v27 = vld [vmem:[#allocation2] sm:$0xff] }
 0x563   : > { %v7673_v51 = vunpack.i.h.bf16 %v7671_v41  ;;  %v7672_v42 = vunpack.i.l.bf16 %v7671_v41  ;;  %v7719_v15 = vpack.i.bf16 %v8482_v57, %v8481_v3  ;;  %v8483_v41 = vld [vmem:[#allocation3] sm:$0xff]  ;;  %v8510_v57 = vld [vmem:[#allocation2 + $0x28] sm:$0xff] }
 0x564   : > { %1974 = vmatprep.mubr.f32.mxu0 %v1838_v21  ;;  %v8484_v21 = vld [vmem:[#allocation3 + $0x8] sm:$0xff]  ;;  %v8509_v3 = vld [vmem:[#allocation2 + $0x20] sm:$0xff] }
 0x565   : > { %1975 = vmatmul.mubr.f32.gmra.mrb[42].mxu0 %v1837_v31  ;;  %v7183_v50 = vpack.c.bf16 %v7673_v51, %v7672_v42  ;;  %v7694_v31 = vpack.i.bf16 %v8484_v21, %v8483_v41  ;;  %v8485_v51 = vld [vmem:[#allocation3 + $0xa0] sm:$0xff]  ;;  %v8486_v42 = vld [vmem:[#allocation3 + $0xa8] sm:$0xff]  ;;  %v8511_v21 = vld [vmem:[#allocation3 + $0x70] sm:$0xff] }
 0x566   : > { %v7676_v58 = vpop.permute.xlu0 %7675 }
 0x567   : > { %v7678_v36 = vunpack.i.h.bf16 %v7676_v58  ;;  %v7677_v59 = vunpack.i.l.bf16 %v7676_v58  ;;  %7695 = vrot.lane.b32.xlu0 %v7694_v31, %s8862_s24  ;;  %v8487_v58 = vld [vmem:[#allocation3 + $0x30] sm:$0xff]  ;;  %v8512_v31 = vld [vmem:[#allocation3 + $0x78] sm:$0xff] }
 0x568   : > { %7182 = vmatpush3.bf16.xpose.msk.msra.mxu0 %vm9405_vm1, %v7180_v52  ;;  %v7709_v52 = vpack.i.bf16 %v8486_v42, %v8485_v51  ;;  %v7764_v51 = vpack.i.bf16 %v8512_v31, %v8511_v21  ;;  %v8513_v42 = vld [vmem:[#allocation2 + $0xc0] sm:$0xff] }
 0x569   : > { %7185 = vmatprep.subr.msk.bf16.mxu0 %vm9405_vm1, %v7183_v50  ;;  %v7186_v61 = vpack.c.bf16 %v7678_v36, %v7677_v59  ;;  %v8488_v50 = vld [vmem:[#allocation3 + $0x38] sm:$0xff] }
 0x56a   : > { %v7681_v8 = vpop.permute.xlu0 %7680  ;;  %v7724_v36 = vpack.i.bf16 %v8488_v50, %v8487_v58 }
 0x56b   : > { %v7683_v26 = vunpack.i.h.bf16 %v7681_v8  ;;  %v7682_v53 = vunpack.i.l.bf16 %v7681_v8  ;;  %7710 = vrot.lane.b32.xlu0 %v7709_v52, %s8862_s24  ;;  %v8489_v8 = vld [vmem:[#allocation3 + $0xc0] sm:$0xff]  ;;  %v8514_v52 = vld [vmem:[#allocation2 + $0xc8] sm:$0xff] }
 0x56c   : > { %v10095_v58 = vpack.i.bf16 %v8514_v52, %v8513_v42 }
 0x56d   : > { %v7189_v44 = vpack.c.bf16 %v7683_v26, %v7682_v53  ;;  %v8490_v26 = vld [vmem:[#allocation3 + $0xc8] sm:$0xff] }
 0x56e   : > { %v7729_v53 = vpack.i.bf16 %v8490_v26, %v8489_v8  ;;  %11892 = vst [vmem:[#allocation30_spill] sm:$0xff] %v10095_v58  ;;  %v8517_v26 = vld [vmem:[#allocation2 + $0x40] sm:$0xff] }
 0x570   : > { %7188 = vmatpush3.bf16.xpose.msk.msra.mxu0 %vm9405_vm1, %v7186_v61  ;;  %v8491_v61 = vld [vmem:[#allocation3 + $0x40] sm:$0xff]  ;;  %7730 = vrot.lane.b32.xlu0 %v7729_v53, %s8862_s24  ;;  %v8518_v53 = vld [vmem:[#allocation2 + $0x48] sm:$0xff] }
 0x571   : > { %7191 = vmatprep.subr.msk.bf16.mxu0 %vm9405_vm1, %v7189_v44  ;;  %v8492_v44 = vld [vmem:[#allocation3 + $0x48] sm:$0xff] }
 0x58b   : > { %v1796_v4 = vpop.xlane.xlu1 %1795 }
 0x58c   : > { %8181 = vrcp.f32 %v1796_v4  ;;  %v7734_v4 = vpack.i.bf16 %v8492_v44, %v8491_v61  ;;  %v10104_v61 = vpack.i.bf16 %v8518_v53, %v8517_v26 }
 0x58e   : > { %11893 = vst [vmem:[#allocation31_spill] sm:$0xff] %v10104_v61 }
 0x58f   : > { %v1997_v38 = vpop.permute.xlu1 %1996 }
 0x596   : > { %v8182_v17 = vpop.eup %8181 }
 0x597   : > { %v1844_v29 = vmul.f32 %v8182_v17, %v9918_v35  ;;  %v1843_v43 = vmul.f32 %v8182_v17, %v9916_v48  ;;  %v8477_v35 = vld [vmem:[#allocation3 + $0x10] sm:$0xff]  ;;  %v8496_v17 = vld [vmem:[#allocation3 + $0xd8] sm:$0xff] }
 0x598   : > { %v7704_v1 = vpack.i.bf16 %v8478_v33, %v8477_v35  ;;  %v8505_v35 = vld [vmem:[#allocation2 + $0xa0] sm:$0xff]  ;;  %v8506_v33 = vld [vmem:[#allocation2 + $0xa8] sm:$0xff] }
 0x59b   : > { %v1793_v23 = vpop.xlane.xlu0 %1792 }
 0x59c   : > { %8183 = vrcp.f32 %v1793_v23  ;;  %v8493_v23 = vld [vmem:[#allocation3 + $0xe0] sm:$0xff] }
 0x59f   : > { %v7686_v7 = vpop.permute.xlu0 %7685 }
 0x5a0   : > { %v7688_v49 = vunpack.i.h.bf16 %v7686_v7  ;;  %v7687_v55 = vunpack.i.l.bf16 %v7686_v7  ;;  %v8494_v7 = vld [vmem:[#allocation3 + $0xe8] sm:$0xff] }
 0x5a2   : > { %v7192_v20 = vpack.c.bf16 %v7688_v49, %v7687_v55  ;;  %v7749_v49 = vpack.i.bf16 %v8494_v7, %v8493_v23  ;;  %v8520_v23 = vld [vmem:[#allocation2 + $0x18] sm:$0xff] }
 0x5a3   : > { %v1995_v56 = vpop.permute.xlu0 %1994 }
 0x5a4   : > { %7194 = vmatpush3.bf16.xpose.msk.msra.mxu0 %vm9405_vm1, %v7192_v20  ;;  %v8495_v20 = vld [vmem:[#allocation3 + $0xd0] sm:$0xff]  ;;  %7750 = vrot.lane.b32.xlu0 %v7749_v49, %s8862_s24 }
 0x5a5   : > { %v8521_v49 = vld [vmem:[#allocation2 + $0xd0] sm:$0xff] }
 0x5a6   : > { %v8184_v9 = vpop.eup %8183 }
 0x5a7   : > { %v1841_v19 = vmul.f32 %v8184_v9, %v9924_v13  ;;  %v1840_v22 = vmul.f32 %v8184_v9, %v9922_v12  ;;  %v1999_v62 = vpop.permute.xlu0 %1998  ;;  %v8475_v13 = vld [vmem:[#allocation3 + $0x90] sm:$0xff]  ;;  %v7739_v9 = vpack.i.bf16 %v8496_v17, %v8495_v20 }
 0x5a8   : > { %v7699_v12 = vpack.i.bf16 %v8476_v14, %v8475_v13 }
 0x5a9   : > { %1979 = vmatprep.mubr.f32.mxu0 %v1841_v19  ;;  %v8497_v19 = vld [vmem:[#allocation2 + $0x80] sm:$0xff] }
 0x5aa   : > { %1980 = vmatmul.mubr.f32.gmra.mrb[44].mxu0 %v1840_v22  ;;  %7700 = vrot.lane.b32.xlu1 %v7699_v12, %s8862_s24  ;;  %v8498_v22 = vld [vmem:[#allocation2 + $0x88] sm:$0xff]  ;;  %v8503_v12 = vld [vmem:[#allocation3 + $0x60] sm:$0xff] }
 0x5ab   : > { %1984 = vmatprep.mubr.f32.mxu0 %v1844_v29  ;;  %v2001_v48 = vpop.permute.xlu0 %2000  ;;  %v2009_v29 = vpop.permute.xlu1 %2008 }
 0x5ae   : > { %1985 = vmatmul.mubr.f32.gmra.mrb[46].mxu0 %v1843_v43  ;;  %7705 = vrot.lane.b32.xlu1 %v7704_v1, %s8862_s24  ;;  %v8499_v43 = vld [vmem:[#allocation3 + $0x50] sm:$0xff]  ;;  %v10081_v1 = vpack.i.bf16 %v8506_v33, %v8505_v35 }
 0x5af   : > { %6147 = vmatprep.mubr.msk.f32.mxu0 %vm1299_vm0, %v1995_v56  ;;  %v2003_v39 = vpop.permute.xlu0 %2002  ;;  %v7744_v32 = vpack.i.bf16 %v8500_v37, %v8499_v43  ;;  %v2013_v28 = vpop.permute.xlu1 %2012  ;;  %v8525_v43 = vld [vmem:[#allocation2 + $0x30] sm:$0xff]  ;;  %v8526_v37 = vld [vmem:[#allocation2 + $0x38] sm:$0xff] }
 0x5b2   : > { %6148 = vmatmul.mubr.msk.f32.vlgmr.msra.gmra.mrb[48].mxu0 %vm1299_vm0, %v1995_v56  ;;  %7715 = vrot.lane.b32.xlu1 %v7714_v24, %s8862_s24  ;;  %v10067_v56 = vpack.i.bf16 %v8498_v22, %v8497_v19  ;;  %v8508_v24 = vld [vmem:[#allocation3 + $0xf8] sm:$0xff] }
 0x5b3   : > { %6149 = vmatprep.mubr.msk.f32.mxu0 %vm1299_vm0, %v1997_v38  ;;  %v2005_v59 = vpop.permute.xlu0 %2004  ;;  %v2017_v50 = vpop.permute.xlu1 %2016  ;;  %v8524_v19 = vld [vmem:[#allocation2 + $0xb8] sm:$0xff] }
 0x5b4   : > { %7770 = vrot.lane.b32.xlu0 %v10067_v56, %s8863_s16 }
 0x5b6   : > { %6150 = vmatmul.mubr.msk.f32.gmra.mrb[50].mxu0 %vm1299_vm0, %v1997_v38  ;;  %7720 = vrot.lane.b32.xlu1 %v7719_v15, %s8862_s24  ;;  %v8504_v38 = vld [vmem:[#allocation3 + $0x68] sm:$0xff]  ;;  %v10088_v15 = vpack.i.bf16 %v8510_v57, %v8509_v3 }
 0x5b7   : > { %6151 = vmatprep.mubr.msk.f32.mxu0 %vm1299_vm0, %v1999_v62  ;;  %v2007_v55 = vpop.permute.xlu0 %2006  ;;  %v2021_v17 = vpop.permute.xlu1 %2020 }
 0x5ba   : > { %6152 = vmatmul.mubr.msk.f32.gmra.mrb[52].mxu0 %vm1299_vm0, %v1999_v62  ;;  %7725 = vrot.lane.b32.xlu1 %v7724_v36, %s8862_s24  ;;  %v8502_v62 = vld [vmem:[#allocation2 + $0x8] sm:$0xff]  ;;  %v8515_v36 = vld [vmem:[#allocation2 + $0x90] sm:$0xff] }
 0x5bb   : > { %6153 = vmatprep.mubr.msk.f32.mxu0 %vm1299_vm0, %v2001_v48  ;;  %v10074_v13 = vpack.i.bf16 %v8502_v62, %v8501_v27  ;;  %v2011_v14 = vpop.permute.xlu0 %2010  ;;  %v2025_v27 = vpop.permute.xlu1 %2024 }
 0x5bd   : > { %7775 = vrot.lane.b32.xlu0 %v10074_v13, %s8863_s16 }
 0x5be   : > { %6154 = vmatmul.mubr.msk.f32.gmra.mrb[54].mxu0 %vm1299_vm0, %v2001_v48  ;;  %7735 = vrot.lane.b32.xlu1 %v7734_v4, %s8862_s24  ;;  %v7754_v48 = vpack.i.bf16 %v8504_v38, %v8503_v12  ;;  %v8519_v4 = vld [vmem:[#allocation2 + $0x10] sm:$0xff] }
 0x5bf   : > { %6155 = vmatprep.mubr.msk.f32.mxu0 %vm1299_vm0, %v2003_v39  ;;  %v2015_v41 = vpop.permute.xlu0 %2014  ;;  %v10109_v7 = vpack.i.bf16 %v8520_v23, %v8519_v4 }
 0x5c1   : > { %7790 = vrot.lane.b32.xlu0 %v10081_v1, %s8863_s16 }
 0x5c2   : > { %6156 = vmatmul.mubr.msk.f32.gmra.mrb[56].mxu0 %vm1299_vm0, %v2003_v39  ;;  %7740 = vrot.lane.b32.xlu1 %v7739_v9, %s8862_s24  ;;  %v7759_v39 = vpack.i.bf16 %v8508_v24, %v8507_v6  ;;  %v8523_v9 = vld [vmem:[#allocation2 + $0xb0] sm:$0xff] }
 0x5c3   : > { %6157 = vmatprep.mubr.msk.f32.mxu0 %vm1299_vm0, %v2005_v59  ;;  %v2019_v44 = vpop.permute.xlu0 %2018  ;;  %v10119_v22 = vpack.i.bf16 %v8524_v19, %v8523_v9 }
 0x5c5   : > { %7795 = vrot.lane.b32.xlu0 %v10088_v15, %s8863_s16 }
 0x5c6   : > { %6158 = vmatmul.mubr.msk.f32.gmra.mrb[58].mxu0 %vm1299_vm0, %v2005_v59  ;;  %7745 = vrot.lane.b32.xlu1 %v7744_v32, %s8862_s24  ;;  %v8516_v59 = vld [vmem:[#allocation2 + $0x98] sm:$0xff]  ;;  %v10127_v32 = vpack.i.bf16 %v8526_v37, %v8525_v43 }
 0x5c7   : > { %6159 = vmatprep.mubr.msk.f32.mxu0 %vm1299_vm0, %v2007_v55  ;;  %v10099_v8 = vpack.i.bf16 %v8516_v59, %v8515_v36 }
 0x5c9   : > { %7810 = vrot.lane.b32.xlu0 %v10095_v58, %s8863_s16 }
 0x5ca   : > { %6160 = vmatmul.mubr.msk.f32.gmra.mrb[60].mxu0 %vm1299_vm0, %v2007_v55  ;;  %7755 = vrot.lane.b32.xlu1 %v7754_v48, %s8862_s24  ;;  %v8522_v55 = vld [vmem:[#allocation2 + $0xd8] sm:$0xff] }
 0x5cb   : > { %6161 = vmatprep.mubr.msk.f32.mxu0 %vm1299_vm0, %v2009_v29  ;;  %v10114_v20 = vpack.i.bf16 %v8522_v55, %v8521_v49 }
 0x5cd   : > { %7815 = vrot.lane.b32.xlu0 %v10104_v61, %s8863_s16  ;;  %11894 = vst [vmem:[#allocation32_spill] sm:$0xff] %v10114_v20 }
 0x5ce   : > { %6162 = vmatmul.mubr.msk.f32.gmra.mrb[62].mxu0 %vm1299_vm0, %v2009_v29  ;;  %7760 = vrot.lane.b32.xlu1 %v7759_v39, %s8862_s24  ;;  %v2023_v29 = vpop.permute.xlu0 %2022 }
 0x5cf   : > { %6163 = vmatprep.mubr.msk.f32.mxu0 %vm1299_vm0, %v2011_v14 }
 0x5d1   : > { %7820 = vrot.lane.b32.xlu0 %v10114_v20, %s8863_s16 }
 0x5d2   : > { %6164 = vmatmul.mubr.msk.f32.gmra.mrb[64].mxu0 %vm1299_vm0, %v2011_v14  ;;  %7765 = vrot.lane.b32.xlu1 %v7764_v51, %s8862_s24  ;;  %s12050_s24 = sld [smem:[#allocation74_spill]] }
 0x5d3   : > { %6165 = vmatprep.mubr.msk.f32.mxu0 %vm1299_vm0, %v2013_v28 }
 0x5d4   : > { %v7691_v43 = vpop.permute.xlu1 %7690 }
 0x5d6   : > { %6166 = vmatmul.mubr.msk.f32.gmra.mrb[66].mxu0 %vm1299_vm0, %v2013_v28  ;;  %7780 = vrot.lane.b32.xlu1 %v10099_v8, %s8863_s16 }
 0x5d7   : > { %6167 = vmatprep.mubr.msk.f32.mxu0 %vm1299_vm0, %v2015_v41 }
 0x5d8   : > { %s12051_s7 = smov %s12050_s24  ;;  %s11603_s30 = scalar_lea.hbm %s12050_s24, %s5838_s27 }
 0x5da   : > { %6168 = vmatmul.mubr.msk.f32.gmra.mrb[68].mxu0 %vm1299_vm0, %v2015_v41  ;;  %7785 = vrot.lane.b32.xlu1 %v10109_v7, %s8863_s16 }
 0x5db   : > { %6169 = vmatprep.mubr.msk.f32.mxu0 %vm1299_vm0, %v2017_v50 }
 0x5de   : > { %6170 = vmatmul.mubr.msk.f32.gmra.mrb[70].mxu0 %vm1299_vm0, %v2017_v50  ;;  %7800 = vrot.lane.b32.xlu1 %v10119_v22, %s8863_s16 }
 0x5df   : > { %6171 = vmatprep.mubr.msk.f32.mxu0 %vm1299_vm0, %v2019_v44 }
 0x5e2   : > { %6172 = vmatmul.mubr.msk.f32.gmra.mrb[72].mxu0 %vm1299_vm0, %v2019_v44  ;;  %7805 = vrot.lane.b32.xlu1 %v10127_v32, %s8863_s16 }
 0x5e3   : > { %6173 = vmatprep.mubr.msk.f32.mxu0 %vm1299_vm0, %v2021_v17 }
 0x5e6   : > { %6174 = vmatmul.mubr.msk.f32.gmra.mrb[74].mxu0 %vm1299_vm0, %v2021_v17 }
 0x5e7   : > { %6175 = vmatprep.mubr.msk.f32.mxu0 %vm1299_vm0, %v2023_v29 }
 0x5ea   : > { %6176 = vmatmul.mubr.msk.f32.gmra.mrb[76].mxu0 %vm1299_vm0, %v2023_v29 }
 0x5eb   : > { %6177 = vmatprep.mubr.msk.f32.mxu0 %vm1299_vm0, %v2025_v27 }
 0x5ee   : > { %6178 = vmatmul.mubr.msk.f32.gmra.mrb[78].mxu0 %vm1299_vm0, %v2025_v27 }
 0x604   : > { %v6067_v62 = vpop.f32.mrb[16].mxu0 }
 0x605   : > { %v6068_v14 = vpop.f32.mrb[17].mxu0 }
 0x606   : > { %v10135_v12 = vadd.f32 %v6068_v14, %v6067_v62 }
 0x608   : > { %11895 = vst [vmem:[#allocation46_spill] sm:$0xff] %v10135_v12  ;;  %v6070_v38 = vpop.f32.mrb[18].mxu0  ;;  %v8527_v12 = vld [vmem:[#allocation2 + $0x50] sm:$0xff] }
 0x609   : > { %v6071_v48 = vpop.f32.mrb[19].mxu0  ;;  %v10265_v11 = vpack.i.bf16 %v8528_v34, %v8527_v12 }
 0x60a   : > { %v10137_v35 = vadd.f32 %v6071_v48, %v6070_v38 }
 0x60b   : > { %11911 = vst [vmem:[#allocation56_spill] sm:$0xff] %v10265_v11 }
 0x60c   : > { %11896 = vst [vmem:[#allocation33_spill] sm:$0xff] %v10137_v35  ;;  %v6073_v33 = vpop.f32.mrb[20].mxu0 }
 0x60d   : > { %v6074_v28 = vpop.f32.mrb[21].mxu0 }
 0x60e   : > { %v10139_v6 = vadd.f32 %v6074_v28, %v6073_v33 }
 0x610   : > { %11897 = vst [vmem:[#allocation49_spill] sm:$0xff] %v10139_v6  ;;  %v6076_v24 = vpop.f32.mrb[22].mxu0 }
 0x611   : > { %v6077_v39 = vpop.f32.mrb[23].mxu0 }
 0x612   : > { %v10141_v3 = vadd.f32 %v6077_v39, %v6076_v24 }
 0x614   : > { %11898 = vst [vmem:[#allocation34_spill] sm:$0xff] %v10141_v3  ;;  %v6079_v57 = vpop.f32.mrb[24].mxu0 }
 0x615   : > { %v6080_v41 = vpop.f32.mrb[25].mxu0 }
 0x616   : > { %v10143_v21 = vadd.f32 %v6080_v41, %v6079_v57  ;;  %v7693_v41 = vunpack.i.h.bf16 %v7691_v43 }
 0x618   : > { %11899 = vst [vmem:[#allocation47_spill] sm:$0xff] %v10143_v21  ;;  %v6082_v31 = vpop.f32.mrb[26].mxu0 }
 0x619   : > { %v6083_v51 = vpop.f32.mrb[27].mxu0 }
 0x61a   : > { %v10145_v42 = vadd.f32 %v6083_v51, %v6082_v31  ;;  %v7692_v31 = vunpack.i.l.bf16 %v7691_v43 }
 0x61c   : > { %11900 = vst [vmem:[#allocation35_spill] sm:$0xff] %v10145_v42  ;;  %v6085_v52 = vpop.f32.mrb[28].mxu0  ;;  %v7701_v14 = vpop.permute.xlu1 %7700 }
 0x61d   : > { %v6086_v50 = vpop.f32.mrb[29].mxu0 }
 0x61e   : > { %v10147_v36 = vadd.f32 %v6086_v50, %v6085_v52  ;;  %v7696_v52 = vpop.permute.xlu0 %7695 }
 0x620   : > { %11901 = vst [vmem:[#allocation36_spill] sm:$0xff] %v10147_v36  ;;  %v6088_v59 = vpop.f32.mrb[30].mxu0  ;;  %v7706_v28 = vpop.permute.xlu1 %7705 }
 0x621   : > { %v6089_v26 = vpop.f32.mrb[31].mxu0  ;;  %v7708_v50 = vunpack.i.h.bf16 %v7706_v28 }
 0x622   : > { %v10149_v53 = vadd.f32 %v6089_v26, %v6088_v59  ;;  %v7707_v59 = vunpack.i.l.bf16 %v7706_v28  ;;  %v7698_v26 = vunpack.i.h.bf16 %v7696_v52 }
 0x624   : > { %11902 = vst [vmem:[#allocation48_spill] sm:$0xff] %v10149_v53  ;;  %v6091_v44 = vpop.f32.mrb[32].mxu0  ;;  %v7716_v51 = vpop.permute.xlu1 %7715 }
 0x625   : > { %v6092_v4 = vpop.f32.mrb[33].mxu0 }
 0x626   : > { %v10151_v23 = vadd.f32 %v6092_v4, %v6091_v44  ;;  %v7697_v44 = vunpack.i.l.bf16 %v7696_v52  ;;  %v7703_v4 = vunpack.i.h.bf16 %v7701_v14 }
 0x628   : > { %11903 = vst [vmem:[#allocation37_spill] sm:$0xff] %v10151_v23  ;;  %v6094_v49 = vpop.f32.mrb[34].mxu0 }
 0x629   : > { %v6095_v55 = vpop.f32.mrb[35].mxu0 }
 0x62a   : > { %v10153_v17 = vadd.f32 %v6095_v55, %v6094_v49  ;;  %v7702_v49 = vunpack.i.l.bf16 %v7701_v14  ;;  %v7721_v55 = vpop.permute.xlu1 %7720 }
 0x62c   : > { %11904 = vst [vmem:[#allocation38_spill] sm:$0xff] %v10153_v17  ;;  %v6097_v9 = vpop.f32.mrb[36].mxu0  ;;  %v7199_v43 = vpack.c.bf16 %v7703_v4, %v7702_v49 }
 0x62d   : > { %v6098_v19 = vpop.f32.mrb[37].mxu0 }
 0x62e   : > { %v10155_v29 = vadd.f32 %v6098_v19, %v6097_v9  ;;  %v7195_v9 = vpack.c.bf16 %v7693_v41, %v7692_v31  ;;  %v7197_v19 = vpack.c.bf16 %v7698_v26, %v7697_v44 }
 0x630   : > { %11905 = vst [vmem:[#allocation50_spill] sm:$0xff] %v10155_v29  ;;  %v6100_v37 = vpop.f32.mrb[38].mxu0  ;;  %7196 = vmatprep.subr.bf16.mxu1 %v7195_v9 }
 0x631   : > { %v6101_v27 = vpop.f32.mrb[39].mxu0  ;;  %7198 = vmatpush3.bf16.msra.mxu1 %v7197_v19 }
 0x632   : > { %v10157_v62 = vadd.f32 %v6101_v27, %v6100_v37  ;;  %v7201_v37 = vpack.c.bf16 %v7708_v50, %v7707_v59  ;;  %v7718_v27 = vunpack.i.h.bf16 %v7716_v51  ;;  %7200 = vmatprep.subr.bf16.mxu1 %v7199_v43 }
 0x634   : > { %11906 = vst [vmem:[#allocation51_spill] sm:$0xff] %v10157_v62  ;;  %v6103_v38 = vpop.f32.mrb[40].mxu0 }
 0x635   : > { %v6104_v48 = vpop.f32.mrb[41].mxu0  ;;  %7202 = vmatpush3.bf16.msra.mxu1 %v7201_v37 }
 0x636   : > { %v10159_v33 = vadd.f32 %v6104_v48, %v6103_v38  ;;  %v7717_v38 = vunpack.i.l.bf16 %v7716_v51  ;;  %v7723_v48 = vunpack.i.h.bf16 %v7721_v55 }
 0x638   : > { %11907 = vst [vmem:[#allocation52_spill] sm:$0xff] %v10159_v33  ;;  %v6106_v24 = vpop.f32.mrb[42].mxu0  ;;  %v7205_v28 = vpack.c.bf16 %v7718_v27, %v7717_v38 }
 0x639   : > { %v6107_v39 = vpop.f32.mrb[43].mxu0 }
 0x63a   : > { %v10161_v57 = vadd.f32 %v6107_v39, %v6106_v24  ;;  %v7722_v24 = vunpack.i.l.bf16 %v7721_v55  ;;  %v7726_v39 = vpop.permute.xlu1 %7725 }
 0x63b   : > { %v7728_v52 = vunpack.i.h.bf16 %v7726_v39  ;;  %v7727_v29 = vunpack.i.l.bf16 %v7726_v39 }
 0x63c   : > { %11908 = vst [vmem:[#allocation53_spill] sm:$0xff] %v10161_v57  ;;  %v7711_v57 = vpop.permute.xlu0 %7710  ;;  %v7207_v26 = vpack.c.bf16 %v7723_v48, %v7722_v24 }
 0x63d   : > { %v7713_v33 = vunpack.i.h.bf16 %v7711_v57  ;;  %v7712_v62 = vunpack.i.l.bf16 %v7711_v57  ;;  %v7209_v59 = vpack.c.bf16 %v7728_v52, %v7727_v29 }
 0x63e   : > { %v7736_v41 = vpop.permute.xlu1 %7735 }
 0x63f   : > { %v7203_v14 = vpack.c.bf16 %v7713_v33, %v7712_v62  ;;  %v7738_v44 = vunpack.i.h.bf16 %v7736_v41  ;;  %v7737_v55 = vunpack.i.l.bf16 %v7736_v41 }
 0x640   : > { %v7731_v31 = vpop.permute.xlu0 %7730 }
 0x641   : > { %7204 = vmatprep.subr.bf16.mxu1 %v7203_v14  ;;  %v7733_v50 = vunpack.i.h.bf16 %v7731_v31  ;;  %v7732_v51 = vunpack.i.l.bf16 %v7731_v31  ;;  %v7213_v57 = vpack.c.bf16 %v7738_v44, %v7737_v55 }
 0x642   : > { %7206 = vmatpush3.bf16.msra.mxu1 %v7205_v28  ;;  %v7741_v4 = vpop.permute.xlu1 %7740 }
 0x643   : > { %7208 = vmatprep.subr.bf16.mxu1 %v7207_v26  ;;  %v7211_v49 = vpack.c.bf16 %v7733_v50, %v7732_v51  ;;  %v7743_v9 = vunpack.i.h.bf16 %v7741_v4  ;;  %v7742_v19 = vunpack.i.l.bf16 %v7741_v4 }
 0x644   : > { %v7751_v48 = vpop.permute.xlu0 %7750 }
 0x645   : > { %v7215_v24 = vpack.c.bf16 %v7743_v9, %v7742_v19  ;;  %v7753_v43 = vunpack.i.h.bf16 %v7751_v48  ;;  %v7752_v28 = vunpack.i.l.bf16 %v7751_v48 }
 0x646   : > { %7210 = vmatpush3.bf16.msra.mxu1 %v7209_v59  ;;  %v7746_v27 = vpop.permute.xlu1 %7745 }
 0x647   : > { %7212 = vmatprep.subr.bf16.mxu1 %v7211_v49  ;;  %v7748_v62 = vunpack.i.h.bf16 %v7746_v27  ;;  %v7747_v33 = vunpack.i.l.bf16 %v7746_v27  ;;  %v7219_v41 = vpack.c.bf16 %v7753_v43, %v7752_v28 }
 0x648   : > { %v7771_v31 = vpop.permute.xlu0 %7770 }
 0x649   : > { %v7217_v37 = vpack.c.bf16 %v7748_v62, %v7747_v33  ;;  %v7773_v51 = vunpack.i.h.bf16 %v7771_v31  ;;  %v7772_v59 = vunpack.i.l.bf16 %v7771_v31 }
 0x64a   : > { %7214 = vmatpush3.bf16.msra.mxu1 %v7213_v57  ;;  %v7756_v38 = vpop.permute.xlu1 %7755 }
 0x64b   : > { %v7758_v29 = vunpack.i.h.bf16 %v7756_v38  ;;  %v7757_v39 = vunpack.i.l.bf16 %v7756_v38  ;;  %7216 = vmatprep.subr.bf16.mxu1 %v7215_v24  ;;  %v7243_v57 = vpack.c.bf16 %v7773_v51, %v7772_v59 }
 0x64c   : > { %v10277_v30 = vpop.permute.xlu0 %7775 }
 0x64d   : > { %v7221_v52 = vpack.c.bf16 %v7758_v29, %v7757_v39 }
 0x64e   : > { %7218 = vmatpush3.bf16.msra.mxu1 %v7217_v37  ;;  %v7761_v14 = vpop.permute.xlu1 %7760 }
 0x64f   : > { %v7763_v26 = vunpack.i.h.bf16 %v7761_v14  ;;  %v7762_v50 = vunpack.i.l.bf16 %v7761_v14  ;;  %7220 = vmatprep.subr.bf16.mxu1 %v7219_v41 }
 0x650   : > { %v10279_v34 = vpop.permute.xlu0 %7790 }
 0x651   : > { %v7223_v44 = vpack.c.bf16 %v7763_v26, %v7762_v50  ;;  %11914 = vst [vmem:[#allocation59_spill] sm:$0xff] %v10279_v34 }
 0x652   : > { %7222 = vmatpush3.bf16.msra.mxu1 %v7221_v52  ;;  %v7766_v55 = vpop.permute.xlu1 %7765 }
 0x653   : > { %v7768_v4 = vunpack.i.h.bf16 %v7766_v55  ;;  %v7767_v49 = vunpack.i.l.bf16 %v7766_v55  ;;  %7224 = vmatprep.subr.bf16.mxu1 %v7223_v44 }
 0x655   : > { %v7225_v9 = vpack.c.bf16 %v7768_v4, %v7767_v49 }
 0x656   : > { %v10283_v12 = vpop.permute.xlu1 %7780 }
 0x657   : > { %7226 = vmatpush3.bf16.msra.mxu1 %v7225_v9 }
 0x658   : > { %7245 = vmatprep.subr.msk.bf16.mxu1 %vm9405_vm1, %v7243_v57 }
 0x67d   : > { %v6109_v19 = vpop.f32.mrb[44].mxu0 }
 0x67e   : > { %v6110_v27 = vpop.f32.mrb[45].mxu0 }
 0x67f   : > { %v10165_v62 = vadd.f32 %v6110_v27, %v6109_v19 }
 0x681   : > { %11909 = vst [vmem:[#allocation54_spill] sm:$0xff] %v10165_v62  ;;  %v6112_v33 = vpop.f32.mrb[46].mxu0 }
 0x682   : > { %v6113_v37 = vpop.f32.mrb[47].mxu0 }
 0x683   : > { %v10167_v38 = vadd.f32 %v6113_v37, %v6112_v33 }
 0x685   : > { %11910 = vst [vmem:[#allocation55_spill] sm:$0xff] %v10167_v38  ;;  %v10169_v48 = vpop.f32.mrb[48].mxu0 }
 0x686   : > { %v10171_v24 = vpop.f32.mrb[49].mxu0 }
 0x687   : > { %v2347_v29 = vmax.f32 %v10169_v48, %v10171_v24 }
 0x689   : > { %2348 = vmax.xlane.f32.xlu0 %v2347_v29  ;;  %v10175_v39 = vpop.f32.mrb[50].mxu0 }
 0x68a   : > { %v10177_v43 = vpop.f32.mrb[51].mxu0 }
 0x68b   : > { %v2350_v28 = vmax.f32 %v10175_v39, %v10177_v43 }
 0x68d   : > { %2351 = vmax.xlane.f32.xlu1 %v2350_v28  ;;  %v10181_v52 = vpop.f32.mrb[52].mxu0 }
 0x68e   : > { %v10183_v14 = vpop.f32.mrb[53].mxu0 }
 0x68f   : > { %v2353_v41 = vmax.f32 %v10181_v52, %v10183_v14 }
 0x691   : > { %2354 = vmax.xlane.f32.xlu0 %v2353_v41  ;;  %v10187_v31 = vpop.f32.mrb[54].mxu0 }
 0x692   : > { %v10189_v26 = vpop.f32.mrb[55].mxu0 }
 0x693   : > { %v2356_v50 = vmax.f32 %v10187_v31, %v10189_v26 }
 0x695   : > { %2357 = vmax.xlane.f32.xlu0 %v2356_v50  ;;  %v10193_v51 = vpop.f32.mrb[56].mxu0 }
 0x696   : > { %v10195_v59 = vpop.f32.mrb[57].mxu0 }
 0x697   : > { %v2359_v44 = vmax.f32 %v10193_v51, %v10195_v59 }
 0x699   : > { %2360 = vmax.xlane.f32.xlu1 %v2359_v44  ;;  %v10199_v55 = vpop.f32.mrb[58].mxu0 }
 0x69a   : > { %v10201_v4 = vpop.f32.mrb[59].mxu0 }
 0x69b   : > { %v2362_v49 = vmax.f32 %v10199_v55, %v10201_v4 }
 0x69d   : > { %2363 = vmax.xlane.f32.xlu0 %v2362_v49  ;;  %v10205_v57 = vpop.f32.mrb[60].mxu0 }
 0x69e   : > { %v10207_v9 = vpop.f32.mrb[61].mxu0 }
 0x69f   : > { %v2365_v19 = vmax.f32 %v10205_v57, %v10207_v9 }
 0x6a1   : > { %2366 = vmax.xlane.f32.xlu1 %v2365_v19  ;;  %v10211_v27 = vpop.f32.mrb[62].mxu0 }
 0x6a2   : > { %v10213_v33 = vpop.f32.mrb[63].mxu0 }
 0x6a3   : > { %v2368_v37 = vmax.f32 %v10211_v27, %v10213_v33 }
 0x6a5   : > { %2369 = vmax.xlane.f32.xlu0 %v2368_v37  ;;  %v10217_v29 = vpop.f32.mrb[64].mxu0 }
 0x6a6   : > { %v10219_v28 = vpop.f32.mrb[65].mxu0 }
 0x6a7   : > { %v2371_v41 = vmax.f32 %v10217_v29, %v10219_v28 }
 0x6a9   : > { %2372 = vmax.xlane.f32.xlu1 %v2371_v41  ;;  %v10223_v50 = vpop.f32.mrb[66].mxu0 }
 0x6aa   : > { %v10225_v44 = vpop.f32.mrb[67].mxu0 }
 0x6ab   : > { %v2374_v49 = vmax.f32 %v10223_v50, %v10225_v44 }
 0x6ad   : > { %2375 = vmax.xlane.f32.xlu0 %v2374_v49  ;;  %v10229_v19 = vpop.f32.mrb[68].mxu0 }
 0x6ae   : > { %v10231_v38 = vpop.f32.mrb[69].mxu0 }
 0x6af   : > { %v2377_v37 = vmax.f32 %v10229_v19, %v10231_v38 }
 0x6b1   : > { %2378 = vmax.xlane.f32.xlu1 %v2377_v37  ;;  %v10235_v62 = vpop.f32.mrb[70].mxu0 }
 0x6b2   : > { %v10237_v17 = vpop.f32.mrb[71].mxu0 }
 0x6b3   : > { %v2380_v41 = vmax.f32 %v10235_v62, %v10237_v17 }
 0x6b5   : > { %2381 = vmax.xlane.f32.xlu0 %v2380_v41  ;;  %v10241_v23 = vpop.f32.mrb[72].mxu0 }
 0x6b6   : > { %v10243_v53 = vpop.f32.mrb[73].mxu0 }
 0x6b7   : > { %v2383_v49 = vmax.f32 %v10241_v23, %v10243_v53 }
 0x6b9   : > { %2384 = vmax.xlane.f32.xlu1 %v2383_v49  ;;  %v10247_v36 = vpop.f32.mrb[74].mxu0 }
 0x6ba   : > { %v10249_v42 = vpop.f32.mrb[75].mxu0 }
 0x6bb   : > { %v2386_v37 = vmax.f32 %v10247_v36, %v10249_v42 }
 0x6bd   : > { %2387 = vmax.xlane.f32.xlu0 %v2386_v37  ;;  %v10253_v21 = vpop.f32.mrb[76].mxu0  ;;  %v8529_v37 = vld [vmem:[#allocation2 + $0xe0] sm:$0xff] }
 0x6be   : > { %v10255_v3 = vpop.f32.mrb[77].mxu0  ;;  %v10267_v46 = vpack.i.bf16 %v8530_v0, %v8529_v37  ;;  %v10281_v0 = vpop.permute.xlu0 %7795 }
 0x6bf   : > { %v2389_v41 = vmax.f32 %v10253_v21, %v10255_v3  ;;  %11915 = vst [vmem:[#allocation60_spill] sm:$0xff] %v10281_v0 }
 0x6c0   : > { %11912 = vst [vmem:[#allocation57_spill] sm:$0xff] %v10267_v46 }
 0x6c1   : > { %2390 = vmax.xlane.f32.xlu1 %v2389_v41  ;;  %v10259_v6 = vpop.f32.mrb[78].mxu0  ;;  %v8531_v41 = vld [vmem:[#allocation2 + $0x60] sm:$0xff] }
 0x6c2   : > { %v10261_v35 = vpop.f32.mrb[79].mxu0  ;;  %v10273_v20 = vpack.i.bf16 %v8532_v63, %v8531_v41  ;;  %v10285_v37 = vpop.permute.xlu0 %7810 }
 0x6c3   : > { %v2392_v49 = vmax.f32 %v10259_v6, %v10261_v35  ;;  %11916 = vst [vmem:[#allocation61_spill] sm:$0xff] %v10285_v37  ;;  %v10289_v63 = vpop.permute.xlu1 %7785 }
 0x6c4   : > { %11913 = vst [vmem:[#allocation58_spill] sm:$0xff] %v10273_v20  ;;  %11918 = vst [vmem:[#allocation63_spill] sm:$0xff] %v10289_v63 }
 0x6c6   : > { %v10291_v41 = vpop.permute.xlu0 %7815 }
 0x6c7   : > { %11919 = vst [vmem:[#allocation64_spill] sm:$0xff] %v10291_v41 }
 0x6d2   : > { %7825 = vrot.lane.b32.xlu1 %v10265_v11, %s8863_s16  ;;  %v8533_v11 = vld [vmem:[#allocation2 + $0xf0] sm:$0xff] }
 0x6d3   : > { %7830 = vrot.lane.b32.xlu0 %v10267_v46, %s8863_s16  ;;  %v8534_v46 = vld [vmem:[#allocation2 + $0xf8] sm:$0xff] }
 0x6d4   : > { %v10287_v45 = vpack.i.bf16 %v8534_v46, %v8533_v11 }
 0x6d6   : > { %11917 = vst [vmem:[#allocation62_spill] sm:$0xff] %v10287_v45 }
 0x6d7   : > { %7835 = vrot.lane.b32.xlu0 %v10273_v20, %s8863_s16  ;;  %v10297_v20 = vpop.permute.xlu0 %7820 }
 0x6d8   : > { %11921 = vst [vmem:[#allocation66_spill] sm:$0xff] %v10297_v20 }
 0x6f6   : > { %2393 = vmax.xlane.f32.xlu0 %v2392_v49  ;;  %v10295_v49 = vpop.permute.xlu1 %7800 }
 0x6f7   : > { %11920 = vst [vmem:[#allocation65_spill] sm:$0xff] %v10295_v49 }
 0x6fa   : > { %v10299_v0 = vpop.permute.xlu1 %7805 }
 0x6fb   : > { %11922 = vst [vmem:[#allocation67_spill] sm:$0xff] %v10299_v0 }
 0x70c   : > { %7840 = vrot.lane.b32.xlu0 %v10287_v45, %s8863_s16 }
 0x716   : > { %v2349_v34 = vpop.xlane.xlu0 %2348 }
 0x717   : > { %v2395_v37 = vsub.f32 %v10169_v48, %v2349_v34  ;;  %v2396_v61 = vsub.f32 %v10171_v24, %v2349_v34 }
 0x719   : > { %v2427_v46 = vmul.f32 1.442695, %v2395_v37  ;;  %v2429_v11 = vmul.f32 1.442695, %v2396_v61 }
 0x71a   : > { %v2352_v60 = vpop.xlane.xlu1 %2351 }
 0x71b   : > { %8185 = vpow2.f32 %v2427_v46  ;;  %v2397_v41 = vsub.f32 %v10175_v39, %v2352_v60  ;;  %v2398_v63 = vsub.f32 %v10177_v43, %v2352_v60 }
 0x71c   : > { %8187 = vpow2.f32 %v2429_v11 }
 0x71d   : > { %v2431_v45 = vmul.f32 1.442695, %v2397_v41  ;;  %v2433_v49 = vmul.f32 1.442695, %v2398_v63 }
 0x71e   : > { %v2355_v58 = vpop.xlane.xlu0 %2354 }
 0x71f   : > { %8189 = vpow2.f32 %v2431_v45  ;;  %v2399_v20 = vsub.f32 %v10181_v52, %v2355_v58  ;;  %v2400_v0 = vsub.f32 %v10183_v14, %v2355_v58 }
 0x720   : > { %8191 = vpow2.f32 %v2433_v49 }
 0x721   : > { %v2435_v48 = vmul.f32 1.442695, %v2399_v20  ;;  %v2437_v24 = vmul.f32 1.442695, %v2400_v0 }
 0x722   : > { %v2358_v34 = vpop.xlane.xlu0 %2357 }
 0x723   : > { %8193 = vpow2.f32 %v2435_v48  ;;  %v2401_v61 = vsub.f32 %v10187_v31, %v2358_v34  ;;  %v2402_v39 = vsub.f32 %v10189_v26, %v2358_v34 }
 0x724   : > { %8195 = vpow2.f32 %v2437_v24 }
 0x725   : > { %v10309_v60 = vpop.eup %8185  ;;  %v2439_v43 = vmul.f32 1.442695, %v2401_v61  ;;  %v2441_v37 = vmul.f32 1.442695, %v2402_v39 }
 0x726   : > { %v10311_v63 = vpop.eup %8187  ;;  %v2361_v45 = vpop.xlane.xlu1 %2360 }
 0x727   : > { %8197 = vpow2.f32 %v2439_v43  ;;  %v2403_v58 = vsub.f32 %v10193_v51, %v2361_v45  ;;  %v2404_v20 = vsub.f32 %v10195_v59, %v2361_v45  ;;  %v2491_v26 = vadd.f32 %v10311_v63, %v10309_v60 }
 0x728   : > { %8199 = vpow2.f32 %v2441_v37 }
 0x729   : > { %v10315_v52 = vpop.eup %8189  ;;  %v2443_v14 = vmul.f32 1.442695, %v2403_v58  ;;  %v2445_v31 = vmul.f32 1.442695, %v2404_v20 }
 0x72a   : > { %v10319_v0 = vpop.eup %8191  ;;  %v2364_v41 = vpop.xlane.xlu0 %2363 }
 0x72b   : > { %8201 = vpow2.f32 %v2443_v14  ;;  %v2405_v49 = vsub.f32 %v10199_v55, %v2364_v41  ;;  %v2406_v46 = vsub.f32 %v10201_v4, %v2364_v41  ;;  %2492 = vadd.xlane.f32.xlu0 %v2491_v26  ;;  %v2494_v51 = vadd.f32 %v10319_v0, %v10315_v52 }
 0x72c   : > { %8203 = vpow2.f32 %v2445_v31 }
 0x72d   : > { %v10325_v59 = vpop.eup %8193  ;;  %v2447_v11 = vmul.f32 1.442695, %v2405_v49  ;;  %v2449_v48 = vmul.f32 1.442695, %v2406_v46  ;;  %2495 = vadd.xlane.f32.xlu1 %v2494_v51 }
 0x72e   : > { %v10327_v24 = vpop.eup %8195  ;;  %v2367_v34 = vpop.xlane.xlu1 %2366 }
 0x72f   : > { %8205 = vpow2.f32 %v2447_v11  ;;  %v2407_v61 = vsub.f32 %v10205_v57, %v2367_v34  ;;  %v2408_v55 = vsub.f32 %v10207_v9, %v2367_v34  ;;  %v2497_v4 = vadd.f32 %v10327_v24, %v10325_v59 }
 0x730   : > { %8207 = vpow2.f32 %v2449_v48 }
 0x731   : > { %v10333_v39 = vpop.eup %8197  ;;  %v2451_v43 = vmul.f32 1.442695, %v2407_v61  ;;  %v2453_v37 = vmul.f32 1.442695, %v2408_v55  ;;  %2498 = vadd.xlane.f32.xlu0 %v2497_v4 }
 0x732   : > { %v10335_v45 = vpop.eup %8199  ;;  %v2370_v58 = vpop.xlane.xlu0 %2369 }
 0x733   : > { %8209 = vpow2.f32 %v2451_v43  ;;  %v2409_v20 = vsub.f32 %v10211_v27, %v2370_v58  ;;  %v2410_v14 = vsub.f32 %v10213_v33, %v2370_v58  ;;  %v2500_v57 = vadd.f32 %v10335_v45, %v10333_v39 }
 0x734   : > { %8211 = vpow2.f32 %v2453_v37 }
 0x735   : > { %v10341_v9 = vpop.eup %8201  ;;  %v2455_v31 = vmul.f32 1.442695, %v2409_v20  ;;  %v2457_v26 = vmul.f32 1.442695, %v2410_v14  ;;  %2501 = vadd.xlane.f32.xlu1 %v2500_v57 }
 0x736   : > { %v10343_v41 = vpop.eup %8203  ;;  %v2373_v49 = vpop.xlane.xlu1 %2372 }
 0x737   : > { %8213 = vpow2.f32 %v2455_v31  ;;  %v2411_v46 = vsub.f32 %v10217_v29, %v2373_v49  ;;  %v2412_v51 = vsub.f32 %v10219_v28, %v2373_v49  ;;  %v2503_v27 = vadd.f32 %v10343_v41, %v10341_v9 }
 0x738   : > { %8215 = vpow2.f32 %v2457_v26 }
 0x739   : > { %v10349_v33 = vpop.eup %8205  ;;  %v2459_v11 = vmul.f32 1.442695, %v2411_v46  ;;  %v2461_v48 = vmul.f32 1.442695, %v2412_v51  ;;  %2504 = vadd.xlane.f32.xlu0 %v2503_v27 }
 0x73a   : > { %v10351_v34 = vpop.eup %8207  ;;  %v2376_v61 = vpop.xlane.xlu0 %2375 }
 0x73b   : > { %8217 = vpow2.f32 %v2459_v11  ;;  %v2413_v55 = vsub.f32 %v10223_v50, %v2376_v61  ;;  %v2414_v4 = vsub.f32 %v10225_v44, %v2376_v61  ;;  %v2506_v29 = vadd.f32 %v10351_v34, %v10349_v33 }
 0x73c   : > { %8219 = vpow2.f32 %v2461_v48 }
 0x73d   : > { %v10357_v28 = vpop.eup %8209  ;;  %v2463_v43 = vmul.f32 1.442695, %v2413_v55  ;;  %v2465_v37 = vmul.f32 1.442695, %v2414_v4  ;;  %2507 = vadd.xlane.f32.xlu1 %v2506_v29 }
 0x73e   : > { %v10359_v58 = vpop.eup %8211  ;;  %v2379_v20 = vpop.xlane.xlu1 %2378 }
 0x73f   : > { %8221 = vpow2.f32 %v2463_v43  ;;  %v2415_v14 = vsub.f32 %v10229_v19, %v2379_v20  ;;  %v2416_v57 = vsub.f32 %v10231_v38, %v2379_v20  ;;  %v2509_v50 = vadd.f32 %v10359_v58, %v10357_v28 }
 0x740   : > { %8223 = vpow2.f32 %v2465_v37 }
 0x741   : > { %v10365_v44 = vpop.eup %8213  ;;  %v2467_v31 = vmul.f32 1.442695, %v2415_v14  ;;  %v2469_v26 = vmul.f32 1.442695, %v2416_v57  ;;  %2510 = vadd.xlane.f32.xlu0 %v2509_v50 }
 0x742   : > { %v10367_v49 = vpop.eup %8215  ;;  %v2382_v46 = vpop.xlane.xlu0 %2381 }
 0x743   : > { %8225 = vpow2.f32 %v2467_v31  ;;  %v2417_v51 = vsub.f32 %v10235_v62, %v2382_v46  ;;  %v2418_v27 = vsub.f32 %v10237_v17, %v2382_v46  ;;  %v2512_v38 = vadd.f32 %v10367_v49, %v10365_v44 }
 0x744   : > { %8227 = vpow2.f32 %v2469_v26 }
 0x745   : > { %v10373_v19 = vpop.eup %8217  ;;  %v2471_v11 = vmul.f32 1.442695, %v2417_v51  ;;  %v2473_v48 = vmul.f32 1.442695, %v2418_v27  ;;  %2513 = vadd.xlane.f32.xlu1 %v2512_v38 }
 0x746   : > { %v10375_v61 = vpop.eup %8219  ;;  %v2385_v55 = vpop.xlane.xlu1 %2384 }
 0x747   : > { %8229 = vpow2.f32 %v2471_v11  ;;  %v2419_v4 = vsub.f32 %v10241_v23, %v2385_v55  ;;  %v2420_v29 = vsub.f32 %v10243_v53, %v2385_v55  ;;  %v2515_v17 = vadd.f32 %v10375_v61, %v10373_v19 }
 0x748   : > { %8231 = vpow2.f32 %v2473_v48 }
 0x749   : > { %v10381_v62 = vpop.eup %8221  ;;  %v2475_v43 = vmul.f32 1.442695, %v2419_v4  ;;  %v2477_v37 = vmul.f32 1.442695, %v2420_v29  ;;  %2516 = vadd.xlane.f32.xlu0 %v2515_v17  ;;  %v8535_v17 = vld [vmem:[#allocation2 + $0x70] sm:$0xff] }
 0x74a   : > { %v10383_v20 = vpop.eup %8223  ;;  %v2388_v14 = vpop.xlane.xlu0 %2387 }
 0x74b   : > { %8233 = vpow2.f32 %v2475_v43  ;;  %v2421_v57 = vsub.f32 %v10247_v36, %v2388_v14  ;;  %v2422_v50 = vsub.f32 %v10249_v42, %v2388_v14  ;;  %v2518_v53 = vadd.f32 %v10383_v20, %v10381_v62  ;;  %v8536_v43 = vld [vmem:[#allocation2 + $0x78] sm:$0xff] }
 0x74c   : > { %8235 = vpow2.f32 %v2477_v37  ;;  %v10413_v37 = vpack.i.bf16 %v8536_v43, %v8535_v17 }
 0x74d   : > { %v10389_v23 = vpop.eup %8225  ;;  %v2479_v31 = vmul.f32 1.442695, %v2421_v57  ;;  %v2481_v26 = vmul.f32 1.442695, %v2422_v50  ;;  %2519 = vadd.xlane.f32.xlu1 %v2518_v53 }
 0x74e   : > { %v10391_v46 = vpop.eup %8227  ;;  %v2391_v14 = vpop.xlane.xlu1 %2390 }
 0x74f   : > { %8237 = vpow2.f32 %v2479_v31  ;;  %v2521_v51 = vadd.f32 %v10391_v46, %v10389_v23  ;;  %v2423_v57 = vsub.f32 %v10253_v21, %v2391_v14  ;;  %v2424_v50 = vsub.f32 %v10255_v3, %v2391_v14  ;;  %v10421_v53 = vpop.permute.xlu0 %7830 }
 0x750   : > { %8239 = vpow2.f32 %v2481_v26 }
 0x751   : > { %v10395_v27 = vpop.eup %8229  ;;  %2522 = vadd.xlane.f32.xlu0 %v2521_v51  ;;  %v2483_v31 = vmul.f32 1.442695, %v2423_v57  ;;  %v2485_v26 = vmul.f32 1.442695, %v2424_v50 }
 0x752   : > { %v10397_v36 = vpop.eup %8231 }
 0x753   : > { %v2524_v42 = vadd.f32 %v10397_v36, %v10395_v27  ;;  %8241 = vpow2.f32 %v2483_v31  ;;  %v10423_v51 = vpop.permute.xlu0 %7835 }
 0x754   : > { %8243 = vpow2.f32 %v2485_v26  ;;  %v7783_v26 = vunpack.i.h.bf16 %v10283_v12 }
 0x755   : > { %v10401_v38 = vpop.eup %8233  ;;  %2525 = vadd.xlane.f32.xlu1 %v2524_v42 }
 0x756   : > { %v10403_v11 = vpop.eup %8235 }
 0x757   : > { %v2527_v48 = vadd.f32 %v10403_v11, %v10401_v38 }
 0x759   : > { %v10407_v55 = vpop.eup %8237  ;;  %2528 = vadd.xlane.f32.xlu0 %v2527_v48 }
 0x75a   : > { %11923 = vst [vmem:[#allocation68_spill] sm:$0xff] %v10407_v55  ;;  %v10409_v4 = vpop.eup %8239 }
 0x75b   : > { %v2530_v29 = vadd.f32 %v10409_v4, %v10407_v55 }
 0x75d   : > { %2531 = vadd.xlane.f32.xlu1 %v2530_v29  ;;  %v10427_v55 = vpop.eup %8241 }
 0x75e   : > { %v10429_v21 = vpop.eup %8243 }
 0x75f   : > { %v2533_v3 = vadd.f32 %v10429_v21, %v10427_v55 }
 0x76e   : > { %3250 = vrot.lane.b32.xlu1 %v11877_v25, %s8863_s16 }
 0x76f   : > { %7845 = vrot.lane.b32.xlu0 %v10413_v37, %s8863_s16 }
 0x783   : > { %v2394_v42 = vpop.xlane.xlu0 %2393 }
 0x784   : > { %v2425_v48 = vsub.f32 %v10259_v6, %v2394_v42  ;;  %v2426_v29 = vsub.f32 %v10261_v35, %v2394_v42  ;;  %v7782_v42 = vunpack.i.l.bf16 %v10283_v12  ;;  %v11925_v12 = vld [vmem:[#allocation39_spill] sm:$0xff] }
 0x786   : > { %v2487_v17 = vmul.f32 1.442695, %v2425_v48  ;;  %v2489_v43 = vmul.f32 1.442695, %v2426_v29 }
 0x788   : > { %8245 = vpow2.f32 %v2487_v17 }
 0x789   : > { %8247 = vpow2.f32 %v2489_v43 }
 0x78e   : > { %2534 = vadd.xlane.f32.xlu0 %v2533_v3  ;;  %v7249_v3 = vpack.c.bf16 %v7783_v26, %v7782_v42  ;;  %v11930_v42 = vld [vmem:[#allocation40_spill] sm:$0xff] }
 0x792   : > { %v10433_v14 = vpop.eup %8245 }
 0x793   : > { %v10435_v57 = vpop.eup %8247 }
 0x794   : > { %v2536_v6 = vadd.f32 %v10435_v57, %v10433_v14 }
 0x796   : > { %2537 = vadd.xlane.f32.xlu1 %v2536_v6  ;;  %v11926_v6 = vld [vmem:[#allocation31_spill] sm:$0xff] }
 0x7a4   : > { %7850 = vrot.lane.b32.xlu0 %v10067_v56, %s8864_s17  ;;  %v10455_v56 = vpop.permute.xlu0 %7840 }
 0x7a7   : > { %3252 = vrot.lane.b32.xlu1 %v9571_v16, %s8863_s16 }
 0x7a8   : > { %7855 = vrot.lane.b32.xlu0 %v10074_v13, %s8864_s17  ;;  %v10459_v13 = vpop.permute.xlu1 %7825 }
 0x7ab   : > { %3254 = vrot.lane.b32.xlu1 %v11879_v40, %s8863_s16 }
 0x7ac   : > { %7860 = vrot.lane.b32.xlu0 %v10099_v8, %s8864_s17 }
 0x7af   : > { %3256 = vrot.lane.b32.xlu1 %v11881_v2, %s8863_s16 }
 0x7b0   : > { %7865 = vrot.lane.b32.xlu0 %v10109_v7, %s8864_s17 }
 0x7b3   : > { %3258 = vrot.lane.b32.xlu1 %v11884_v10, %s8863_s16 }
 0x7b4   : > { %7870 = vrot.lane.b32.xlu0 %v10081_v1, %s8864_s17  ;;  %v7778_v1 = vunpack.i.h.bf16 %v10277_v30 }
 0x7b7   : > { %3260 = vrot.lane.b32.xlu1 %v11885_v47, %s8863_s16 }
 0x7b8   : > { %7875 = vrot.lane.b32.xlu0 %v10088_v15, %s8864_s17  ;;  %v2493_v8 = vpop.xlane.xlu0 %2492  ;;  %v7777_v15 = vunpack.i.l.bf16 %v10277_v30 }
 0x7b9   : > { %8249 = vrcp.f32 %v2493_v8 }
 0x7ba   : > { %v2496_v35 = vpop.xlane.xlu1 %2495  ;;  %v7246_v17 = vpack.c.bf16 %v7778_v1, %v7777_v15 }
 0x7bb   : > { %8251 = vrcp.f32 %v2496_v35  ;;  %3262 = vrot.lane.b32.xlu1 %v11887_v5, %s8863_s16 }
 0x7bc   : > { %7880 = vrot.lane.b32.xlu0 %v10119_v22, %s8864_s17  ;;  %v11924_v22 = vld [vmem:[#allocation30_spill] sm:$0xff] }
 0x7be   : > { %v2499_v7 = vpop.xlane.xlu0 %2498 }
 0x7bf   : > { %8253 = vrcp.f32 %v2499_v7  ;;  %3264 = vrot.lane.b32.xlu1 %v9609_v54, %s8863_s16 }
 0x7c0   : > { %7885 = vrot.lane.b32.xlu0 %v10127_v32, %s8864_s17 }
 0x7c2   : > { %v2502_v50 = vpop.xlane.xlu1 %2501 }
 0x7c3   : > { %v8250_v31 = vpop.eup %8249  ;;  %8255 = vrcp.f32 %v2502_v50  ;;  %3266 = vrot.lane.b32.xlu1 %v11888_v18, %s8863_s16  ;;  %v11929_v50 = vld [vmem:[#allocation59_spill] sm:$0xff] }
 0x7c4   : > { %7890 = vrot.lane.b32.xlu0 %v11924_v22, %s8864_s17  ;;  %v2541_v48 = vmul.f32 %v8250_v31, %v10311_v63  ;;  %v2540_v32 = vmul.f32 %v8250_v31, %v10309_v60  ;;  %v7793_v31 = vunpack.i.h.bf16 %v11929_v50  ;;  %v7792_v26 = vunpack.i.l.bf16 %v11929_v50  ;;  %v11931_v22 = vld [vmem:[#allocation32_spill] sm:$0xff]  ;;  %v11937_v50 = vld [vmem:[#allocation57_spill] sm:$0xff] }
 0x7c5   : > { %v8252_v29 = vpop.eup %8251 }
 0x7c6   : > { %v2505_v30 = vpop.xlane.xlu0 %2504  ;;  %2779 = vmatprep.mubr.f32.mxu1 %v2541_v48  ;;  %v2544_v43 = vmul.f32 %v8252_v29, %v10319_v0  ;;  %v2543_v60 = vmul.f32 %v8252_v29, %v10315_v52  ;;  %v11928_v0 = vld [vmem:[#allocation63_spill] sm:$0xff] }
 0x7c7   : > { %8257 = vrcp.f32 %v2505_v30  ;;  %3268 = vrot.lane.b32.xlu1 %v11925_v12, %s8863_s16  ;;  %2780 = vmatmul.mubr.f32.vlgmr.msra.gmra.mrb[32].mxu1 %v2540_v32  ;;  %v7788_v35 = vunpack.i.h.bf16 %v11928_v0  ;;  %v7787_v7 = vunpack.i.l.bf16 %v11928_v0  ;;  %v11932_v30 = vld [vmem:[#allocation41_spill] sm:$0xff] }
 0x7c8   : > { %7895 = vrot.lane.b32.xlu0 %v11926_v6, %s8864_s17  ;;  %7248 = vmatpush3.bf16.xpose.msk.msra.mxu1 %vm9405_vm1, %v7246_v17  ;;  %v7255_v17 = vpack.c.bf16 %v7793_v31, %v7792_v26 }
 0x7c9   : > { %v8254_v63 = vpop.eup %8253  ;;  %2784 = vmatprep.mubr.f32.mxu1 %v2544_v43  ;;  %7251 = vmatprep.subr.msk.bf16.mxu1 %vm9405_vm1, %v7249_v3  ;;  %v7252_v32 = vpack.c.bf16 %v7788_v35, %v7787_v7  ;;  %v11933_v43 = vld [vmem:[#allocation56_spill] sm:$0xff]  ;;  %v11935_v35 = vld [vmem:[#allocation65_spill] sm:$0xff] }
 0x7ca   : > { %v2508_v1 = vpop.xlane.xlu1 %2507  ;;  %v2547_v15 = vmul.f32 %v8254_v63, %v10327_v24  ;;  %v2546_v48 = vmul.f32 %v8254_v63, %v10325_v59  ;;  %v7803_v7 = vunpack.i.h.bf16 %v11935_v35 }
 0x7cb   : > { %8259 = vrcp.f32 %v2508_v1  ;;  %3270 = vrot.lane.b32.xlu1 %v11930_v42, %s8863_s16  ;;  %2785 = vmatmul.mubr.f32.gmra.mrb[34].mxu1 %v2543_v60  ;;  %v7802_v1 = vunpack.i.l.bf16 %v11935_v35 }
 0x7cc   : > { %7900 = vrot.lane.b32.xlu0 %v11931_v22, %s8864_s17  ;;  %2789 = vmatprep.mubr.f32.mxu1 %v2547_v15  ;;  %v11936_v15 = vld [vmem:[#allocation42_spill] sm:$0xff] }
 0x7cd   : > { %v8256_v52 = vpop.eup %8255 }
 0x7ce   : > { %v2511_v29 = vpop.xlane.xlu0 %2510  ;;  %v2550_v24 = vmul.f32 %v8256_v52, %v10335_v45  ;;  %v2549_v59 = vmul.f32 %v8256_v52, %v10333_v39  ;;  %v11934_v45 = vld [vmem:[#allocation60_spill] sm:$0xff]  ;;  %v7261_v52 = vpack.c.bf16 %v7803_v7, %v7802_v1 }
 0x7cf   : > { %8261 = vrcp.f32 %v2511_v29  ;;  %3272 = vrot.lane.b32.xlu1 %v11932_v30, %s8863_s16  ;;  %2790 = vmatmul.mubr.f32.gmra.mrb[36].mxu1 %v2546_v48  ;;  %v7798_v6 = vunpack.i.h.bf16 %v11934_v45  ;;  %v7797_v63 = vunpack.i.l.bf16 %v11934_v45  ;;  %v11938_v48 = vld [vmem:[#allocation43_spill] sm:$0xff] }
 0x7d0   : > { %7905 = vrot.lane.b32.xlu0 %v11933_v43, %s8864_s17  ;;  %7254 = vmatpush3.bf16.xpose.msk.msra.mxu1 %vm9405_vm1, %v7252_v32  ;;  %v11939_v32 = vld [vmem:[#allocation58_spill] sm:$0xff] }
 0x7d1   : > { %v8258_v3 = vpop.eup %8257  ;;  %2794 = vmatprep.mubr.f32.mxu1 %v2550_v24  ;;  %7257 = vmatprep.subr.msk.bf16.mxu1 %vm9405_vm1, %v7255_v17  ;;  %v7258_v26 = vpack.c.bf16 %v7798_v6, %v7797_v63  ;;  %v11942_v63 = vld [vmem:[#allocation44_spill] sm:$0xff] }
 0x7d2   : > { %v2514_v60 = vpop.xlane.xlu1 %2513  ;;  %v2553_v0 = vmul.f32 %v8258_v3, %v10343_v41  ;;  %v2552_v31 = vmul.f32 %v8258_v3, %v10341_v9 }
 0x7d3   : > { %8263 = vrcp.f32 %v2514_v60  ;;  %3274 = vrot.lane.b32.xlu1 %v11936_v15, %s8863_s16  ;;  %2795 = vmatmul.mubr.f32.gmra.mrb[38].mxu1 %v2549_v59  ;;  %v11941_v59 = vld [vmem:[#allocation61_spill] sm:$0xff]  ;;  %v11943_v60 = vld [vmem:[#allocation62_spill] sm:$0xff] }
 0x7d4   : > { %7910 = vrot.lane.b32.xlu0 %v11937_v50, %s8864_s17  ;;  %2799 = vmatprep.mubr.f32.mxu1 %v2553_v0  ;;  %v7813_v45 = vunpack.i.h.bf16 %v11941_v59  ;;  %v7812_v6 = vunpack.i.l.bf16 %v11941_v59  ;;  %v11944_v50 = vld [vmem:[#allocation45_spill] sm:$0xff] }
 0x7d5   : > { %v8260_v39 = vpop.eup %8259 }
 0x7d6   : > { %v2517_v22 = vpop.xlane.xlu0 %2516  ;;  %v2556_v41 = vmul.f32 %v8260_v39, %v10351_v34  ;;  %v2555_v9 = vmul.f32 %v8260_v39, %v10349_v33  ;;  %v11940_v34 = vld [vmem:[#allocation67_spill] sm:$0xff] }
 0x7d7   : > { %8265 = vrcp.f32 %v2517_v22  ;;  %3276 = vrot.lane.b32.xlu1 %v11938_v48, %s8863_s16  ;;  %2800 = vmatmul.mubr.f32.gmra.mrb[40].mxu1 %v2552_v31  ;;  %v7808_v24 = vunpack.i.h.bf16 %v11940_v34  ;;  %v7807_v17 = vunpack.i.l.bf16 %v11940_v34 }
 0x7d8   : > { %7915 = vrot.lane.b32.xlu0 %v11939_v32, %s8864_s17  ;;  %7260 = vmatpush3.bf16.xpose.msk.msra.mxu1 %vm9405_vm1, %v7258_v26 }
 0x7d9   : > { %v8262_v29 = vpop.eup %8261  ;;  %2804 = vmatprep.mubr.f32.mxu1 %v2556_v41  ;;  %7263 = vmatprep.subr.msk.bf16.mxu1 %vm9405_vm1, %v7261_v52  ;;  %v7264_v35 = vpack.c.bf16 %v7808_v24, %v7807_v17  ;;  %v11946_v52 = vld [vmem:[#allocation66_spill] sm:$0xff] }
 0x7da   : > { %v2520_v43 = vpop.xlane.xlu1 %2519  ;;  %v2559_v3 = vmul.f32 %v8262_v29, %v10359_v58  ;;  %v2558_v0 = vmul.f32 %v8262_v29, %v10357_v28  ;;  %v7267_v58 = vpack.c.bf16 %v7813_v45, %v7812_v6  ;;  %v7823_v32 = vunpack.i.h.bf16 %v11946_v52 }
 0x7db   : > { %8267 = vrcp.f32 %v2520_v43  ;;  %3278 = vrot.lane.b32.xlu1 %v11942_v63, %s8863_s16  ;;  %2805 = vmatmul.mubr.f32.gmra.mrb[42].mxu1 %v2555_v9  ;;  %v7832_v43 = vunpack.i.l.bf16 %v10421_v53 }
 0x7dc   : > { %7920 = vrot.lane.b32.xlu0 %v11943_v60, %s8864_s17  ;;  %2809 = vmatprep.mubr.f32.mxu1 %v2559_v3 }
 0x7dd   : > { %v8264_v33 = vpop.eup %8263 }
 0x7de   : > { %v2562_v7 = vmul.f32 %v8264_v33, %v10367_v49  ;;  %v2523_v1 = vpop.xlane.xlu0 %2522  ;;  %v2561_v28 = vmul.f32 %v8264_v33, %v10365_v44  ;;  %v11945_v49 = vld [vmem:[#allocation64_spill] sm:$0xff] }
 0x7df   : > { %3280 = vrot.lane.b32.xlu1 %v11944_v50, %s8863_s16  ;;  %2810 = vmatmul.mubr.f32.gmra.mrb[44].mxu1 %v2558_v0  ;;  %8269 = vrcp.f32 %v2523_v1  ;;  %v7818_v31 = vunpack.i.h.bf16 %v11945_v49  ;;  %v7817_v26 = vunpack.i.l.bf16 %v11945_v49 }
 0x7e0   : > { %7925 = vrot.lane.b32.xlu0 %v10413_v37, %s8864_s17  ;;  %7266 = vmatpush3.bf16.xpose.msk.msra.mxu1 %vm9405_vm1, %v7264_v35  ;;  %v7822_v37 = vunpack.i.l.bf16 %v11946_v52  ;;  %v2863_v35 = vld [vmem:[#allocation12 + $0x38] sm:$0xff] }
 0x7e1   : > { %v8266_v39 = vpop.eup %8265  ;;  %2814 = vmatprep.mubr.f32.mxu1 %v2562_v7  ;;  %7269 = vmatprep.subr.msk.bf16.mxu1 %vm9405_vm1, %v7267_v58  ;;  %v7270_v9 = vpack.c.bf16 %v7818_v31, %v7817_v26 }
 0x7e2   : > { %v2526_v22 = vpop.xlane.xlu1 %2525  ;;  %v2565_v41 = vmul.f32 %v8266_v39, %v10375_v61  ;;  %v2564_v29 = vmul.f32 %v8266_v39, %v10373_v19  ;;  %v7273_v24 = vpack.c.bf16 %v7823_v32, %v7822_v37  ;;  %v7828_v19 = vunpack.i.h.bf16 %v10459_v13  ;;  %v8537_v37 = vld [vmem:[#allocation3 + $0x80] sm:$0xff] }
 0x7e3   : > { %8271 = vrcp.f32 %v2526_v22  ;;  %4299 = vrot.lane.b32.xlu1 %v9571_v16, %s8864_s17  ;;  %2815 = vmatmul.mubr.f32.gmra.mrb[46].mxu1 %v2561_v28 }
 0x7e4   : > { %4297 = vrot.lane.b32.xlu0 %v11877_v25, %s8864_s17  ;;  %2819 = vmatprep.mubr.f32.mxu1 %v2565_v41 }
 0x7e5   : > { %v8268_v44 = vpop.eup %8267 }
 0x7e6   : > { %v2529_v34 = vpop.xlane.xlu0 %2528  ;;  %v2568_v61 = vmul.f32 %v8268_v44, %v10383_v20  ;;  %v2567_v16 = vmul.f32 %v8268_v44, %v10381_v62  ;;  %v7827_v20 = vunpack.i.l.bf16 %v10459_v13  ;;  %v8538_v44 = vld [vmem:[#allocation3 + $0x88] sm:$0xff] }
 0x7e7   : > { %8273 = vrcp.f32 %v2529_v34  ;;  %4303 = vrot.lane.b32.xlu1 %v11881_v2, %s8864_s17  ;;  %2820 = vmatmul.mubr.f32.gmra.mrb[48].mxu1 %v2564_v29  ;;  %v7833_v2 = vunpack.i.h.bf16 %v10421_v53  ;;  %v10627_v29 = vpack.i.bf16 %v8538_v44, %v8537_v37 }
 0x7e8   : > { %4301 = vrot.lane.b32.xlu0 %v11879_v40, %s8864_s17  ;;  %7272 = vmatpush3.bf16.xpose.msk.msra.mxu1 %vm9405_vm1, %v7270_v9  ;;  %v7276_v13 = vpack.c.bf16 %v7828_v19, %v7827_v20  ;;  %v8539_v20 = vld [vmem:[#allocation3 + $0x90] sm:$0xff] }
 0x7e9   : > { %2824 = vmatprep.mubr.f32.mxu1 %v2568_v61  ;;  %7275 = vmatprep.subr.msk.bf16.mxu1 %vm9405_vm1, %v7273_v24  ;;  %v8270_v25 = vpop.eup %8269  ;;  %v7279_v45 = vpack.c.bf16 %v7833_v2, %v7832_v43 }
 0x7ea   : > { %v2532_v17 = vpop.xlane.xlu1 %2531  ;;  %v2571_v40 = vmul.f32 %v8270_v25, %v10391_v46  ;;  %v2570_v3 = vmul.f32 %v8270_v25, %v10389_v23  ;;  %v7838_v23 = vunpack.i.h.bf16 %v10423_v51  ;;  %v7837_v46 = vunpack.i.l.bf16 %v10423_v51 }
 0x7eb   : > { %8275 = vrcp.f32 %v2532_v17  ;;  %4307 = vrot.lane.b32.xlu1 %v11885_v47, %s8864_s17  ;;  %2825 = vmatmul.mubr.f32.gmra.mrb[50].mxu1 %v2567_v16  ;;  %v8540_v17 = vld [vmem:[#allocation3 + $0x98] sm:$0xff] }
 0x7ec   : > { %4305 = vrot.lane.b32.xlu0 %v11884_v10, %s8864_s17  ;;  %2829 = vmatprep.mubr.f32.mxu1 %v2571_v40  ;;  %v7282_v6 = vpack.c.bf16 %v7838_v23, %v7837_v46  ;;  %v10635_v2 = vpack.i.bf16 %v8540_v17, %v8539_v20  ;;  %v8559_v20 = vld [vmem:[#allocation3 + $0xd0] sm:$0xff]  ;;  %v8560_v17 = vld [vmem:[#allocation3 + $0xd8] sm:$0xff] }
 0x7ed   : > { %v8272_v62 = vpop.eup %8271 }
 0x7ee   : > { %v2574_v59 = vmul.f32 %v8272_v62, %v10397_v36  ;;  %v2573_v10 = vmul.f32 %v8272_v62, %v10395_v27  ;;  %v7843_v36 = vunpack.i.h.bf16 %v10455_v56 }
 0x7ef   : > { %4311 = vrot.lane.b32.xlu1 %v9609_v54, %s8864_s17  ;;  %2830 = vmatmul.mubr.f32.gmra.mrb[52].mxu1 %v2570_v3  ;;  %v8541_v3 = vld [vmem:[#allocation3] sm:$0xff] }
 0x7f0   : > { %4309 = vrot.lane.b32.xlu0 %v11887_v5, %s8864_s17  ;;  %7278 = vmatpush3.bf16.xpose.msk.msra.mxu1 %vm9405_vm1, %v7276_v13  ;;  %v7842_v5 = vunpack.i.l.bf16 %v10455_v56 }
 0x7f1   : > { %v8274_v47 = vpop.eup %8273  ;;  %2834 = vmatprep.mubr.f32.mxu1 %v2574_v59  ;;  %7281 = vmatprep.subr.msk.bf16.mxu1 %vm9405_vm1, %v7279_v45  ;;  %v8543_v59 = vld [vmem:[#allocation3 + $0x10] sm:$0xff]  ;;  %v8544_v45 = vld [vmem:[#allocation3 + $0x18] sm:$0xff] }
 0x7f2   : > { %v2577_v54 = vmul.f32 %v8274_v47, %v10403_v11  ;;  %v2576_v27 = vmul.f32 %v8274_v47, %v10401_v38  ;;  %v7285_v60 = vpack.c.bf16 %v7843_v36, %v7842_v5  ;;  %v7846_v11 = vpop.permute.xlu0 %7845  ;;  %v10644_v47 = vpack.i.bf16 %v8544_v45, %v8543_v59 }
 0x7f3   : > { %4315 = vrot.lane.b32.xlu1 %v11925_v12, %s8864_s17  ;;  %2835 = vmatmul.mubr.f32.gmra.mrb[54].mxu1 %v2573_v10  ;;  %v7848_v56 = vunpack.i.h.bf16 %v7846_v11 }
 0x7f4   : > { %4313 = vrot.lane.b32.xlu0 %v11888_v18, %s8864_s17  ;;  %2839 = vmatprep.mubr.f32.mxu1 %v2577_v54  ;;  %v11947_v18 = vld [vmem:[#allocation68_spill] sm:$0xff] }
 0x7f5   : > { %v8276_v53 = vpop.eup %8275 }
 0x7f6   : > { %v2580_v51 = vmul.f32 %v8276_v53, %v10409_v4  ;;  %v2579_v38 = vmul.f32 %v8276_v53, %v11947_v18  ;;  %v7847_v4 = vunpack.i.l.bf16 %v7846_v11  ;;  %v8545_v53 = vld [vmem:[#allocation3 + $0x20] sm:$0xff] }
 0x7f7   : > { %4319 = vrot.lane.b32.xlu1 %v11932_v30, %s8864_s17  ;;  %2840 = vmatmul.mubr.f32.gmra.mrb[56].mxu1 %v2576_v27  ;;  %v2861_v30 = vld [vmem:[#allocation12 + $0x28] sm:$0xff] }
 0x7f8   : > { %4317 = vrot.lane.b32.xlu0 %v11930_v42, %s8864_s17  ;;  %7284 = vmatpush3.bf16.xpose.msk.msra.mxu1 %vm9405_vm1, %v7282_v6  ;;  %v7288_v12 = vpack.c.bf16 %v7848_v56, %v7847_v4  ;;  %v2860_v42 = vld [vmem:[#allocation12 + $0x20] sm:$0xff]  ;;  %v8546_v27 = vld [vmem:[#allocation3 + $0x28] sm:$0xff] }
 0x7f9   : > { %2844 = vmatprep.mubr.f32.mxu1 %v2580_v51  ;;  %7287 = vmatprep.subr.msk.bf16.mxu1 %vm9405_vm1, %v7285_v60  ;;  %v7227_v0 = vpack.c.bf16 %v2861_v30, %v2860_v42  ;;  %v10658_v6 = vpack.i.bf16 %v8546_v27, %v8545_v53  ;;  %v8548_v56 = vld [vmem:[#allocation3 + $0xa8] sm:$0xff]  ;;  %v8550_v42 = vld [vmem:[#allocation3 + $0x38] sm:$0xff] }
 0x7fa   : > { %v8566_v53 = vld [vmem:[#allocation3 + $0x68] sm:$0xff] }
 0x7fb   : > { %4323 = vrot.lane.b32.xlu1 %v11938_v48, %s8864_s17  ;;  %2845 = vmatmul.mubr.f32.gmra.mrb[58].mxu1 %v2579_v38  ;;  %v2862_v48 = vld [vmem:[#allocation12 + $0x30] sm:$0xff]  ;;  %v8547_v38 = vld [vmem:[#allocation3 + $0xa0] sm:$0xff] }
 0x7fc   : > { %4321 = vrot.lane.b32.xlu0 %v11936_v15, %s8864_s17  ;;  %7228 = vmatprep.subr.bf16.mxu0 %v7227_v0  ;;  %v3251_v15 = vpop.permute.xlu1 %3250  ;;  %v7231_v58 = vpack.c.bf16 %v2863_v35, %v2862_v48  ;;  %v10666_v4 = vpack.i.bf16 %v8548_v56, %v8547_v38 }
 0x7fd   : > { %7230 = vmatpush3.bf16.msra.mxu0 %v7227_v0 }
 0x7fe   : > { %7232 = vmatprep.subr.bf16.mxu0 %v7231_v58 }
 0x7ff   : > { %4327 = vrot.lane.b32.xlu1 %v11944_v50, %s8864_s17 }
 0x800   : > { %4325 = vrot.lane.b32.xlu0 %v11942_v63, %s8864_s17  ;;  %7290 = vmatpush3.bf16.xpose.msk.msra.mxu1 %vm9405_vm1, %v7288_v12  ;;  %v8549_v12 = vld [vmem:[#allocation3 + $0x30] sm:$0xff] }
 0x801   : > { %7234 = vmatpush3.bf16.msra.mxu0 %v7231_v58  ;;  %v10668_v30 = vpack.i.bf16 %v8550_v42, %v8549_v12  ;;  %v8551_v58 = vld [vmem:[#allocation3 + $0xb0] sm:$0xff] }
 0x804   : > { %7930 = vrot.lane.b32.xlu0 %v10627_v29, %s8863_s16 }
 0x808   : > { %7940 = vrot.lane.b32.xlu0 %v10635_v2, %s8863_s16 }
 0x80c   : > { %7945 = vrot.lane.b32.xlu0 %v10644_v47, %s8863_s16 }
 0x810   : > { %7955 = vrot.lane.b32.xlu0 %v10658_v6, %s8863_s16 }
 0x814   : > { %7965 = vrot.lane.b32.xlu0 %v10668_v30, %s8863_s16 }
 0x81b   : > { %v2535_v33 = vpop.xlane.xlu0 %2534 }
 0x81c   : > { %8277 = vrcp.f32 %v2535_v33 }
 0x81f   : > { %v7851_v7 = vpop.permute.xlu0 %7850 }
 0x820   : > { %v7853_v1 = vunpack.i.h.bf16 %v7851_v7  ;;  %v7852_v50 = vunpack.i.l.bf16 %v7851_v7 }
 0x822   : > { %v7331_v39 = vpack.c.bf16 %v7853_v1, %v7852_v50  ;;  %v8552_v1 = vld [vmem:[#allocation3 + $0xb8] sm:$0xff] }
 0x823   : > { %v2538_v63 = vpop.xlane.xlu1 %2537  ;;  %v7856_v28 = vpop.permute.xlu0 %7855  ;;  %v10683_v50 = vpack.i.bf16 %v8552_v1, %v8551_v58 }
 0x824   : > { %8279 = vrcp.f32 %v2538_v63  ;;  %7333 = vmatprep.subr.msk.bf16.mxu1 %vm9405_vm1, %v7331_v39  ;;  %v7858_v34 = vunpack.i.h.bf16 %v7856_v28  ;;  %v7857_v61 = vunpack.i.l.bf16 %v7856_v28  ;;  %v8553_v39 = vld [vmem:[#allocation3 + $0xc0] sm:$0xff]  ;;  %v8554_v63 = vld [vmem:[#allocation3 + $0xc8] sm:$0xff] }
 0x825   : > { %v10685_v28 = vpack.i.bf16 %v8554_v63, %v8553_v39 }
 0x826   : > { %v8278_v49 = vpop.eup %8277  ;;  %v7334_v43 = vpack.c.bf16 %v7858_v34, %v7857_v61 }
 0x827   : > { %v3253_v31 = vpop.permute.xlu1 %3252  ;;  %v7861_v26 = vpop.permute.xlu0 %7860  ;;  %v2583_v22 = vmul.f32 %v8278_v49, %v10429_v21  ;;  %v2582_v41 = vmul.f32 %v8278_v49, %v10427_v55  ;;  %7970 = vrot.lane.b32.xlu0 %v10685_v28, %s8863_s16 }
 0x828   : > { %v7863_v25 = vunpack.i.h.bf16 %v7861_v26  ;;  %v7862_v19 = vunpack.i.l.bf16 %v7861_v26 }
 0x829   : > { %2849 = vmatprep.mubr.f32.mxu1 %v2583_v22 }
 0x82a   : > { %2850 = vmatmul.mubr.f32.gmra.mrb[60].mxu1 %v2582_v41  ;;  %v8555_v41 = vld [vmem:[#allocation3 + $0x40] sm:$0xff] }
 0x82b   : > { %v3255_v52 = vpop.permute.xlu1 %3254  ;;  %v7866_v32 = vpop.permute.xlu0 %7865 }
 0x82c   : > { %v7868_v10 = vunpack.i.h.bf16 %v7866_v32  ;;  %v7867_v23 = vunpack.i.l.bf16 %v7866_v32 }
 0x82e   : > { %v8280_v9 = vpop.eup %8279  ;;  %v7340_v51 = vpack.c.bf16 %v7868_v10, %v7867_v23 }
 0x82f   : > { %v10631_v24 = vpop.permute.xlu1 %3256  ;;  %v7871_v16 = vpop.permute.xlu0 %7870  ;;  %v2586_v21 = vmul.f32 %v8280_v9, %v10435_v57  ;;  %v2585_v55 = vmul.f32 %v8280_v9, %v10433_v14  ;;  %v7337_v57 = vpack.c.bf16 %v7863_v25, %v7862_v19  ;;  %v8542_v14 = vld [vmem:[#allocation3 + $0x8] sm:$0xff] }
 0x830   : > { %v10642_v13 = vpack.i.bf16 %v8542_v14, %v8541_v3  ;;  %v7873_v36 = vunpack.i.h.bf16 %v7871_v16  ;;  %v7872_v5 = vunpack.i.l.bf16 %v7871_v16  ;;  %v8558_v16 = vld [vmem:[#allocation3 + $0x58] sm:$0xff] }
 0x831   : > { %2854 = vmatprep.mubr.f32.mxu1 %v2586_v21 }
 0x832   : > { %2855 = vmatmul.mubr.f32.gmra.mrb[62].mxu1 %v2585_v55  ;;  %7935 = vrot.lane.b32.xlu1 %v10642_v13, %s8863_s16  ;;  %v7343_v18 = vpack.c.bf16 %v7873_v36, %v7872_v5  ;;  %v8565_v5 = vld [vmem:[#allocation3 + $0x60] sm:$0xff] }
 0x833   : > { %v10639_v40 = vpop.permute.xlu1 %3258  ;;  %6331 = vmatprep.mubr.msk.f32.mxu1 %vm1299_vm0, %v3251_v15  ;;  %v7876_v62 = vpop.permute.xlu0 %7875  ;;  %v7994_v27 = vpack.i.bf16 %v8566_v53, %v8565_v5 }
 0x834   : > { %v7878_v33 = vunpack.i.h.bf16 %v7876_v62  ;;  %v7877_v0 = vunpack.i.l.bf16 %v7876_v62  ;;  %v8562_v62 = vld [vmem:[#allocation3 + $0xe8] sm:$0xff] }
 0x836   : > { %6332 = vmatmul.mubr.msk.f32.vlgmr.msra.gmra.mrb[64].mxu1 %vm1299_vm0, %v3251_v15  ;;  %7950 = vrot.lane.b32.xlu1 %v10666_v4, %s8863_s16  ;;  %v7346_v49 = vpack.c.bf16 %v7878_v33, %v7877_v0 }
 0x837   : > { %v10649_v46 = vpop.permute.xlu1 %3260  ;;  %v7881_v54 = vpop.permute.xlu0 %7880  ;;  %6333 = vmatprep.mubr.msk.f32.mxu1 %vm1299_vm0, %v3253_v31  ;;  %7336 = vmatpush3.bf16.xpose.msk.msra.mxu1 %vm9405_vm1, %v7334_v43  ;;  %v10715_v43 = vpack.i.bf16 %v8560_v17, %v8559_v20 }
 0x838   : > { %7339 = vmatprep.subr.msk.bf16.mxu1 %vm9405_vm1, %v7337_v57  ;;  %v7883_v15 = vunpack.i.h.bf16 %v7881_v54  ;;  %v7882_v7 = vunpack.i.l.bf16 %v7881_v54  ;;  %v8564_v54 = vld [vmem:[#allocation3 + $0xf8] sm:$0xff] }
 0x83a   : > { %6334 = vmatmul.mubr.msk.f32.gmra.mrb[66].mxu1 %vm1299_vm0, %v3253_v31  ;;  %7960 = vrot.lane.b32.xlu1 %v10683_v50, %s8863_s16  ;;  %v7349_v26 = vpack.c.bf16 %v7883_v15, %v7882_v7 }
 0x83b   : > { %v10661_v60 = vpop.permute.xlu1 %3262  ;;  %v7886_v11 = vpop.permute.xlu0 %7885  ;;  %6335 = vmatprep.mubr.msk.f32.mxu1 %vm1299_vm0, %v3255_v52 }
 0x83c   : > { %v7888_v37 = vunpack.i.h.bf16 %v7886_v11  ;;  %v7887_v44 = vunpack.i.l.bf16 %v7886_v11 }
 0x83e   : > { %6336 = vmatmul.mubr.msk.f32.gmra.mrb[68].mxu1 %vm1299_vm0, %v3255_v52  ;;  %v8556_v52 = vld [vmem:[#allocation3 + $0x48] sm:$0xff]  ;;  %v7352_v25 = vpack.c.bf16 %v7888_v37, %v7887_v44  ;;  %7980 = vrot.lane.b32.xlu1 %v10715_v43, %s8863_s16 }
 0x83f   : > { %v10673_v48 = vpop.permute.xlu1 %3264  ;;  %v7891_v35 = vpop.permute.xlu0 %7890  ;;  %6337 = vmatprep.mubr.msk.f32.mxu1 %vm1299_vm0, %v10631_v24  ;;  %7342 = vmatpush3.bf16.xpose.msk.msra.mxu1 %vm9405_vm1, %v7340_v51  ;;  %v10695_v32 = vpack.i.bf16 %v8556_v52, %v8555_v41  ;;  %v8567_v51 = vld [vmem:[#allocation3 + $0x70] sm:$0xff]  ;;  %v1991_v37 = vld [vmem:[#allocation12 + $0x8] sm:$0xff] }
 0x840   : > { %7345 = vmatprep.subr.msk.bf16.mxu1 %vm9405_vm1, %v7343_v18  ;;  %v7893_v34 = vunpack.i.h.bf16 %v7891_v35  ;;  %v7892_v61 = vunpack.i.l.bf16 %v7891_v35 }
 0x841   : > { %7975 = vrot.lane.b32.xlu0 %v10695_v32, %s8863_s16 }
 0x842   : > { %6338 = vmatmul.mubr.msk.f32.gmra.mrb[70].mxu1 %vm1299_vm0, %v10631_v24  ;;  %v8557_v24 = vld [vmem:[#allocation3 + $0x50] sm:$0xff]  ;;  %v7355_v19 = vpack.c.bf16 %v7893_v34, %v7892_v61 }
 0x843   : > { %v7896_v31 = vpop.permute.xlu0 %7895  ;;  %6339 = vmatprep.mubr.msk.f32.mxu1 %vm1299_vm0, %v10639_v40  ;;  %v3267_v22 = vpop.permute.xlu1 %3266  ;;  %v10707_v21 = vpack.i.bf16 %v8558_v16, %v8557_v24 }
 0x844   : > { %v7898_v14 = vunpack.i.h.bf16 %v7896_v31  ;;  %v7897_v59 = vunpack.i.l.bf16 %v7896_v31 }
 0x845   : > { %7985 = vrot.lane.b32.xlu0 %v10707_v21, %s8863_s16 }
 0x846   : > { %6340 = vmatmul.mubr.msk.f32.gmra.mrb[72].mxu1 %vm1299_vm0, %v10639_v40  ;;  %v8561_v40 = vld [vmem:[#allocation3 + $0xe0] sm:$0xff]  ;;  %v7358_v18 = vpack.c.bf16 %v7898_v14, %v7897_v59 }
 0x847   : > { %v7901_v9 = vpop.permute.xlu0 %7900  ;;  %6341 = vmatprep.mubr.msk.f32.mxu1 %vm1299_vm0, %v10649_v46  ;;  %7348 = vmatpush3.bf16.xpose.msk.msra.mxu1 %vm9405_vm1, %v7346_v49  ;;  %v3269_v55 = vpop.permute.xlu1 %3268  ;;  %v10717_v57 = vpack.i.bf16 %v8562_v62, %v8561_v40  ;;  %v1993_v40 = vld [vmem:[#allocation12 + $0x18] sm:$0xff] }
 0x848   : > { %7351 = vmatprep.subr.msk.bf16.mxu1 %vm9405_vm1, %v7349_v26  ;;  %v7903_v45 = vunpack.i.h.bf16 %v7901_v9  ;;  %v7902_v10 = vunpack.i.l.bf16 %v7901_v9 }
 0x849   : > { %7990 = vrot.lane.b32.xlu0 %v10717_v57, %s8863_s16 }
 0x84a   : > { %6342 = vmatmul.mubr.msk.f32.gmra.mrb[74].mxu1 %vm1299_vm0, %v10649_v46  ;;  %v8563_v46 = vld [vmem:[#allocation3 + $0xf0] sm:$0xff]  ;;  %v7361_v56 = vpack.c.bf16 %v7903_v45, %v7902_v10 }
 0x84b   : > { %6343 = vmatprep.mubr.msk.f32.mxu1 %vm1299_vm0, %v10661_v60  ;;  %v7906_v3 = vpop.permute.xlu0 %7905  ;;  %v3271_v23 = vpop.permute.xlu1 %3270  ;;  %v7999_v36 = vpack.i.bf16 %v8564_v54, %v8563_v46 }
 0x84c   : > { %v7908_v42 = vunpack.i.h.bf16 %v7906_v3  ;;  %v7907_v33 = vunpack.i.l.bf16 %v7906_v3 }
 0x84d   : > { %8000 = vrot.lane.b32.xlu1 %v7999_v36, %s8863_s16  ;;  %7995 = vrot.lane.b32.xlu0 %v7994_v27, %s8863_s16 }
 0x84e   : > { %6344 = vmatmul.mubr.msk.f32.gmra.mrb[76].mxu1 %vm1299_vm0, %v10661_v60  ;;  %v8568_v60 = vld [vmem:[#allocation3 + $0x78] sm:$0xff]  ;;  %v7364_v15 = vpack.c.bf16 %v7908_v42, %v7907_v33 }
 0x84f   : > { %6345 = vmatprep.mubr.msk.f32.mxu1 %vm1299_vm0, %v10673_v48  ;;  %7354 = vmatpush3.bf16.xpose.msk.msra.mxu1 %vm9405_vm1, %v7352_v25  ;;  %v8004_v11 = vpack.i.bf16 %v8568_v60, %v8567_v51  ;;  %v7911_v38 = vpop.permute.xlu0 %7910  ;;  %v3273_v12 = vpop.permute.xlu1 %3272 }
 0x850   : > { %7357 = vmatprep.subr.msk.bf16.mxu1 %vm9405_vm1, %v7355_v19  ;;  %v7913_v0 = vunpack.i.h.bf16 %v7911_v38 }
 0x851   : > { %8005 = vrot.lane.b32.xlu1 %v8004_v11, %s8863_s16  ;;  %8015 = vrot.lane.b32.xlu0 %v10642_v13, %s8864_s17  ;;  %s8721_s16 = scalar_lea.vmem %s11605_s22, 2048 }
 0x852   : > { %6346 = vmatmul.mubr.msk.f32.gmra.mrb[78].mxu1 %vm1299_vm0, %v10673_v48  ;;  %v7912_v48 = vunpack.i.l.bf16 %v7911_v38  ;;  %p8722_p9 = scmp.ne.s32.totalorder %s11605_s22, %s8721_s16 }
 0x853   : > { %6347 = vmatprep.mubr.msk.f32.mxu1 %vm1299_vm0, %v3267_v22  ;;  %v7916_v35 = vpop.permute.xlu0 %7915  ;;  %v3275_v58 = vpop.permute.xlu1 %3274 }
 0x854   : > { %v7367_v7 = vpack.c.bf16 %v7913_v0, %v7912_v48  ;;  %v7918_v13 = vunpack.i.h.bf16 %v7916_v35  ;;  %v7917_v1 = vunpack.i.l.bf16 %v7916_v35  ;;  %p8723_p11 = pnand %p8722_p9, %p12052_p1 }
 0x855   : > { %8010 = vrot.lane.b32.xlu1 %v10627_v29, %s8864_s17  ;;  %8020 = vrot.lane.b32.xlu0 %v10635_v2, %s8864_s17 }
 0x856   : > { %6348 = vmatmul.mubr.msk.f32.gmra.mrb[80].mxu1 %vm1299_vm0, %v3267_v22  ;;  %p8724_p3 = pneg %p8723_p11 }
 0x857   : > { %6349 = vmatprep.mubr.msk.f32.mxu1 %vm1299_vm0, %v3269_v55  ;;  %7360 = vmatpush3.bf16.xpose.msk.msra.mxu1 %vm9405_vm1, %v7358_v18  ;;  %v7921_v39 = vpop.permute.xlu0 %7920  ;;  %v3277_v2 = vpop.permute.xlu1 %3276 }
 0x858   : > { %7363 = vmatprep.subr.msk.bf16.mxu1 %vm9405_vm1, %v7361_v56  ;;  %v7923_v29 = vunpack.i.h.bf16 %v7921_v39  ;;  %v7922_v63 = vunpack.i.l.bf16 %v7921_v39 }
 0x859   : > { %8030 = vrot.lane.b32.xlu1 %v10666_v4, %s8864_s17  ;;  %8025 = vrot.lane.b32.xlu0 %v10644_v47, %s8864_s17  ;;  %v7370_v4 = vpack.c.bf16 %v7918_v13, %v7917_v1 }
 0x85a   : > { %6350 = vmatmul.mubr.msk.f32.gmra.mrb[82].mxu1 %vm1299_vm0, %v3269_v55  ;;  %v7373_v49 = vpack.c.bf16 %v7923_v29, %v7922_v63 }
 0x85b   : > { %6351 = vmatprep.mubr.msk.f32.mxu1 %vm1299_vm0, %v3271_v23  ;;  %v7926_v31 = vpop.permute.xlu0 %7925 }
 0x85c   : > { %v7928_v47 = vunpack.i.h.bf16 %v7926_v31  ;;  %v7927_v26 = vunpack.i.l.bf16 %v7926_v31 }
 0x85d   : > { %8035 = vrot.lane.b32.xlu1 %v10658_v6, %s8864_s17  ;;  %8040 = vrot.lane.b32.xlu0 %v10683_v50, %s8864_s17  ;;  %v3279_v6 = vpop.permute.xlu1 %3278 }
 0x85e   : > { %6352 = vmatmul.mubr.msk.f32.gmra.mrb[84].mxu1 %vm1299_vm0, %v3271_v23  ;;  %v7376_v50 = vpack.c.bf16 %v7928_v47, %v7927_v26 }
 0x85f   : > { %6353 = vmatprep.mubr.msk.f32.mxu1 %vm1299_vm0, %v3273_v12  ;;  %7366 = vmatpush3.bf16.xpose.msk.msra.mxu1 %vm9405_vm1, %v7364_v15 }
 0x860   : > { %7369 = vmatprep.subr.msk.bf16.mxu1 %vm9405_vm1, %v7367_v7 }
 0x861   : > { %8050 = vrot.lane.b32.xlu1 %v10685_v28, %s8864_s17  ;;  %8045 = vrot.lane.b32.xlu0 %v10668_v30, %s8864_s17  ;;  %v3281_v28 = vpop.permute.xlu1 %3280  ;;  %v4298_v30 = vpop.permute.xlu0 %4297 }
 0x862   : > { %6354 = vmatmul.mubr.msk.f32.gmra.mrb[86].mxu1 %vm1299_vm0, %v3273_v12 }
 0x863   : > { %6355 = vmatprep.mubr.msk.f32.mxu1 %vm1299_vm0, %v3275_v58 }
 0x865   : > { %8055 = vrot.lane.b32.xlu1 %v10695_v32, %s8864_s17  ;;  %8060 = vrot.lane.b32.xlu0 %v10715_v43, %s8864_s17  ;;  %v4300_v22 = vpop.permute.xlu1 %4299  ;;  %v4302_v41 = vpop.permute.xlu0 %4301  ;;  %v1990_v32 = vld [vmem:[#allocation12] sm:$0xff]  ;;  %v1992_v43 = vld [vmem:[#allocation12 + $0x10] sm:$0xff] }
 0x866   : > { %6356 = vmatmul.mubr.msk.f32.gmra.mrb[88].mxu1 %vm1299_vm0, %v3275_v58  ;;  %v7235_v44 = vpack.c.bf16 %v1991_v37, %v1990_v32  ;;  %v7239_v59 = vpack.c.bf16 %v1993_v40, %v1992_v43 }
 0x867   : > { %6357 = vmatprep.mubr.msk.f32.mxu1 %vm1299_vm0, %v3277_v2  ;;  %7372 = vmatpush3.bf16.xpose.msk.msra.mxu1 %vm9405_vm1, %v7370_v4 }
 0x868   : > { %7375 = vmatprep.subr.msk.bf16.mxu1 %vm9405_vm1, %v7373_v49  ;;  %7236 = vmatprep.subr.bf16.mxu0 %v7235_v44 }
 0x869   : > { %8070 = vrot.lane.b32.xlu1 %v10717_v57, %s8864_s17  ;;  %8065 = vrot.lane.b32.xlu0 %v10707_v21, %s8864_s17  ;;  %v4304_v8 = vpop.permute.xlu1 %4303  ;;  %v4306_v52 = vpop.permute.xlu0 %4305 }
 0x86a   : > { %6358 = vmatmul.mubr.msk.f32.gmra.mrb[90].mxu1 %vm1299_vm0, %v3277_v2 }
 0x86b   : > { %6359 = vmatprep.mubr.msk.f32.mxu1 %vm1299_vm0, %v3279_v6 }
 0x86d   : > { %v4308_v9 = vpop.permute.xlu1 %4307  ;;  %v4310_v34 = vpop.permute.xlu0 %4309 }
 0x86e   : > { %6360 = vmatmul.mubr.msk.f32.gmra.mrb[92].mxu1 %vm1299_vm0, %v3279_v6 }
 0x86f   : > { %6361 = vmatprep.mubr.msk.f32.mxu1 %vm1299_vm0, %v3281_v28  ;;  %7378 = vmatpush3.bf16.xpose.msk.msra.mxu1 %vm9405_vm1, %v7376_v50 }
 0x871   : > { %v4314_v61 = vpop.permute.xlu0 %4313  ;;  %v4312_v24 = vpop.permute.xlu1 %4311 }
 0x872   : > { %6362 = vmatmul.mubr.msk.f32.gmra.mrb[94].mxu1 %vm1299_vm0, %v3281_v28 }
 0x873   : > { %6495 = vmatprep.mubr.msk.f32.mxu1 %vm1299_vm0, %v4298_v30 }
 0x875   : > { %v4318_v16 = vpop.permute.xlu0 %4317  ;;  %v4316_v21 = vpop.permute.xlu1 %4315 }
 0x876   : > { %6496 = vmatmul.mubr.msk.f32.vlgmr.msra.gmra.mrb[96].mxu1 %vm1299_vm0, %v4298_v30 }
 0x877   : > { %6497 = vmatprep.mubr.msk.f32.mxu1 %vm1299_vm0, %v4300_v22 }
 0x879   : > { %v4322_v55 = vpop.permute.xlu0 %4321  ;;  %v4320_v17 = vpop.permute.xlu1 %4319 }
 0x87a   : > { %6498 = vmatmul.mubr.msk.f32.gmra.mrb[98].mxu1 %vm1299_vm0, %v4300_v22 }
 0x87b   : > { %6499 = vmatprep.mubr.msk.f32.mxu1 %vm1299_vm0, %v4302_v41 }
 0x87d   : > { %v4326_v62 = vpop.permute.xlu0 %4325  ;;  %v4324_v5 = vpop.permute.xlu1 %4323 }
 0x87e   : > { %6500 = vmatmul.mubr.msk.f32.gmra.mrb[100].mxu1 %vm1299_vm0, %v4302_v41 }
 0x87f   : > { %6501 = vmatprep.mubr.msk.f32.mxu1 %vm1299_vm0, %v4304_v8 }
 0x881   : > { %v7931_v10 = vpop.permute.xlu0 %7930  ;;  %v4328_v42 = vpop.permute.xlu1 %4327 }
 0x882   : > { %6502 = vmatmul.mubr.msk.f32.gmra.mrb[102].mxu1 %vm1299_vm0, %v4304_v8  ;;  %v7933_v46 = vunpack.i.h.bf16 %v7931_v10  ;;  %v7932_v54 = vunpack.i.l.bf16 %v7931_v10 }
 0x883   : > { %6503 = vmatprep.mubr.msk.f32.mxu1 %vm1299_vm0, %v4306_v52 }
 0x884   : > { %v7291_v53 = vpack.c.bf16 %v7933_v46, %v7932_v54 }
 0x885   : > { %v10821_v51 = vpop.permute.xlu0 %7940 }
 0x886   : > { %6504 = vmatmul.mubr.msk.f32.gmra.mrb[104].mxu1 %vm1299_vm0, %v4306_v52 }
 0x887   : > { %6505 = vmatprep.mubr.msk.f32.mxu1 %vm1299_vm0, %v4308_v9 }
 0x889   : > { %v10826_v38 = vpop.permute.xlu0 %7945 }
 0x88a   : > { %6506 = vmatmul.mubr.msk.f32.gmra.mrb[106].mxu1 %vm1299_vm0, %v4308_v9 }
 0x88b   : > { %6507 = vmatprep.mubr.msk.f32.mxu1 %vm1299_vm0, %v4310_v34 }
 0x88d   : > { %v10831_v0 = vpop.permute.xlu0 %7955 }
 0x88e   : > { %6508 = vmatmul.mubr.msk.f32.gmra.mrb[108].mxu1 %vm1299_vm0, %v4310_v34 }
 0x88f   : > { %6509 = vmatprep.mubr.msk.f32.mxu1 %vm1299_vm0, %v4312_v24 }
 0x891   : > { %v10838_v58 = vpop.permute.xlu0 %7965 }
 0x892   : > { %6510 = vmatmul.mubr.msk.f32.gmra.mrb[110].mxu1 %vm1299_vm0, %v4312_v24 }
 0x893   : > { %6511 = vmatprep.mubr.msk.f32.mxu1 %vm1299_vm0, %v4314_v61 }
 0x896   : > { %6512 = vmatmul.mubr.msk.f32.gmra.mrb[112].mxu1 %vm1299_vm0, %v4314_v61 }
 0x897   : > { %6513 = vmatprep.mubr.msk.f32.mxu1 %vm1299_vm0, %v4316_v21 }
 0x899   : > { %v10843_v63 = vpop.permute.xlu0 %7970 }
 0x89a   : > { %6514 = vmatmul.mubr.msk.f32.gmra.mrb[114].mxu1 %vm1299_vm0, %v4316_v21  ;;  %v6211_v25 = vpop.f32.mrb[32].mxu1 }
 0x89b   : > { %6515 = vmatprep.mubr.msk.f32.mxu1 %vm1299_vm0, %v4318_v16  ;;  %v6212_v19 = vpop.f32.mrb[33].mxu1 }
 0x89c   : > { %v6213_v20 = vadd.f32 %v6212_v19, %v6211_v25 }
 0x89e   : > { %6516 = vmatmul.mubr.msk.f32.gmra.mrb[116].mxu1 %vm1299_vm0, %v4318_v16  ;;  %v6214_v57 = vpop.f32.mrb[34].mxu1  ;;  %6851 = vmatprep.mubr.msk.f32.mxu0 %vm1299_vm0, %v6213_v20 }
 0x89f   : > { %6517 = vmatprep.mubr.msk.f32.mxu1 %vm1299_vm0, %v4320_v17  ;;  %v6215_v3 = vpop.f32.mrb[35].mxu1 }
 0x8a0   : > { %v6216_v14 = vadd.f32 %v6215_v3, %v6214_v57 }
 0x8a2   : > { %6518 = vmatmul.mubr.msk.f32.gmra.mrb[118].mxu1 %vm1299_vm0, %v4320_v17  ;;  %v6217_v45 = vpop.f32.mrb[36].mxu1  ;;  %6852 = vmatmul.mubr.msk.f32.vlgmr.msra.gmra.mrb[80].mxu0 %vm1299_vm0, %v6216_v14 }
 0x8a3   : > { %6519 = vmatprep.mubr.msk.f32.mxu1 %vm1299_vm0, %v4322_v55  ;;  %v6218_v23 = vpop.f32.mrb[37].mxu1  ;;  %7238 = vmatpush3.bf16.msra.mxu0 %v7235_v44 }
 0x8a4   : > { %v6219_v36 = vadd.f32 %v6218_v23, %v6217_v45  ;;  %7240 = vmatprep.subr.bf16.mxu0 %v7239_v59  ;;  %v10834_v15 = vpop.permute.xlu1 %7935 }
 0x8a6   : > { %6520 = vmatmul.mubr.msk.f32.gmra.mrb[120].mxu1 %vm1299_vm0, %v4322_v55  ;;  %v6220_v27 = vpop.f32.mrb[38].mxu1  ;;  %6854 = vmatprep.mubr.msk.f32.mxu0 %vm1299_vm0, %v6219_v36 }
 0x8a7   : > { %6521 = vmatprep.mubr.msk.f32.mxu1 %vm1299_vm0, %v4324_v5  ;;  %v6221_v60 = vpop.f32.mrb[39].mxu1  ;;  %7242 = vmatpush3.bf16.msra.mxu0 %v7239_v59 }
 0x8a8   : > { %v6222_v11 = vadd.f32 %v6221_v60, %v6220_v27  ;;  %7292 = vmatprep.subr.bf16.mxu0 %v7291_v53  ;;  %v10840_v39 = vpop.permute.xlu1 %7950 }
 0x8aa   : > { %6522 = vmatmul.mubr.msk.f32.gmra.mrb[122].mxu1 %vm1299_vm0, %v4324_v5  ;;  %v6223_v18 = vpop.f32.mrb[40].mxu1  ;;  %6855 = vmatmul.mubr.msk.f32.gmra.mrb[82].mxu0 %vm1299_vm0, %v6222_v11 }
 0x8ab   : > { %6523 = vmatprep.mubr.msk.f32.mxu1 %vm1299_vm0, %v4326_v62  ;;  %v6224_v56 = vpop.f32.mrb[41].mxu1 }
 0x8ac   : > { %v6225_v12 = vadd.f32 %v6224_v56, %v6223_v18  ;;  %v10848_v6 = vpop.permute.xlu1 %7960 }
 0x8ae   : > { %6524 = vmatmul.mubr.msk.f32.gmra.mrb[124].mxu1 %vm1299_vm0, %v4326_v62  ;;  %v6226_v33 = vpop.f32.mrb[42].mxu1  ;;  %6857 = vmatprep.mubr.msk.f32.mxu0 %vm1299_vm0, %v6225_v12 }
 0x8af   : > { %6525 = vmatprep.mubr.msk.f32.mxu1 %vm1299_vm0, %v4328_v42  ;;  %v6227_v48 = vpop.f32.mrb[43].mxu1 }
 0x8b0   : > { %v6228_v35 = vadd.f32 %v6227_v48, %v6226_v33  ;;  %v10853_v41 = vpop.permute.xlu1 %7980 }
 0x8b2   : > { %6526 = vmatmul.mubr.msk.f32.gmra.mrb[126].mxu1 %vm1299_vm0, %v4328_v42  ;;  %v6229_v7 = vpop.f32.mrb[44].mxu1  ;;  %6858 = vmatmul.mubr.msk.f32.gmra.mrb[84].mxu0 %vm1299_vm0, %v6228_v35 }
 0x8b3   : > { %v6230_v13 = vpop.f32.mrb[45].mxu1  ;;  %v10846_v31 = vpop.permute.xlu0 %7975 }
 0x8b4   : > { %v6231_v1 = vadd.f32 %v6230_v13, %v6229_v7 }
 0x8b6   : > { %v6232_v29 = vpop.f32.mrb[46].mxu1  ;;  %6860 = vmatprep.mubr.msk.f32.mxu0 %vm1299_vm0, %v6231_v1 }
 0x8b7   : > { %v6233_v2 = vpop.f32.mrb[47].mxu1  ;;  %v10851_v28 = vpop.permute.xlu0 %7985 }
 0x8b8   : > { %v6234_v4 = vadd.f32 %v6233_v2, %v6232_v29 }
 0x8ba   : > { %v6235_v49 = vpop.f32.mrb[48].mxu1  ;;  %6861 = vmatmul.mubr.msk.f32.gmra.mrb[86].mxu0 %vm1299_vm0, %v6234_v4 }
 0x8bb   : > { %v6236_v47 = vpop.f32.mrb[49].mxu1  ;;  %v10856_v52 = vpop.permute.xlu0 %7990 }
 0x8bc   : > { %v6237_v26 = vadd.f32 %v6236_v47, %v6235_v49 }
 0x8be   : > { %v6238_v50 = vpop.f32.mrb[50].mxu1  ;;  %6863 = vmatprep.mubr.msk.f32.mxu0 %vm1299_vm0, %v6237_v26 }
 0x8bf   : > { %v6239_v30 = vpop.f32.mrb[51].mxu1  ;;  %v10858_v44 = vpop.permute.xlu1 %8000 }
 0x8c0   : > { %v6240_v22 = vadd.f32 %v6239_v30, %v6238_v50  ;;  %v10861_v34 = vpop.permute.xlu0 %7995 }
 0x8c2   : > { %v6241_v8 = vpop.f32.mrb[52].mxu1  ;;  %6864 = vmatmul.mubr.msk.f32.gmra.mrb[88].mxu0 %vm1299_vm0, %v6240_v22 }
 0x8c3   : > { %v6242_v32 = vpop.f32.mrb[53].mxu1  ;;  %v10863_v16 = vpop.permute.xlu1 %8005 }
 0x8c4   : > { %v6243_v37 = vadd.f32 %v6242_v32, %v6241_v8  ;;  %v8016_v55 = vpop.permute.xlu0 %8015 }
 0x8c5   : > { %v8018_v19 = vunpack.i.h.bf16 %v8016_v55  ;;  %v8017_v20 = vunpack.i.l.bf16 %v8016_v55 }
 0x8c6   : > { %v6244_v9 = vpop.f32.mrb[54].mxu1  ;;  %6866 = vmatprep.mubr.msk.f32.mxu0 %vm1299_vm0, %v6243_v37 }
 0x8c7   : > { %v6245_v61 = vpop.f32.mrb[55].mxu1  ;;  %v8011_v43 = vpop.permute.xlu1 %8010  ;;  %v7381_v3 = vpack.c.bf16 %v8018_v19, %v8017_v20 }
 0x8c8   : > { %v6246_v24 = vadd.f32 %v6245_v61, %v6244_v9  ;;  %v8013_v40 = vunpack.i.h.bf16 %v8011_v43  ;;  %v8012_v62 = vunpack.i.l.bf16 %v8011_v43  ;;  %v8021_v14 = vpop.permute.xlu0 %8020 }
 0x8c9   : > { %v8023_v10 = vunpack.i.h.bf16 %v8021_v14  ;;  %v8022_v23 = vunpack.i.l.bf16 %v8021_v14 }
 0x8ca   : > { %v6247_v21 = vpop.f32.mrb[56].mxu1  ;;  %6867 = vmatmul.mubr.msk.f32.gmra.mrb[90].mxu0 %vm1299_vm0, %v6246_v24  ;;  %v7379_v45 = vpack.c.bf16 %v8013_v40, %v8012_v62 }
 0x8cb   : > { %v6248_v25 = vpop.f32.mrb[57].mxu1  ;;  %v7383_v54 = vpack.c.bf16 %v8023_v10, %v8022_v23  ;;  %v8031_v36 = vpop.permute.xlu1 %8030  ;;  %v7938_v10 = vunpack.i.h.bf16 %v10834_v15  ;;  %v7937_v23 = vunpack.i.l.bf16 %v10834_v15 }
 0x8cc   : > { %v6249_v17 = vadd.f32 %v6248_v25, %v6247_v21  ;;  %7380 = vmatprep.subr.bf16.mxu1 %v7379_v45  ;;  %v8033_v5 = vunpack.i.h.bf16 %v8031_v36  ;;  %v8032_v53 = vunpack.i.l.bf16 %v8031_v36  ;;  %v8026_v27 = vpop.permute.xlu0 %8025  ;;  %v7942_v36 = vunpack.i.l.bf16 %v10821_v51 }
 0x8cd   : > { %7382 = vmatpush3.bf16.msra.mxu1 %v7381_v3  ;;  %v8028_v60 = vunpack.i.h.bf16 %v8026_v27  ;;  %v8027_v11 = vunpack.i.l.bf16 %v8026_v27 }
 0x8ce   : > { %v6250_v57 = vpop.f32.mrb[58].mxu1  ;;  %6869 = vmatprep.mubr.msk.f32.mxu0 %vm1299_vm0, %v6249_v17  ;;  %7384 = vmatprep.subr.bf16.mxu1 %v7383_v54  ;;  %v7387_v18 = vpack.c.bf16 %v8033_v5, %v8032_v53  ;;  %v7943_v54 = vunpack.i.h.bf16 %v10821_v51  ;;  %v11948_v53 = vld [vmem:[#allocation46_spill] sm:$0xff]  ;;  %v7953_v51 = vunpack.i.h.bf16 %v10840_v39 }
 0x8cf   : > { %v6251_v59 = vpop.f32.mrb[59].mxu1  ;;  %v7385_v56 = vpack.c.bf16 %v8028_v60, %v8027_v11  ;;  %v8036_v12 = vpop.permute.xlu1 %8035  ;;  %v7293_v60 = vpack.c.bf16 %v7938_v10, %v7937_v23  ;;  %v7948_v11 = vunpack.i.h.bf16 %v10826_v38  ;;  %v11957_v10 = vld [vmem:[#allocation38_spill] sm:$0xff] }
 0x8d0   : > { %v6252_v46 = vadd.f32 %v6251_v59, %v6250_v57  ;;  %v8038_v42 = vunpack.i.h.bf16 %v8036_v12  ;;  %v8037_v33 = vunpack.i.l.bf16 %v8036_v12  ;;  %v8041_v48 = vpop.permute.xlu0 %8040  ;;  %v7952_v12 = vunpack.i.l.bf16 %v10840_v39 }
 0x8d1   : > { %v8043_v35 = vunpack.i.h.bf16 %v8041_v48  ;;  %v8042_v7 = vunpack.i.l.bf16 %v8041_v48  ;;  %7386 = vmatpush3.bf16.msra.mxu1 %v7385_v56  ;;  %v7295_v56 = vpack.c.bf16 %v7943_v54, %v7942_v36  ;;  %v11950_v48 = vld [vmem:[#allocation49_spill] sm:$0xff]  ;;  %v7998_v36 = vunpack.i.h.bf16 %v10861_v34 }
 0x8d2   : > { %6870 = vmatmul.mubr.msk.f32.gmra.mrb[92].mxu0 %vm1299_vm0, %v6252_v46  ;;  %v7389_v13 = vpack.c.bf16 %v8038_v42, %v8037_v33  ;;  %7388 = vmatprep.subr.bf16.mxu1 %v7387_v18  ;;  %v7947_v18 = vunpack.i.l.bf16 %v10826_v38  ;;  %v11949_v42 = vld [vmem:[#allocation33_spill] sm:$0xff] }
 0x8d3   : > { %v7391_v1 = vpack.c.bf16 %v8043_v35, %v8042_v7  ;;  %v8051_v29 = vpop.permute.xlu1 %8050  ;;  %v7958_v7 = vunpack.i.h.bf16 %v10831_v0 }
 0x8d4   : > { %v8053_v2 = vunpack.i.h.bf16 %v8051_v29  ;;  %v8052_v4 = vunpack.i.l.bf16 %v8051_v29  ;;  %v8046_v49 = vpop.permute.xlu0 %8045  ;;  %v7297_v38 = vpack.c.bf16 %v7948_v11, %v7947_v18  ;;  %v7963_v29 = vunpack.i.h.bf16 %v10848_v6 }
 0x8d5   : > { %v8048_v47 = vunpack.i.h.bf16 %v8046_v49  ;;  %v8047_v26 = vunpack.i.l.bf16 %v8046_v49  ;;  %7390 = vmatpush3.bf16.msra.mxu1 %v7389_v13  ;;  %v7957_v13 = vunpack.i.l.bf16 %v10831_v0  ;;  %v8003_v11 = vunpack.i.h.bf16 %v10858_v44 }
 0x8d6   : > { %v7395_v50 = vpack.c.bf16 %v8053_v2, %v8052_v4  ;;  %7392 = vmatprep.subr.bf16.mxu1 %v7391_v1  ;;  %v7299_v1 = vpack.c.bf16 %v7953_v51, %v7952_v12  ;;  %v7962_v2 = vunpack.i.l.bf16 %v10848_v6  ;;  %v11951_v4 = vld [vmem:[#allocation34_spill] sm:$0xff]  ;;  %v8002_v18 = vunpack.i.l.bf16 %v10858_v44  ;;  %v11960_v51 = vld [vmem:[#allocation52_spill] sm:$0xff] }
 0x8d7   : > { %v7393_v30 = vpack.c.bf16 %v8048_v47, %v8047_v26  ;;  %v8056_v22 = vpop.permute.xlu1 %8055  ;;  %v11952_v47 = vld [vmem:[#allocation47_spill] sm:$0xff]  ;;  %v7301_v0 = vpack.c.bf16 %v7958_v7, %v7957_v13  ;;  %v11961_v7 = vld [vmem:[#allocation53_spill] sm:$0xff] }
 0x8d8   : > { %v8058_v8 = vunpack.i.h.bf16 %v8056_v22  ;;  %v8057_v32 = vunpack.i.l.bf16 %v8056_v22  ;;  %v8061_v37 = vpop.permute.xlu0 %8060  ;;  %v7303_v22 = vpack.c.bf16 %v7963_v29, %v7962_v2  ;;  %v11963_v2 = vld [vmem:[#allocation55_spill] sm:$0xff] }
 0x8d9   : > { %v8063_v9 = vunpack.i.h.bf16 %v8061_v37  ;;  %v8062_v61 = vunpack.i.l.bf16 %v8061_v37  ;;  %7394 = vmatpush3.bf16.msra.mxu1 %v7393_v30  ;;  %v7967_v30 = vunpack.i.l.bf16 %v10838_v58  ;;  %v11953_v37 = vld [vmem:[#allocation35_spill] sm:$0xff] }
 0x8da   : > { %v7397_v24 = vpack.c.bf16 %v8058_v8, %v8057_v32  ;;  %7396 = vmatprep.subr.bf16.mxu1 %v7395_v50  ;;  %v7968_v50 = vunpack.i.h.bf16 %v10838_v58  ;;  %v7973_v8 = vunpack.i.h.bf16 %v10843_v63  ;;  %v7972_v32 = vunpack.i.l.bf16 %v10843_v63 }
 0x8db   : > { %v7399_v21 = vpack.c.bf16 %v8063_v9, %v8062_v61  ;;  %v8071_v20 = vpop.permute.xlu1 %8070  ;;  %v11954_v61 = vld [vmem:[#allocation36_spill] sm:$0xff] }
 0x8dc   : > { %v8066_v55 = vpop.permute.xlu0 %8065  ;;  %v8073_v17 = vunpack.i.h.bf16 %v8071_v20  ;;  %v8072_v43 = vunpack.i.l.bf16 %v8071_v20  ;;  %v7305_v58 = vpack.c.bf16 %v7968_v50, %v7967_v30  ;;  %v7982_v20 = vunpack.i.l.bf16 %v10853_v41 }
 0x8dd   : > { %v8068_v25 = vunpack.i.h.bf16 %v8066_v55  ;;  %v8067_v19 = vunpack.i.l.bf16 %v8066_v55  ;;  %7398 = vmatpush3.bf16.msra.mxu1 %v7397_v24  ;;  %v7977_v55 = vunpack.i.l.bf16 %v10846_v31 }
 0x8de   : > { %7400 = vmatprep.subr.bf16.mxu1 %v7399_v21  ;;  %v7403_v62 = vpack.c.bf16 %v8073_v17, %v8072_v43  ;;  %v7978_v21 = vunpack.i.h.bf16 %v10846_v31  ;;  %v11955_v17 = vld [vmem:[#allocation48_spill] sm:$0xff] }
 0x8df   : > { %v7401_v40 = vpack.c.bf16 %v8068_v25, %v8067_v19  ;;  %v7307_v25 = vpack.c.bf16 %v7973_v8, %v7972_v32  ;;  %v7983_v19 = vunpack.i.h.bf16 %v10853_v41 }
 0x8e0   : > { %v7309_v31 = vpack.c.bf16 %v7978_v21, %v7977_v55 }
 0x8e1   : > { %7402 = vmatpush3.bf16.msra.mxu1 %v7401_v40  ;;  %v11956_v40 = vld [vmem:[#allocation37_spill] sm:$0xff] }
 0x8e2   : > { %7404 = vmatprep.subr.bf16.mxu1 %v7403_v62 }
 0x8fd   : > { %v6253_v57 = vpop.f32.mrb[60].mxu1 }
 0x8fe   : > { %v6254_v3 = vpop.f32.mrb[61].mxu1 }
 0x8ff   : > { %v6255_v14 = vadd.f32 %v6254_v3, %v6253_v57  ;;  %v7988_v57 = vunpack.i.h.bf16 %v10851_v28  ;;  %v7987_v3 = vunpack.i.l.bf16 %v10851_v28 }
 0x901   : > { %6872 = vmatprep.mubr.msk.f32.mxu0 %vm1299_vm0, %v6255_v14  ;;  %v7311_v14 = vpack.c.bf16 %v7983_v19, %v7982_v20  ;;  %v7313_v28 = vpack.c.bf16 %v7988_v57, %v7987_v3 }
 0x905   : > { %v6256_v59 = vpop.f32.mrb[62].mxu1 }
 0x906   : > { %v6257_v45 = vpop.f32.mrb[63].mxu1 }
 0x907   : > { %v6258_v46 = vadd.f32 %v6257_v45, %v6256_v59  ;;  %v7993_v59 = vunpack.i.h.bf16 %v10856_v52  ;;  %v7992_v45 = vunpack.i.l.bf16 %v10856_v52 }
 0x909   : > { %6873 = vmatmul.mubr.msk.f32.gmra.mrb[94].mxu0 %vm1299_vm0, %v6258_v46  ;;  %v10874_v5 = vpop.f32.mrb[64].mxu1  ;;  %v11958_v46 = vld [vmem:[#allocation50_spill] sm:$0xff] }
 0x90a   : > { %6883 = vmatprep.mubr.msk.f32.mxu0 %vm1299_vm0, %v11948_v53  ;;  %v10878_v27 = vpop.f32.mrb[65].mxu1  ;;  %v7997_v53 = vunpack.i.l.bf16 %v10861_v34 }
 0x90b   : > { %v3603_v15 = vmax.f32 %v10874_v5, %v10878_v27 }
 0x90c   : > { %v7317_v34 = vpack.c.bf16 %v7998_v36, %v7997_v53 }
 0x90d   : > { %6884 = vmatmul.mubr.msk.f32.vlgmr.msra.gmra.mrb[80].mxu0 %vm1299_vm0, %v11949_v42  ;;  %3604 = vmax.xlane.f32.xlu0 %v3603_v15  ;;  %v10888_v33 = vpop.f32.mrb[66].mxu1  ;;  %v11959_v15 = vld [vmem:[#allocation51_spill] sm:$0xff]  ;;  %v8008_v42 = vunpack.i.h.bf16 %v10863_v16 }
 0x90e   : > { %6886 = vmatprep.mubr.msk.f32.mxu0 %vm1299_vm0, %v11950_v48  ;;  %v10892_v35 = vpop.f32.mrb[67].mxu1  ;;  %7294 = vmatpush3.bf16.msra.mxu0 %v7293_v60  ;;  %v7315_v60 = vpack.c.bf16 %v7993_v59, %v7992_v45  ;;  %v8007_v48 = vunpack.i.l.bf16 %v10863_v16 }
 0x90f   : > { %v3606_v39 = vmax.f32 %v10888_v33, %v10892_v35  ;;  %7296 = vmatprep.subr.bf16.mxu0 %v7295_v56 }
 0x910   : > { %v7321_v29 = vpack.c.bf16 %v8008_v42, %v8007_v48 }
 0x911   : > { %6887 = vmatmul.mubr.msk.f32.gmra.mrb[82].mxu0 %vm1299_vm0, %v11951_v4  ;;  %3607 = vmax.xlane.f32.xlu1 %v3606_v39  ;;  %v10902_v49 = vpop.f32.mrb[68].mxu1  ;;  %v11962_v39 = vld [vmem:[#allocation54_spill] sm:$0xff] }
 0x912   : > { %6889 = vmatprep.mubr.msk.f32.mxu0 %vm1299_vm0, %v11952_v47  ;;  %v10906_v26 = vpop.f32.mrb[69].mxu1  ;;  %7298 = vmatpush3.bf16.msra.mxu0 %v7297_v38  ;;  %v7319_v38 = vpack.c.bf16 %v8003_v11, %v8002_v18 }
 0x913   : > { %v3609_v6 = vmax.f32 %v10902_v49, %v10906_v26  ;;  %7300 = vmatprep.subr.bf16.mxu0 %v7299_v1 }
 0x915   : > { %6890 = vmatmul.mubr.msk.f32.gmra.mrb[84].mxu0 %vm1299_vm0, %v11953_v37  ;;  %3610 = vmax.xlane.f32.xlu0 %v3609_v6  ;;  %v10916_v9 = vpop.f32.mrb[70].mxu1 }
 0x916   : > { %6892 = vmatprep.mubr.msk.f32.mxu0 %vm1299_vm0, %v11954_v61  ;;  %v10920_v24 = vpop.f32.mrb[71].mxu1  ;;  %7302 = vmatpush3.bf16.msra.mxu0 %v7301_v0 }
 0x917   : > { %v3612_v63 = vmax.f32 %v10916_v9, %v10920_v24  ;;  %7304 = vmatprep.subr.bf16.mxu0 %v7303_v22 }
 0x919   : > { %6893 = vmatmul.mubr.msk.f32.gmra.mrb[86].mxu0 %vm1299_vm0, %v11955_v17  ;;  %3613 = vmax.xlane.f32.xlu0 %v3612_v63  ;;  %v10930_v43 = vpop.f32.mrb[72].mxu1 }
 0x91a   : > { %6895 = vmatprep.mubr.msk.f32.mxu0 %vm1299_vm0, %v11956_v40  ;;  %v10934_v62 = vpop.f32.mrb[73].mxu1  ;;  %7306 = vmatpush3.bf16.msra.mxu0 %v7305_v58 }
 0x91b   : > { %v3615_v41 = vmax.f32 %v10930_v43, %v10934_v62  ;;  %7308 = vmatprep.subr.bf16.mxu0 %v7307_v25 }
 0x91d   : > { %6896 = vmatmul.mubr.msk.f32.gmra.mrb[88].mxu0 %vm1299_vm0, %v11957_v10  ;;  %3616 = vmax.xlane.f32.xlu1 %v3615_v41  ;;  %v10944_v23 = vpop.f32.mrb[74].mxu1 }
 0x91e   : > { %6898 = vmatprep.mubr.msk.f32.mxu0 %vm1299_vm0, %v11958_v46  ;;  %v10948_v54 = vpop.f32.mrb[75].mxu1  ;;  %7310 = vmatpush3.bf16.msra.mxu0 %v7309_v31 }
 0x91f   : > { %v3618_v52 = vmax.f32 %v10944_v23, %v10948_v54  ;;  %7312 = vmatprep.subr.bf16.mxu0 %v7311_v14 }
 0x921   : > { %6899 = vmatmul.mubr.msk.f32.gmra.mrb[90].mxu0 %vm1299_vm0, %v11959_v15  ;;  %3619 = vmax.xlane.f32.xlu0 %v3618_v52  ;;  %v10958_v56 = vpop.f32.mrb[76].mxu1 }
 0x922   : > { %6901 = vmatprep.mubr.msk.f32.mxu0 %vm1299_vm0, %v11960_v51  ;;  %v10962_v12 = vpop.f32.mrb[77].mxu1  ;;  %7314 = vmatpush3.bf16.msra.mxu0 %v7313_v28 }
 0x923   : > { %v3621_v44 = vmax.f32 %v10958_v56, %v10962_v12  ;;  %7316 = vmatprep.subr.bf16.mxu0 %v7315_v60 }
 0x925   : > { %6902 = vmatmul.mubr.msk.f32.gmra.mrb[92].mxu0 %vm1299_vm0, %v11961_v7  ;;  %3622 = vmax.xlane.f32.xlu1 %v3621_v44  ;;  %v10970_v13 = vpop.f32.mrb[78].mxu1 }
 0x926   : > { %6904 = vmatprep.mubr.msk.f32.mxu0 %vm1299_vm0, %v11962_v39  ;;  %v10974_v1 = vpop.f32.mrb[79].mxu1  ;;  %7318 = vmatpush3.bf16.msra.mxu0 %v7317_v34 }
 0x927   : > { %v3624_v16 = vmax.f32 %v10970_v13, %v10974_v1  ;;  %7320 = vmatprep.subr.bf16.mxu0 %v7319_v38 }
 0x929   : > { %6905 = vmatmul.mubr.msk.f32.gmra.mrb[94].mxu0 %vm1299_vm0, %v11963_v2  ;;  %3625 = vmax.xlane.f32.xlu0 %v3624_v16  ;;  %v10980_v4 = vpop.f32.mrb[80].mxu1 }
 0x92a   : > { %v10982_v47 = vpop.f32.mrb[81].mxu1  ;;  %7322 = vmatpush3.bf16.msra.mxu0 %v7321_v29 }
 0x92b   : > { %v3627_v0 = vmax.f32 %v10980_v4, %v10982_v47 }
 0x92d   : > { %3628 = vmax.xlane.f32.xlu1 %v3627_v0  ;;  %v10986_v50 = vpop.f32.mrb[82].mxu1 }
 0x92e   : > { %v10988_v30 = vpop.f32.mrb[83].mxu1 }
 0x92f   : > { %v3630_v6 = vmax.f32 %v10986_v50, %v10988_v30 }
 0x931   : > { %3631 = vmax.xlane.f32.xlu1 %v3630_v6  ;;  %v10992_v22 = vpop.f32.mrb[84].mxu1 }
 0x932   : > { %v10994_v8 = vpop.f32.mrb[85].mxu1 }
 0x933   : > { %v3633_v32 = vmax.f32 %v10992_v22, %v10994_v8 }
 0x935   : > { %3634 = vmax.xlane.f32.xlu1 %v3633_v32  ;;  %v10998_v37 = vpop.f32.mrb[86].mxu1 }
 0x936   : > { %v11000_v61 = vpop.f32.mrb[87].mxu1 }
 0x937   : > { %v3636_v58 = vmax.f32 %v10998_v37, %v11000_v61 }
 0x939   : > { %3637 = vmax.xlane.f32.xlu1 %v3636_v58  ;;  %v11004_v21 = vpop.f32.mrb[88].mxu1 }
 0x93a   : > { %v11006_v55 = vpop.f32.mrb[89].mxu1 }
 0x93b   : > { %v3639_v63 = vmax.f32 %v11004_v21, %v11006_v55 }
 0x93d   : > { %3640 = vmax.xlane.f32.xlu1 %v3639_v63  ;;  %v11010_v25 = vpop.f32.mrb[90].mxu1 }
 0x93e   : > { %v11012_v19 = vpop.f32.mrb[91].mxu1 }
 0x93f   : > { %v3642_v20 = vmax.f32 %v11010_v25, %v11012_v19 }
 0x941   : > { %3643 = vmax.xlane.f32.xlu1 %v3642_v20  ;;  %v11016_v17 = vpop.f32.mrb[92].mxu1 }
 0x942   : > { %v11018_v40 = vpop.f32.mrb[93].mxu1 }
 0x943   : > { %v3645_v31 = vmax.f32 %v11016_v17, %v11018_v40 }
 0x945   : > { %3646 = vmax.xlane.f32.xlu1 %v3645_v31  ;;  %v11022_v57 = vpop.f32.mrb[94].mxu1 }
 0x946   : > { %v11024_v3 = vpop.f32.mrb[95].mxu1 }
 0x947   : > { %v3648_v41 = vmax.f32 %v11022_v57, %v11024_v3 }
 0x949   : > { %v11028_v14 = vpop.f32.mrb[96].mxu1  ;;  %3649 = vmax.xlane.f32.xlu1 %v3648_v41 }
 0x94a   : > { %v11030_v59 = vpop.f32.mrb[97].mxu1 }
 0x94b   : > { %v4650_v45 = vmax.f32 %v11028_v14, %v11030_v59 }
 0x94d   : > { %4651 = vmax.xlane.f32.xlu0 %v4650_v45  ;;  %v11034_v10 = vpop.f32.mrb[98].mxu1 }
 0x94e   : > { %v11036_v46 = vpop.f32.mrb[99].mxu1 }
 0x94f   : > { %v4653_v28 = vmax.f32 %v11034_v10, %v11036_v46 }
 0x951   : > { %4654 = vmax.xlane.f32.xlu0 %v4653_v28  ;;  %v11040_v36 = vpop.f32.mrb[100].mxu1 }
 0x952   : > { %v11042_v53 = vpop.f32.mrb[101].mxu1 }
 0x953   : > { %v4656_v52 = vmax.f32 %v11040_v36, %v11042_v53 }
 0x955   : > { %4657 = vmax.xlane.f32.xlu0 %v4656_v52  ;;  %v11046_v60 = vpop.f32.mrb[102].mxu1 }
 0x956   : > { %v11048_v11 = vpop.f32.mrb[103].mxu1 }
 0x957   : > { %v4659_v18 = vmax.f32 %v11046_v60, %v11048_v11 }
 0x959   : > { %4660 = vmax.xlane.f32.xlu0 %v4659_v18  ;;  %v11052_v15 = vpop.f32.mrb[104].mxu1 }
 0x95a   : > { %v11054_v51 = vpop.f32.mrb[105].mxu1 }
 0x95b   : > { %v4662_v34 = vmax.f32 %v11052_v15, %v11054_v51 }
 0x95d   : > { %4663 = vmax.xlane.f32.xlu0 %v4662_v34  ;;  %v11058_v42 = vpop.f32.mrb[106].mxu1 }
 0x95e   : > { %v11060_v48 = vpop.f32.mrb[107].mxu1 }
 0x95f   : > { %v4665_v44 = vmax.f32 %v11058_v42, %v11060_v48 }
 0x961   : > { %4666 = vmax.xlane.f32.xlu0 %v4665_v44  ;;  %v11064_v38 = vpop.f32.mrb[108].mxu1 }
 0x962   : > { %v11066_v7 = vpop.f32.mrb[109].mxu1 }
 0x963   : > { %v4668_v39 = vmax.f32 %v11064_v38, %v11066_v7 }
 0x965   : > { %4669 = vmax.xlane.f32.xlu0 %v4668_v39  ;;  %v11070_v29 = vpop.f32.mrb[110].mxu1 }
 0x966   : > { %v11072_v16 = vpop.f32.mrb[111].mxu1 }
 0x967   : > { %v4671_v2 = vmax.f32 %v11070_v29, %v11072_v16 }
 0x969   : > { %4672 = vmax.xlane.f32.xlu0 %v4671_v2  ;;  %v11076_v0 = vpop.f32.mrb[112].mxu1 }
 0x96a   : > { %v11078_v6 = vpop.f32.mrb[113].mxu1 }
 0x96b   : > { %v4674_v32 = vmax.f32 %v11076_v0, %v11078_v6 }
 0x96d   : > { %v11082_v58 = vpop.f32.mrb[114].mxu1  ;;  %4675 = vmax.xlane.f32.xlu1 %v4674_v32 }
 0x96e   : > { %11964 = vst [vmem:[#allocation30_spill] sm:$0xff] %v11082_v58  ;;  %v11084_v63 = vpop.f32.mrb[115].mxu1 }
 0x96f   : > { %11965 = vst [vmem:[#allocation39_spill] sm:$0xff] %v11084_v63  ;;  %v4677_v20 = vmax.f32 %v11082_v58, %v11084_v63 }
 0x971   : > { %4678 = vmax.xlane.f32.xlu0 %v4677_v20  ;;  %v11088_v31 = vpop.f32.mrb[116].mxu1 }
 0x972   : > { %11966 = vst [vmem:[#allocation31_spill] sm:$0xff] %v11088_v31  ;;  %v11090_v41 = vpop.f32.mrb[117].mxu1 }
 0x973   : > { %11967 = vst [vmem:[#allocation29_spill] sm:$0xff] %v11090_v41  ;;  %v4680_v45 = vmax.f32 %v11088_v31, %v11090_v41 }
 0x975   : > { %v11094_v28 = vpop.f32.mrb[118].mxu1  ;;  %4681 = vmax.xlane.f32.xlu1 %v4680_v45 }
 0x976   : > { %11968 = vst [vmem:[#allocation63_spill] sm:$0xff] %v11094_v28  ;;  %v11096_v52 = vpop.f32.mrb[119].mxu1 }
 0x977   : > { %11969 = vst [vmem:[#allocation59_spill] sm:$0xff] %v11096_v52  ;;  %v4683_v18 = vmax.f32 %v11094_v28, %v11096_v52 }
 0x979   : > { %4684 = vmax.xlane.f32.xlu0 %v4683_v18  ;;  %v11100_v34 = vpop.f32.mrb[120].mxu1 }
 0x97a   : > { %11970 = vst [vmem:[#allocation40_spill] sm:$0xff] %v11100_v34  ;;  %v11102_v44 = vpop.f32.mrb[121].mxu1 }
 0x97b   : > { %11971 = vst [vmem:[#allocation32_spill] sm:$0xff] %v11102_v44  ;;  %v4686_v39 = vmax.f32 %v11100_v34, %v11102_v44 }
 0x97d   : > { %v11106_v2 = vpop.f32.mrb[122].mxu1  ;;  %4687 = vmax.xlane.f32.xlu1 %v4686_v39 }
 0x97e   : > { %11972 = vst [vmem:[#allocation41_spill] sm:$0xff] %v11106_v2  ;;  %v11108_v32 = vpop.f32.mrb[123].mxu1 }
 0x97f   : > { %11973 = vst [vmem:[#allocation56_spill] sm:$0xff] %v11108_v32  ;;  %v4689_v20 = vmax.f32 %v11106_v2, %v11108_v32 }
 0x981   : > { %v11112_v45 = vpop.f32.mrb[124].mxu1  ;;  %4690 = vmax.xlane.f32.xlu1 %v4689_v20 }
 0x982   : > { %11974 = vst [vmem:[#allocation60_spill] sm:$0xff] %v11112_v45  ;;  %v11114_v52 = vpop.f32.mrb[125].mxu1 }
 0x983   : > { %11975 = vst [vmem:[#allocation65_spill] sm:$0xff] %v11114_v52  ;;  %v4692_v18 = vmax.f32 %v11112_v45, %v11114_v52 }
 0x985   : > { %4693 = vmax.xlane.f32.xlu0 %v4692_v18  ;;  %v11118_v28 = vpop.f32.mrb[126].mxu1 }
 0x986   : > { %11976 = vst [vmem:[#allocation42_spill] sm:$0xff] %v11118_v28  ;;  %v11120_v44 = vpop.f32.mrb[127].mxu1 }
 0x987   : > { %11977 = vst [vmem:[#allocation57_spill] sm:$0xff] %v11120_v44  ;;  %v4695_v39 = vmax.f32 %v11118_v28, %v11120_v44 }
 0x989   : > { %4696 = vmax.xlane.f32.xlu1 %v4695_v39 }
 0x99a   : > { %v3605_v34 = vpop.xlane.xlu0 %3604 }
 0x99b   : > { %v3651_v32 = vsub.f32 %v10874_v5, %v3605_v34  ;;  %v3652_v2 = vsub.f32 %v10878_v27, %v3605_v34 }
 0x99d   : > { %v3683_v20 = vmul.f32 1.442695, %v3651_v32  ;;  %v3685_v41 = vmul.f32 1.442695, %v3652_v2 }
 0x99e   : > { %v3608_v31 = vpop.xlane.xlu1 %3607 }
 0x99f   : > { %8281 = vpow2.f32 %v3683_v20  ;;  %v3653_v52 = vsub.f32 %v10888_v33, %v3608_v31  ;;  %v3654_v18 = vsub.f32 %v10892_v35, %v3608_v31 }
 0x9a0   : > { %8283 = vpow2.f32 %v3685_v41 }
 0x9a1   : > { %v3687_v45 = vmul.f32 1.442695, %v3653_v52  ;;  %v3689_v63 = vmul.f32 1.442695, %v3654_v18 }
 0x9a2   : > { %v3611_v58 = vpop.xlane.xlu0 %3610 }
 0x9a3   : > { %8285 = vpow2.f32 %v3687_v45  ;;  %v3655_v39 = vsub.f32 %v10902_v49, %v3611_v58  ;;  %v3656_v44 = vsub.f32 %v10906_v26, %v3611_v58 }
 0x9a4   : > { %8287 = vpow2.f32 %v3689_v63 }
 0x9a5   : > { %v3691_v5 = vmul.f32 1.442695, %v3655_v39  ;;  %v3693_v27 = vmul.f32 1.442695, %v3656_v44 }
 0x9a6   : > { %v3614_v34 = vpop.xlane.xlu0 %3613 }
 0x9a7   : > { %8289 = vpow2.f32 %v3691_v5  ;;  %v3657_v2 = vsub.f32 %v10916_v9, %v3614_v34  ;;  %v3658_v33 = vsub.f32 %v10920_v24, %v3614_v34 }
 0x9a8   : > { %8291 = vpow2.f32 %v3693_v27 }
 0x9a9   : > { %v11132_v35 = vpop.eup %8281  ;;  %v3695_v31 = vmul.f32 1.442695, %v3657_v2  ;;  %v3697_v41 = vmul.f32 1.442695, %v3658_v33 }
 0x9aa   : > { %11978 = vst [vmem:[#allocation43_spill] sm:$0xff] %v11132_v35  ;;  %v11134_v52 = vpop.eup %8283  ;;  %v3617_v32 = vpop.xlane.xlu1 %3616 }
 0x9ab   : > { %11979 = vst [vmem:[#allocation58_spill] sm:$0xff] %v11134_v52  ;;  %8293 = vpow2.f32 %v3695_v31  ;;  %v3659_v49 = vsub.f32 %v10930_v43, %v3617_v32  ;;  %v3660_v26 = vsub.f32 %v10934_v62, %v3617_v32  ;;  %v3747_v58 = vadd.f32 %v11134_v52, %v11132_v35 }
 0x9ac   : > { %8295 = vpow2.f32 %v3697_v41  ;;  %v8569_v41 = vld [vmem:[#allocation3 + $0x60] sm:$0xff] }
 0x9ad   : > { %v11140_v9 = vpop.eup %8285  ;;  %v3699_v24 = vmul.f32 1.442695, %v3659_v49  ;;  %v3701_v63 = vmul.f32 1.442695, %v3660_v26  ;;  %3748 = vadd.xlane.f32.xlu1 %v3747_v58  ;;  %v8570_v58 = vld [vmem:[#allocation3 + $0x68] sm:$0xff] }
 0x9ae   : > { %11980 = vst [vmem:[#allocation67_spill] sm:$0xff] %v11140_v9  ;;  %v11142_v44 = vpop.eup %8287  ;;  %v8074_v31 = vpack.i.bf16 %v8570_v58, %v8569_v41  ;;  %v3620_v41 = vpop.xlane.xlu0 %3619 }
 0x9af   : > { %11981 = vst [vmem:[#allocation61_spill] sm:$0xff] %v11142_v44  ;;  %8297 = vpow2.f32 %v3699_v24  ;;  %v3750_v45 = vadd.f32 %v11142_v44, %v11140_v9 }
 0x9b0   : > { %8299 = vpow2.f32 %v3701_v63 }
 0x9b1   : > { %v11146_v20 = vpop.eup %8289  ;;  %3751 = vadd.xlane.f32.xlu0 %v3750_v45  ;;  %v8571_v45 = vld [vmem:[#allocation3 + $0xf0] sm:$0xff] }
 0x9b2   : > { %11982 = vst [vmem:[#allocation44_spill] sm:$0xff] %v11146_v20  ;;  %v11148_v43 = vpop.eup %8291  ;;  %v3623_v5 = vpop.xlane.xlu1 %3622 }
 0x9b3   : > { %11983 = vst [vmem:[#allocation62_spill] sm:$0xff] %v11148_v43  ;;  %v3753_v62 = vadd.f32 %v11148_v43, %v11146_v20 }
 0x9b5   : > { %v11152_v18 = vpop.eup %8293  ;;  %3754 = vadd.xlane.f32.xlu1 %v3753_v62 }
 0x9b6   : > { %11984 = vst [vmem:[#allocation45_spill] sm:$0xff] %v11152_v18  ;;  %v11154_v39 = vpop.eup %8295 }
 0x9b7   : > { %11985 = vst [vmem:[#allocation64_spill] sm:$0xff] %v11154_v39  ;;  %v3756_v27 = vadd.f32 %v11154_v39, %v11152_v18  ;;  %v3664_v39 = vsub.f32 %v10962_v12, %v3623_v5 }
 0x9b9   : > { %v11158_v34 = vpop.eup %8297  ;;  %3757 = vadd.xlane.f32.xlu0 %v3756_v27  ;;  %v3709_v35 = vmul.f32 1.442695, %v3664_v39 }
 0x9ba   : > { %11986 = vst [vmem:[#allocation66_spill] sm:$0xff] %v11158_v34  ;;  %v11160_v2 = vpop.eup %8299  ;;  %v11162_v33 = vpop.xlane.xlu1 %3628 }
 0x9bb   : > { %11987 = vst [vmem:[#allocation68_spill] sm:$0xff] %v11160_v2  ;;  %v3759_v32 = vadd.f32 %v11160_v2, %v11158_v34  ;;  %v8572_v2 = vld [vmem:[#allocation3 + $0xf8] sm:$0xff]  ;;  %v3662_v34 = vsub.f32 %v10948_v54, %v3620_v41 }
 0x9bc   : > { %v8079_v18 = vpack.i.bf16 %v8572_v2, %v8571_v45  ;;  %v3626_v45 = vpop.xlane.xlu0 %3625 }
 0x9bd   : > { %3760 = vadd.xlane.f32.xlu1 %v3759_v32  ;;  %v3663_v32 = vsub.f32 %v10958_v56, %v3623_v5  ;;  %v3705_v9 = vmul.f32 1.442695, %v3662_v34  ;;  %v3666_v44 = vsub.f32 %v10974_v1, %v3626_v45 }
 0x9be   : > { %v11170_v49 = vpop.xlane.xlu1 %3631 }
 0x9bf   : > { %v3707_v52 = vmul.f32 1.442695, %v3663_v32  ;;  %v3713_v54 = vmul.f32 1.442695, %v3666_v44 }
 0x9c2   : > { %v11176_v24 = vpop.xlane.xlu1 %3634 }
 0x9c6   : > { %v11182_v62 = vpop.xlane.xlu1 %3637 }
 0x9ca   : > { %v11188_v26 = vpop.xlane.xlu1 %3640 }
 0x9ce   : > { %8075 = vrot.lane.b32.xlu1 %v8074_v31, %s8864_s17  ;;  %v11195_v27 = vpop.xlane.xlu1 %3643  ;;  %v3661_v31 = vsub.f32 %v10944_v23, %v3620_v41 }
 0x9cf   : > { %8080 = vrot.lane.b32.xlu0 %v8079_v18, %s8864_s17  ;;  %v3665_v18 = vsub.f32 %v10970_v13, %v3626_v45 }
 0x9d0   : > { %v3703_v20 = vmul.f32 1.442695, %v3661_v31 }
 0x9d1   : > { %v3711_v2 = vmul.f32 1.442695, %v3665_v18 }
 0x9d2   : > { %v11202_v58 = vpop.xlane.xlu1 %3646  ;;  %8301 = vpow2.f32 %v3703_v20 }
 0x9d3   : > { %8303 = vpow2.f32 %v3705_v9 }
 0x9d4   : > { %8305 = vpow2.f32 %v3707_v52 }
 0x9d5   : > { %8307 = vpow2.f32 %v3709_v35 }
 0x9d6   : > { %v3650_v63 = vpop.xlane.xlu1 %3649  ;;  %8309 = vpow2.f32 %v3711_v2 }
 0x9d7   : > { %v3681_v23 = vsub.f32 %v11022_v57, %v3650_v63  ;;  %v3682_v56 = vsub.f32 %v11024_v3, %v3650_v63  ;;  %8311 = vpow2.f32 %v3713_v54 }
 0x9d9   : > { %v3743_v12 = vmul.f32 1.442695, %v3681_v23  ;;  %v3745_v1 = vmul.f32 1.442695, %v3682_v56 }
 0x9da   : > { %v4652_v43 = vpop.xlane.xlu0 %4651 }
 0x9db   : > { %v4698_v13 = vsub.f32 %v11028_v14, %v4652_v43  ;;  %v4699_v39 = vsub.f32 %v11030_v59, %v4652_v43  ;;  %8313 = vpow2.f32 %v3743_v12 }
 0x9dc   : > { %8315 = vpow2.f32 %v3745_v1  ;;  %v11220_v52 = vpop.eup %8301 }
 0x9dd   : > { %v4730_v20 = vmul.f32 1.442695, %v4698_v13  ;;  %v4732_v9 = vmul.f32 1.442695, %v4699_v39  ;;  %v11222_v35 = vpop.eup %8303 }
 0x9de   : > { %v4655_v28 = vpop.xlane.xlu0 %4654  ;;  %v11224_v44 = vpop.eup %8305 }
 0x9df   : > { %v4700_v57 = vsub.f32 %v11034_v10, %v4655_v28  ;;  %v4701_v3 = vsub.f32 %v11036_v46, %v4655_v28  ;;  %8317 = vpow2.f32 %v4730_v20  ;;  %v11227_v43 = vpop.eup %8307  ;;  %v3762_v46 = vadd.f32 %v11222_v35, %v11220_v52 }
 0x9e0   : > { %8319 = vpow2.f32 %v4732_v9  ;;  %v11230_v41 = vpop.eup %8309 }
 0x9e1   : > { %v4734_v14 = vmul.f32 1.442695, %v4700_v57  ;;  %v4736_v10 = vmul.f32 1.442695, %v4701_v3  ;;  %v11234_v28 = vpop.eup %8311 }
 0x9e2   : > { %v4658_v5 = vpop.xlane.xlu0 %4657  ;;  %v3768_v54 = vadd.f32 %v11234_v28, %v11230_v41 }
 0x9e3   : > { %v4702_v63 = vsub.f32 %v11040_v36, %v4658_v5  ;;  %v4703_v32 = vsub.f32 %v11042_v53, %v4658_v5  ;;  %8321 = vpow2.f32 %v4734_v14  ;;  %v3765_v53 = vadd.f32 %v11227_v43, %v11224_v44 }
 0x9e4   : > { %8323 = vpow2.f32 %v4736_v10 }
 0x9e5   : > { %v4738_v2 = vmul.f32 1.442695, %v4702_v63  ;;  %v4740_v36 = vmul.f32 1.442695, %v4703_v32  ;;  %v11238_v23 = vpop.eup %8313 }
 0x9e6   : > { %v4661_v34 = vpop.xlane.xlu0 %4660  ;;  %11988 = vst [vmem:[#allocation46_spill] sm:$0xff] %v11238_v23  ;;  %v11244_v56 = vpop.eup %8315 }
 0x9e7   : > { %v4704_v31 = vsub.f32 %v11046_v60, %v4661_v34  ;;  %v4705_v45 = vsub.f32 %v11048_v11, %v4661_v34  ;;  %8325 = vpow2.f32 %v4738_v2  ;;  %v3792_v1 = vadd.f32 %v11244_v56, %v11238_v23 }
 0x9e8   : > { %8327 = vpow2.f32 %v4740_v36 }
 0x9e9   : > { %v4742_v12 = vmul.f32 1.442695, %v4704_v31  ;;  %v4744_v13 = vmul.f32 1.442695, %v4705_v45  ;;  %v11248_v5 = vpop.eup %8317 }
 0x9ea   : > { %v4664_v59 = vpop.xlane.xlu0 %4663  ;;  %v11252_v39 = vpop.eup %8319 }
 0x9eb   : > { %v4706_v60 = vsub.f32 %v11052_v15, %v4664_v59  ;;  %v4707_v11 = vsub.f32 %v11054_v51, %v4664_v59  ;;  %8329 = vpow2.f32 %v4742_v12  ;;  %v4794_v51 = vadd.f32 %v11252_v39, %v11248_v5 }
 0x9ec   : > { %8331 = vpow2.f32 %v4744_v13 }
 0x9ed   : > { %v4746_v57 = vmul.f32 1.442695, %v4706_v60  ;;  %v4748_v15 = vmul.f32 1.442695, %v4707_v11  ;;  %v11256_v3 = vpop.eup %8321 }
 0x9ee   : > { %3763 = vadd.xlane.f32.xlu0 %v3762_v46  ;;  %v4667_v18 = vpop.xlane.xlu0 %4666  ;;  %v11260_v14 = vpop.eup %8323 }
 0x9ef   : > { %v4708_v34 = vsub.f32 %v11058_v42, %v4667_v18  ;;  %v4709_v9 = vsub.f32 %v11060_v48, %v4667_v18  ;;  %8333 = vpow2.f32 %v4746_v57  ;;  %v4797_v48 = vadd.f32 %v11260_v14, %v11256_v3  ;;  %v8574_v57 = vld [vmem:[#allocation3 + $0x78] sm:$0xff] }
 0x9f0   : > { %8335 = vpow2.f32 %v4748_v15 }
 0x9f1   : > { %v4750_v63 = vmul.f32 1.442695, %v4708_v34  ;;  %v4752_v10 = vmul.f32 1.442695, %v4709_v9  ;;  %v11264_v46 = vpop.eup %8325 }
 0x9f2   : > { %3766 = vadd.xlane.f32.xlu0 %v3765_v53  ;;  %3769 = vadd.xlane.f32.xlu1 %v3768_v54  ;;  %v4670_v20 = vpop.xlane.xlu0 %4669  ;;  %v11268_v2 = vpop.eup %8327 }
 0x9f3   : > { %v4710_v59 = vsub.f32 %v11064_v38, %v4670_v20  ;;  %v4711_v42 = vsub.f32 %v11066_v7, %v4670_v20  ;;  %8337 = vpow2.f32 %v4750_v63  ;;  %v4800_v7 = vadd.f32 %v11268_v2, %v11264_v46  ;;  %v8573_v20 = vld [vmem:[#allocation3 + $0x70] sm:$0xff] }
 0x9f4   : > { %8339 = vpow2.f32 %v4752_v10  ;;  %v8084_v34 = vpack.i.bf16 %v8574_v57, %v8573_v20  ;;  %v11993_v20 = vld [vmem:[#allocation40_spill] sm:$0xff] }
 0x9f5   : > { %v4754_v31 = vmul.f32 1.442695, %v4710_v59  ;;  %v4756_v38 = vmul.f32 1.442695, %v4711_v42  ;;  %v11272_v53 = vpop.eup %8329  ;;  %v11990_v59 = vld [vmem:[#allocation39_spill] sm:$0xff] }
 0x9f6   : > { %3793 = vadd.xlane.f32.xlu1 %v3792_v1  ;;  %v4673_v32 = vpop.xlane.xlu0 %4672  ;;  %v11276_v54 = vpop.eup %8331 }
 0x9f7   : > { %v4712_v36 = vsub.f32 %v11070_v29, %v4673_v32  ;;  %v4713_v45 = vsub.f32 %v11072_v16, %v4673_v32  ;;  %8341 = vpow2.f32 %v4754_v31  ;;  %v4803_v16 = vadd.f32 %v11276_v54, %v11272_v53 }
 0x9f8   : > { %8343 = vpow2.f32 %v4756_v38 }
 0x9f9   : > { %v4758_v12 = vmul.f32 1.442695, %v4712_v36  ;;  %v4760_v29 = vmul.f32 1.442695, %v4713_v45  ;;  %v11280_v1 = vpop.eup %8333  ;;  %v11991_v36 = vld [vmem:[#allocation31_spill] sm:$0xff] }
 0x9fa   : > { %4795 = vadd.xlane.f32.xlu1 %v4794_v51  ;;  %v4676_v18 = vpop.xlane.xlu1 %4675  ;;  %v11284_v15 = vpop.eup %8335  ;;  %v11989_v51 = vld [vmem:[#allocation30_spill] sm:$0xff] }
 0x9fb   : > { %v4714_v60 = vsub.f32 %v11076_v0, %v4676_v18  ;;  %v4715_v13 = vsub.f32 %v11078_v6, %v4676_v18  ;;  %8345 = vpow2.f32 %v4758_v12  ;;  %v4806_v32 = vadd.f32 %v11284_v15, %v11280_v1  ;;  %v11992_v18 = vld [vmem:[#allocation29_spill] sm:$0xff] }
 0x9fc   : > { %8347 = vpow2.f32 %v4760_v29 }
 0x9fd   : > { %v4762_v9 = vmul.f32 1.442695, %v4714_v60  ;;  %v4764_v63 = vmul.f32 1.442695, %v4715_v13  ;;  %v11288_v42 = vpop.eup %8337 }
 0x9fe   : > { %4798 = vadd.xlane.f32.xlu1 %v4797_v48  ;;  %v4679_v11 = vpop.xlane.xlu0 %4678  ;;  %v11293_v48 = vpop.eup %8339 }
 0x9ff   : > { %v4716_v0 = vsub.f32 %v11989_v51, %v4679_v11  ;;  %v4717_v6 = vsub.f32 %v11990_v59, %v4679_v11  ;;  %8349 = vpow2.f32 %v4762_v9  ;;  %v4809_v29 = vadd.f32 %v11293_v48, %v11288_v42  ;;  %v11994_v9 = vld [vmem:[#allocation32_spill] sm:$0xff] }
 0xa00   : > { %8351 = vpow2.f32 %v4764_v63 }
 0xa01   : > { %v4766_v31 = vmul.f32 1.442695, %v4716_v0  ;;  %v4768_v45 = vmul.f32 1.442695, %v4717_v6  ;;  %v11297_v60 = vpop.eup %8341  ;;  %v11995_v6 = vsub.f32 %v10980_v4, %v11162_v33 }
 0xa02   : > { %4801 = vadd.xlane.f32.xlu1 %v4800_v7  ;;  %v4682_v10 = vpop.xlane.xlu1 %4681  ;;  %v11301_v13 = vpop.eup %8343 }
 0xa03   : > { %v4718_v38 = vsub.f32 %v11991_v36, %v4682_v10  ;;  %v4719_v7 = vsub.f32 %v11992_v18, %v4682_v10  ;;  %8353 = vpow2.f32 %v4766_v31  ;;  %v4812_v63 = vadd.f32 %v11301_v13, %v11297_v60  ;;  %v11997_v18 = vld [vmem:[#allocation65_spill] sm:$0xff] }
 0xa04   : > { %8355 = vpow2.f32 %v4768_v45  ;;  %v3715_v10 = vmul.f32 1.442695, %v11995_v6 }
 0xa05   : > { %v4770_v11 = vmul.f32 1.442695, %v4718_v38  ;;  %v11307_v0 = vpop.eup %8345  ;;  %v11996_v38 = vld [vmem:[#allocation60_spill] sm:$0xff] }
 0xa06   : > { %4804 = vadd.xlane.f32.xlu1 %v4803_v16  ;;  %v11303_v16 = vpop.xlane.xlu0 %4684  ;;  %v11311_v59 = vpop.eup %8347 }
 0xa07   : > { %8357 = vpow2.f32 %v4770_v11  ;;  %v4815_v4 = vadd.f32 %v11311_v59, %v11307_v0  ;;  %v11999_v11 = vsub.f32 %v10986_v50, %v11170_v49  ;;  %v12001_v50 = vsub.f32 %v10992_v22, %v11176_v24 }
 0xa08   : > { %8085 = vrot.lane.b32.xlu0 %v8084_v34, %s8864_s17  ;;  %v4772_v34 = vmul.f32 1.442695, %v4719_v7  ;;  %v12003_v22 = vsub.f32 %v10998_v37, %v11182_v62  ;;  %v12007_v37 = vsub.f32 %v11004_v21, %v11188_v26  ;;  %v12011_v21 = vsub.f32 %v11010_v25, %v11195_v27  ;;  %s8865_s17 = smov [#allocation13]  }
 0xa09   : > { %v12013_v25 = vsub.f32 %v11016_v17, %v11202_v58  ;;  %s8725_s21 = sshll.u32 %s8865_s17, 4  ;;  %s8726_s21 = int_to_ptr.vmem [resolvable:$false] %s8725_s21 }
 0xa0a   : > { %4807 = vadd.xlane.f32.xlu1 %v4806_v32  ;;  %v4688_v12 = vpop.xlane.xlu1 %4687  ;;  %8359 = vpow2.f32 %v4772_v34  ;;  %s8727_s3 = scalar_lea.vmem %s8726_s21, 4096  ;;  %p8728_p5 = scmp.lt.s32.totalorder %s11605_s22, %s8726_s21 }
 0xa0b   : > { %v4722_v57 = vsub.f32 %v11993_v20, %v4688_v12  ;;  %v4723_v51 = vsub.f32 %v11994_v9, %v4688_v12  ;;  %v11318_v12 = vpop.eup %8349  ;;  %8361 = vpow2.f32 %v3715_v10  ;;  %p8729_p4 = scmp.lt.s32.totalorder %s8727_s3, %s8721_s16 }
 0xa0c   : > { %v11325_v9 = vpop.eup %8351 }
 0xa0d   : > { %v4778_v32 = vmul.f32 1.442695, %v4722_v57  ;;  %v4780_v36 = vmul.f32 1.442695, %v4723_v51  ;;  %v3719_v57 = vmul.f32 1.442695, %v11999_v11  ;;  %v4818_v6 = vadd.f32 %v11325_v9, %v11318_v12  ;;  %p8730_p12 = por %p8729_p4, %p8728_p5 }
 0xa0e   : > { %4810 = vadd.xlane.f32.xlu1 %v4809_v29  ;;  %v11998_v29 = vsub.f32 %v10982_v47, %v11162_v33  ;;  %v12000_v47 = vsub.f32 %v10988_v30, %v11170_v49  ;;  %v12002_v30 = vsub.f32 %v10994_v8, %v11176_v24  ;;  %v12005_v8 = vsub.f32 %v11000_v61, %v11182_v62 }
 0xa0f   : > { %8363 = vpow2.f32 %v4778_v32  ;;  %v3723_v32 = vmul.f32 1.442695, %v12001_v50  ;;  %v12009_v61 = vsub.f32 %v11006_v55, %v11188_v26  ;;  %v3735_v50 = vmul.f32 1.442695, %v12011_v21  ;;  %p8731_p10 = pnand %p8730_p12, %p8724_p3 }
 0xa10   : > { %v3717_v20 = vmul.f32 1.442695, %v11998_v29  ;;  %8365 = vpow2.f32 %v4780_v36  ;;  %v3721_v33 = vmul.f32 1.442695, %v12000_v47  ;;  %v3725_v49 = vmul.f32 1.442695, %v12002_v30 }
 0xa11   : > { %v3729_v24 = vmul.f32 1.442695, %v12005_v8  ;;  %v3733_v62 = vmul.f32 1.442695, %v12009_v61  ;;  %v12012_v55 = vsub.f32 %v11012_v19, %v11195_v27  ;;  %v4691_v27 = vpop.xlane.xlu1 %4690  ;;  %v12015_v8 = vsub.f32 %v11018_v40, %v11202_v58  ;;  %v12018_v40 = vld [vmem:[#allocation56_spill] sm:$0xff] }
 0xa12   : > { %4813 = vadd.xlane.f32.xlu1 %v4812_v63  ;;  %v4694_v31 = vpop.xlane.xlu0 %4693  ;;  %v11330_v63 = vpop.eup %8353  ;;  %8367 = vpow2.f32 %v3717_v20  ;;  %v4725_v58 = vsub.f32 %v12018_v40, %v4691_v27 }
 0xa13   : > { %v4726_v45 = vsub.f32 %v11996_v38, %v4694_v31  ;;  %v4727_v7 = vsub.f32 %v11997_v18, %v4694_v31  ;;  %v11337_v10 = vpop.eup %8355  ;;  %8369 = vpow2.f32 %v3719_v57  ;;  %v3727_v18 = vmul.f32 1.442695, %v12003_v22 }
 0xa14   : > { %v11342_v31 = vpop.eup %8357  ;;  %v4821_v36 = vadd.f32 %v11337_v10, %v11330_v63  ;;  %v3731_v57 = vmul.f32 1.442695, %v12007_v37  ;;  %v3737_v26 = vmul.f32 1.442695, %v12012_v55  ;;  %v3739_v22 = vmul.f32 1.442695, %v12013_v25 }
 0xa15   : > { %v4786_v34 = vmul.f32 1.442695, %v4726_v45  ;;  %v4788_v51 = vmul.f32 1.442695, %v4727_v7  ;;  %v11349_v38 = vpop.eup %8359 }
 0xa16   : > { %4816 = vadd.xlane.f32.xlu1 %v4815_v4  ;;  %v11351_v45 = vpop.eup %8361  ;;  %v4824_v29 = vadd.f32 %v11349_v38, %v11342_v31  ;;  %v4697_v21 = vpop.xlane.xlu1 %4696 }
 0xa17   : > { %8371 = vpow2.f32 %v4786_v34 }
 0xa18   : > { %8373 = vpow2.f32 %v4788_v51 }
 0xa19   : > { %8375 = vpow2.f32 %v3721_v33  ;;  %v11356_v7 = vpop.eup %8363 }
 0xa1a   : > { %4819 = vadd.xlane.f32.xlu1 %v4818_v6  ;;  %8377 = vpow2.f32 %v3723_v32  ;;  %12004 = vst [vmem:[#allocation33_spill] sm:$0xff] %v11356_v7  ;;  %v11363_v20 = vpop.eup %8365 }
 0xa1b   : > { %8379 = vpow2.f32 %v3725_v49  ;;  %12006 = vst [vmem:[#allocation49_spill] sm:$0xff] %v11363_v20  ;;  %v4830_v51 = vadd.f32 %v11363_v20, %v11356_v7  ;;  %v12029_v7 = vld [vmem:[#allocation67_spill] sm:$0xff] }
 0xa1c   : > { %v11365_v4 = vpop.eup %8367  ;;  %8381 = vpow2.f32 %v3727_v18  ;;  %v12014_v18 = vld [vmem:[#allocation63_spill] sm:$0xff] }
 0xa1d   : > { %v11367_v11 = vpop.eup %8369  ;;  %8383 = vpow2.f32 %v3729_v24  ;;  %v3771_v33 = vadd.f32 %v11365_v4, %v11351_v45  ;;  %v4720_v19 = vsub.f32 %v12014_v18, %v11303_v16  ;;  %v3741_v24 = vmul.f32 1.442695, %v12015_v8  ;;  %v12020_v18 = vld [vmem:[#allocation57_spill] sm:$0xff] }
 0xa1e   : > { %4822 = vadd.xlane.f32.xlu1 %v4821_v36  ;;  %8385 = vpow2.f32 %v3731_v57 }
 0xa1f   : > { %8387 = vpow2.f32 %v3733_v62  ;;  %v4774_v62 = vmul.f32 1.442695, %v4720_v19  ;;  %v4729_v19 = vsub.f32 %v12020_v18, %v4697_v21 }
 0xa20   : > { %8389 = vpow2.f32 %v3735_v50 }
 0xa21   : > { %v11372_v34 = vpop.eup %8371  ;;  %8391 = vpow2.f32 %v3737_v26 }
 0xa22   : > { %4825 = vadd.xlane.f32.xlu1 %v4824_v29  ;;  %12008 = vst [vmem:[#allocation34_spill] sm:$0xff] %v11372_v34  ;;  %v11379_v47 = vpop.eup %8373  ;;  %v12016_v29 = vld [vmem:[#allocation59_spill] sm:$0xff]  ;;  %8393 = vpow2.f32 %v3739_v22  ;;  %v4784_v22 = vmul.f32 1.442695, %v4725_v58 }
 0xa23   : > { %12010 = vst [vmem:[#allocation47_spill] sm:$0xff] %v11379_v47  ;;  %v11383_v6 = vpop.eup %8375  ;;  %v4836_v32 = vadd.f32 %v11379_v47, %v11372_v34  ;;  %v4721_v37 = vsub.f32 %v12016_v29, %v11303_v16  ;;  %8395 = vpow2.f32 %v3741_v24  ;;  %v12028_v34 = vld [vmem:[#allocation61_spill] sm:$0xff] }
 0xa24   : > { %v11393_v30 = vpop.eup %8377  ;;  %v3774_v49 = vadd.f32 %v11383_v6, %v11367_v11  ;;  %8397 = vpow2.f32 %v4774_v62 }
 0xa25   : > { %v11397_v36 = vpop.eup %8379  ;;  %v4776_v50 = vmul.f32 1.442695, %v4721_v37  ;;  %v4792_v37 = vmul.f32 1.442695, %v4729_v19 }
 0xa26   : > { %4831 = vadd.xlane.f32.xlu1 %v4830_v51  ;;  %v11409_v57 = vpop.eup %8381  ;;  %v3777_v61 = vadd.f32 %v11397_v36, %v11393_v30  ;;  %v12017_v51 = vld [vmem:[#allocation41_spill] sm:$0xff] }
 0xa27   : > { %3772 = vadd.xlane.f32.xlu0 %v3771_v33  ;;  %v11413_v17 = vpop.eup %8383  ;;  %v4724_v33 = vsub.f32 %v12017_v51, %v4691_v27  ;;  %8399 = vpow2.f32 %v4776_v50 }
 0xa28   : > { %v11417_v55 = vpop.eup %8385  ;;  %v3780_v16 = vadd.f32 %v11413_v17, %v11409_v57 }
 0xa29   : > { %v11421_v26 = vpop.eup %8387  ;;  %v4782_v25 = vmul.f32 1.442695, %v4724_v33 }
 0xa2a   : > { %4837 = vadd.xlane.f32.xlu1 %v4836_v32  ;;  %v12019_v32 = vld [vmem:[#allocation42_spill] sm:$0xff]  ;;  %v11425_v8 = vpop.eup %8389  ;;  %v3783_v27 = vadd.f32 %v11421_v26, %v11417_v55 }
 0xa2b   : > { %3775 = vadd.xlane.f32.xlu0 %v3774_v49  ;;  %v4728_v49 = vsub.f32 %v12019_v32, %v4697_v21  ;;  %v11429_v24 = vpop.eup %8391  ;;  %8401 = vpow2.f32 %v4782_v25 }
 0xa2c   : > { %8403 = vpow2.f32 %v4784_v22  ;;  %v3786_v62 = vadd.f32 %v11429_v24, %v11425_v8 }
 0xa2d   : > { %v4790_v29 = vmul.f32 1.442695, %v4728_v49 }
 0xa2f   : > { %3778 = vadd.xlane.f32.xlu0 %v3777_v61  ;;  %v11431_v61 = vpop.eup %8393  ;;  %8405 = vpow2.f32 %v4790_v29  ;;  %v12026_v29 = vld [vmem:[#allocation43_spill] sm:$0xff] }
 0xa30   : > { %v11435_v51 = vpop.eup %8395 }
 0xa31   : > { %v11437_v21 = vpop.eup %8397  ;;  %v3789_v50 = vadd.f32 %v11435_v51, %v11431_v61 }
 0xa32   : > { %12021 = vst [vmem:[#allocation35_spill] sm:$0xff] %v11437_v21  ;;  %v11441_v40 = vpop.eup %8399 }
 0xa33   : > { %3781 = vadd.xlane.f32.xlu0 %v3780_v16  ;;  %v4827_v32 = vadd.f32 %v11441_v40, %v11437_v21  ;;  %v12035_v21 = vld [vmem:[#allocation66_spill] sm:$0xff] }
 0xa35   : > { %v11443_v16 = vpop.eup %8401 }
 0xa36   : > { %12022 = vst [vmem:[#allocation36_spill] sm:$0xff] %v11443_v16  ;;  %v11447_v49 = vpop.eup %8403 }
 0xa37   : > { %3784 = vadd.xlane.f32.xlu0 %v3783_v27  ;;  %12023 = vst [vmem:[#allocation48_spill] sm:$0xff] %v11447_v49  ;;  %v4833_v19 = vadd.f32 %v11447_v49, %v11443_v16 }
 0xa39   : > { %v11449_v22 = vpop.eup %8405 }
 0xa3a   : > { %v3749_v33 = vpop.xlane.xlu1 %3748  ;;  %12024 = vst [vmem:[#allocation37_spill] sm:$0xff] %v11449_v22 }
 0xa3b   : > { %8407 = vrcp.f32 %v3749_v33  ;;  %3787 = vadd.xlane.f32.xlu0 %v3786_v62  ;;  %v12027_v33 = vld [vmem:[#allocation58_spill] sm:$0xff] }
 0xa3c   : > { %8409 = vpow2.f32 %v4792_v37 }
 0xa3e   : > { %v3752_v58 = vpop.xlane.xlu0 %3751 }
 0xa3f   : > { %8411 = vrcp.f32 %v3752_v58  ;;  %3790 = vadd.xlane.f32.xlu0 %v3789_v50 }
 0xa42   : > { %v3755_v25 = vpop.xlane.xlu1 %3754 }
 0xa43   : > { %8413 = vrcp.f32 %v3755_v25  ;;  %4828 = vadd.xlane.f32.xlu0 %v4827_v32 }
 0xa45   : > { %v8408_v18 = vpop.eup %8407 }
 0xa46   : > { %v11453_v27 = vpop.eup %8409  ;;  %v3796_v37 = vmul.f32 %v8408_v18, %v12026_v29  ;;  %v3758_v62 = vpop.xlane.xlu0 %3757  ;;  %v3797_v50 = vmul.f32 %v8408_v18, %v12027_v33  ;;  %v12030_v33 = vld [vmem:[#allocation62_spill] sm:$0xff] }
 0xa47   : > { %12025 = vst [vmem:[#allocation38_spill] sm:$0xff] %v11453_v27  ;;  %8415 = vrcp.f32 %v3758_v62  ;;  %4834 = vadd.xlane.f32.xlu0 %v4833_v19  ;;  %v4839_v32 = vadd.f32 %v11453_v27, %v11449_v22 }
 0xa48   : > { %4003 = vmatprep.mubr.f32.mxu0 %v3797_v50 }
 0xa49   : > { %v8412_v58 = vpop.eup %8411  ;;  %4004 = vmatmul.mubr.f32.vlgmr.msra.gmra.mrb[96].mxu0 %v3796_v37  ;;  %v12031_v37 = vld [vmem:[#allocation44_spill] sm:$0xff] }
 0xa4a   : > { %v3761_v25 = vpop.xlane.xlu1 %3760  ;;  %v3800_v47 = vmul.f32 %v8412_v58, %v12028_v34  ;;  %v3799_v16 = vmul.f32 %v8412_v58, %v12029_v7  ;;  %v8081_v49 = vpop.permute.xlu0 %8080  ;;  %v12032_v58 = vld [vmem:[#allocation64_spill] sm:$0xff] }
 0xa4b   : > { %8417 = vrcp.f32 %v3761_v25  ;;  %4840 = vadd.xlane.f32.xlu0 %v4839_v32  ;;  %v8083_v18 = vunpack.i.h.bf16 %v8081_v49  ;;  %v8082_v62 = vunpack.i.l.bf16 %v8081_v49  ;;  %v12033_v32 = vld [vmem:[#allocation45_spill] sm:$0xff]  ;;  %v12034_v49 = vld [vmem:[#allocation68_spill] sm:$0xff] }
 0xa4c   : > { %4008 = vmatprep.mubr.f32.mxu0 %v3800_v47 }
 0xa4d   : > { %v8414_v29 = vpop.eup %8413  ;;  %4009 = vmatmul.mubr.f32.gmra.mrb[98].mxu0 %v3799_v16  ;;  %v7407_v7 = vpack.c.bf16 %v8083_v18, %v8082_v62 }
 0xa4e   : > { %v8076_v19 = vpop.permute.xlu1 %8075  ;;  %v3803_v50 = vmul.f32 %v8414_v29, %v12030_v33  ;;  %v3802_v20 = vmul.f32 %v8414_v29, %v12031_v37 }
 0xa4f   : > { %v8078_v23 = vunpack.i.h.bf16 %v8076_v19  ;;  %v8077_v22 = vunpack.i.l.bf16 %v8076_v19 }
 0xa50   : > { %4013 = vmatprep.mubr.f32.mxu0 %v3803_v50 }
 0xa51   : > { %v8416_v27 = vpop.eup %8415  ;;  %v7405_v34 = vpack.c.bf16 %v8078_v23, %v8077_v22  ;;  %4014 = vmatmul.mubr.f32.gmra.mrb[100].mxu0 %v3802_v20 }
 0xa52   : > { %v3806_v25 = vmul.f32 %v8416_v27, %v12032_v58  ;;  %v3805_v47 = vmul.f32 %v8416_v27, %v12033_v32 }
 0xa53   : > { %7406 = vmatpush3.bf16.msra.mxu1 %v7405_v34 }
 0xa54   : > { %4018 = vmatprep.mubr.f32.mxu0 %v3806_v25  ;;  %7408 = vmatprep.subr.bf16.mxu1 %v7407_v7 }
 0xa55   : > { %v8418_v16 = vpop.eup %8417  ;;  %4019 = vmatmul.mubr.f32.gmra.mrb[102].mxu0 %v3805_v47 }
 0xa56   : > { %v3809_v33 = vmul.f32 %v8418_v16, %v12034_v49  ;;  %v3808_v29 = vmul.f32 %v8418_v16, %v12035_v21 }
 0xa58   : > { %4023 = vmatprep.mubr.f32.mxu0 %v3809_v33 }
 0xa59   : > { %4024 = vmatmul.mubr.f32.gmra.mrb[104].mxu0 %v3808_v29 }
 0xa7b   : > { %v3764_v19 = vpop.xlane.xlu0 %3763 }
 0xa7c   : > { %8419 = vrcp.f32 %v3764_v19 }
 0xa7f   : > { %v3767_v23 = vpop.xlane.xlu0 %3766  ;;  %v3770_v20 = vpop.xlane.xlu1 %3769 }
 0xa80   : > { %8421 = vrcp.f32 %v3767_v23 }
 0xa81   : > { %8423 = vrcp.f32 %v3770_v20 }
 0xa83   : > { %v8086_v22 = vpop.permute.xlu0 %8085  ;;  %v11467_v18 = vpop.xlane.xlu1 %3793 }
 0xa84   : > { %v8088_v27 = vunpack.i.h.bf16 %v8086_v22  ;;  %v8087_v62 = vunpack.i.l.bf16 %v8086_v22 }
 0xa86   : > { %v8420_v50 = vpop.eup %8419  ;;  %v7409_v37 = vpack.c.bf16 %v8088_v27, %v8087_v62  ;;  %v4085_v27 = vld [vmem:[#allocation12 + $0x48] sm:$0xff] }
 0xa87   : > { %v4796_v34 = vpop.xlane.xlu1 %4795  ;;  %v3812_v7 = vmul.f32 %v8420_v50, %v11222_v35  ;;  %v3811_v21 = vmul.f32 %v8420_v50, %v11220_v52 }
 0xa88   : > { %8425 = vrcp.f32 %v4796_v34  ;;  %7410 = vmatpush3.bf16.msra.mxu1 %v7409_v37 }
 0xa89   : > { %4028 = vmatprep.mubr.f32.mxu0 %v3812_v7 }
 0xa8a   : > { %v8422_v58 = vpop.eup %8421  ;;  %4029 = vmatmul.mubr.f32.gmra.mrb[106].mxu0 %v3811_v21 }
 0xa8b   : > { %v8424_v25 = vpop.eup %8423  ;;  %v4799_v32 = vpop.xlane.xlu1 %4798  ;;  %v3815_v47 = vmul.f32 %v8422_v58, %v11227_v43  ;;  %v3814_v16 = vmul.f32 %v8422_v58, %v11224_v44 }
 0xa8c   : > { %8427 = vrcp.f32 %v4799_v32  ;;  %v3818_v49 = vmul.f32 %v8424_v25, %v11234_v28  ;;  %v3817_v52 = vmul.f32 %v8424_v25, %v11230_v41  ;;  %v4084_v41 = vld [vmem:[#allocation12 + $0x40] sm:$0xff] }
 0xa8d   : > { %4033 = vmatprep.mubr.f32.mxu0 %v3815_v47  ;;  %v7323_v50 = vpack.c.bf16 %v4085_v27, %v4084_v41 }
 0xa8e   : > { %4034 = vmatmul.mubr.f32.gmra.mrb[108].mxu0 %v3814_v16 }
 0xa8f   : > { %4038 = vmatprep.mubr.f32.mxu0 %v3818_v49  ;;  %v4802_v35 = vpop.xlane.xlu1 %4801  ;;  %7324 = vmatprep.subr.bf16.mxu0 %v7323_v50 }
 0xa90   : > { %8429 = vrcp.f32 %v4802_v35  ;;  %7326 = vmatpush3.bf16.msra.mxu0 %v7323_v50 }
 0xa92   : > { %v8426_v33 = vpop.eup %8425  ;;  %4039 = vmatmul.mubr.f32.gmra.mrb[110].mxu0 %v3817_v52 }
 0xa93   : > { %v4843_v29 = vmul.f32 %v8426_v33, %v11248_v5  ;;  %v4805_v19 = vpop.xlane.xlu1 %4804  ;;  %v4844_v23 = vmul.f32 %v8426_v33, %v11252_v39 }
 0xa94   : > { %8431 = vrcp.f32 %v4805_v19 }
 0xa95   : > { %5050 = vmatprep.mubr.f32.mxu1 %v4844_v23 }
 0xa96   : > { %v8428_v44 = vpop.eup %8427  ;;  %5051 = vmatmul.mubr.f32.vlgmr.msra.gmra.mrb[128].mxu1 %v4843_v29 }
 0xa97   : > { %v4808_v43 = vpop.xlane.xlu1 %4807  ;;  %v4847_v28 = vmul.f32 %v8428_v44, %v11260_v14  ;;  %v4846_v20 = vmul.f32 %v8428_v44, %v11256_v3  ;;  %v4086_v14 = vld [vmem:[#allocation12 + $0x50] sm:$0xff]  ;;  %v4087_v3 = vld [vmem:[#allocation12 + $0x58] sm:$0xff] }
 0xa98   : > { %8433 = vrcp.f32 %v4808_v43  ;;  %v7327_v58 = vpack.c.bf16 %v4087_v3, %v4086_v14 }
 0xa99   : > { %5055 = vmatprep.mubr.f32.mxu1 %v4847_v28 }
 0xa9a   : > { %v8430_v22 = vpop.eup %8429  ;;  %5056 = vmatmul.mubr.f32.gmra.mrb[130].mxu1 %v4846_v20  ;;  %7328 = vmatprep.subr.bf16.mxu0 %v7327_v58 }
 0xa9b   : > { %v4811_v62 = vpop.xlane.xlu1 %4810  ;;  %v4850_v5 = vmul.f32 %v8430_v22, %v11268_v2  ;;  %v4849_v39 = vmul.f32 %v8430_v22, %v11264_v46  ;;  %7330 = vmatpush3.bf16.msra.mxu0 %v7327_v58 }
 0xa9c   : > { %8435 = vrcp.f32 %v4811_v62 }
 0xa9d   : > { %5060 = vmatprep.mubr.f32.mxu1 %v4850_v5 }
 0xa9e   : > { %v8432_v37 = vpop.eup %8431  ;;  %5061 = vmatmul.mubr.f32.gmra.mrb[132].mxu1 %v4849_v39 }
 0xa9f   : > { %v4814_v34 = vpop.xlane.xlu1 %4813  ;;  %v4853_v7 = vmul.f32 %v8432_v37, %v11276_v54  ;;  %v4852_v21 = vmul.f32 %v8432_v37, %v11272_v53 }
 0xaa0   : > { %8437 = vrcp.f32 %v4814_v34 }
 0xaa1   : > { %5065 = vmatprep.mubr.f32.mxu1 %v4853_v7 }
 0xaa2   : > { %v8434_v2 = vpop.eup %8433  ;;  %5066 = vmatmul.mubr.f32.gmra.mrb[134].mxu1 %v4852_v21 }
 0xaa3   : > { %v4817_v46 = vpop.xlane.xlu1 %4816  ;;  %v4856_v25 = vmul.f32 %v8434_v2, %v11284_v15  ;;  %v4855_v32 = vmul.f32 %v8434_v2, %v11280_v1 }
 0xaa4   : > { %8439 = vrcp.f32 %v4817_v46 }
 0xaa5   : > { %5070 = vmatprep.mubr.f32.mxu1 %v4856_v25 }
 0xaa6   : > { %v8436_v47 = vpop.eup %8435  ;;  %5071 = vmatmul.mubr.f32.gmra.mrb[136].mxu1 %v4855_v32 }
 0xaa7   : > { %v4820_v16 = vpop.xlane.xlu1 %4819  ;;  %v4859_v54 = vmul.f32 %v8436_v47, %v11293_v48  ;;  %v4858_v53 = vmul.f32 %v8436_v47, %v11288_v42 }
 0xaa8   : > { %8441 = vrcp.f32 %v4820_v16  ;;  %v12037_v16 = vld [vmem:[#allocation46_spill] sm:$0xff] }
 0xaa9   : > { %5075 = vmatprep.mubr.f32.mxu1 %v4859_v54 }
 0xaaa   : > { %v8438_v49 = vpop.eup %8437  ;;  %5076 = vmatmul.mubr.f32.gmra.mrb[138].mxu1 %v4858_v53 }
 0xaab   : > { %v4823_v35 = vpop.xlane.xlu1 %4822  ;;  %v4862_v52 = vmul.f32 %v8438_v49, %v11301_v13  ;;  %v4861_v15 = vmul.f32 %v8438_v49, %v11297_v60  ;;  %v12039_v49 = vld [vmem:[#allocation33_spill] sm:$0xff] }
 0xaac   : > { %8443 = vrcp.f32 %v4823_v35 }
 0xaad   : > { %5080 = vmatprep.mubr.f32.mxu1 %v4862_v52 }
 0xaae   : > { %v8440_v1 = vpop.eup %8439  ;;  %5081 = vmatmul.mubr.f32.gmra.mrb[140].mxu1 %v4861_v15 }
 0xaaf   : > { %v4826_v33 = vpop.xlane.xlu1 %4825  ;;  %v4865_v29 = vmul.f32 %v8440_v1, %v11311_v59  ;;  %v4864_v48 = vmul.f32 %v8440_v1, %v11307_v0 }
 0xab0   : > { %8445 = vrcp.f32 %v4826_v33  ;;  %v12042_v33 = vld [vmem:[#allocation47_spill] sm:$0xff] }
 0xab1   : > { %5085 = vmatprep.mubr.f32.mxu1 %v4865_v29 }
 0xab2   : > { %v8442_v42 = vpop.eup %8441  ;;  %5086 = vmatmul.mubr.f32.gmra.mrb[142].mxu1 %v4864_v48 }
 0xab3   : > { %v4868_v19 = vmul.f32 %v8442_v42, %v11325_v9  ;;  %v4867_v23 = vmul.f32 %v8442_v42, %v11318_v12  ;;  %v4832_v37 = vpop.xlane.xlu1 %4831  ;;  %v12043_v42 = vld [vmem:[#allocation34_spill] sm:$0xff] }
 0xab4   : > { %v3773_v13 = vpop.xlane.xlu0 %3772 }
 0xab5   : > { %8447 = vrcp.f32 %v3773_v13  ;;  %5090 = vmatprep.mubr.f32.mxu1 %v4868_v19 }
 0xab6   : > { %v8444_v60 = vpop.eup %8443  ;;  %5091 = vmatmul.mubr.f32.gmra.mrb[144].mxu1 %v4867_v23  ;;  %v12044_v23 = vld [vmem:[#allocation38_spill] sm:$0xff] }
 0xab7   : > { %v4871_v44 = vmul.f32 %v8444_v60, %v11337_v10  ;;  %v4870_v43 = vmul.f32 %v8444_v60, %v11330_v63  ;;  %v4838_v21 = vpop.xlane.xlu1 %4837  ;;  %v12045_v60 = vld [vmem:[#allocation37_spill] sm:$0xff] }
 0xab8   : > { %v3776_v59 = vpop.xlane.xlu0 %3775 }
 0xab9   : > { %8449 = vrcp.f32 %v3776_v59  ;;  %5095 = vmatprep.mubr.f32.mxu1 %v4871_v44  ;;  %v5132_v59 = vld [vmem:[#allocation12 + $0x68] sm:$0xff] }
 0xaba   : > { %v8446_v0 = vpop.eup %8445  ;;  %5096 = vmatmul.mubr.f32.gmra.mrb[146].mxu1 %v4870_v43  ;;  %v5131_v43 = vld [vmem:[#allocation12 + $0x60] sm:$0xff] }
 0xabb   : > { %v4874_v28 = vmul.f32 %v8446_v0, %v11349_v38  ;;  %v4873_v9 = vmul.f32 %v8446_v0, %v11342_v31  ;;  %v7411_v0 = vpack.c.bf16 %v5132_v59, %v5131_v43 }
 0xabc   : > { %v3779_v20 = vpop.xlane.xlu0 %3778 }
 0xabd   : > { %8451 = vrcp.f32 %v3779_v20  ;;  %5100 = vmatprep.mubr.f32.mxu1 %v4874_v28  ;;  %7412 = vmatprep.subr.bf16.mxu0 %v7411_v0 }
 0xabe   : > { %5101 = vmatmul.mubr.f32.gmra.mrb[148].mxu1 %v4873_v9 }
 0xabf   : > { %v8448_v12 = vpop.eup %8447 }
 0xac0   : > { %v3782_v22 = vpop.xlane.xlu0 %3781  ;;  %v3821_v41 = vmul.f32 %v8448_v12, %v11365_v4  ;;  %v3820_v10 = vmul.f32 %v8448_v12, %v11351_v45 }
 0xac1   : > { %8453 = vrcp.f32 %v3782_v22 }
 0xac2   : > { %4043 = vmatprep.mubr.f32.mxu0 %v3821_v41 }
 0xac3   : > { %v8450_v63 = vpop.eup %8449  ;;  %4044 = vmatmul.mubr.f32.gmra.mrb[112].mxu0 %v3820_v10 }
 0xac4   : > { %v3785_v27 = vpop.xlane.xlu0 %3784  ;;  %v3824_v62 = vmul.f32 %v8450_v63, %v11383_v6  ;;  %v3823_v38 = vmul.f32 %v8450_v63, %v11367_v11 }
 0xac5   : > { %8455 = vrcp.f32 %v3785_v27 }
 0xac6   : > { %4048 = vmatprep.mubr.f32.mxu0 %v3824_v62 }
 0xac7   : > { %v8452_v31 = vpop.eup %8451  ;;  %4049 = vmatmul.mubr.f32.gmra.mrb[114].mxu0 %v3823_v38  ;;  %v5133_v38 = vld [vmem:[#allocation12 + $0x70] sm:$0xff] }
 0xac8   : > { %v3788_v5 = vpop.xlane.xlu0 %3787  ;;  %v3827_v39 = vmul.f32 %v8452_v31, %v11397_v36  ;;  %v3826_v4 = vmul.f32 %v8452_v31, %v11393_v30  ;;  %v5134_v31 = vld [vmem:[#allocation12 + $0x78] sm:$0xff] }
 0xac9   : > { %8457 = vrcp.f32 %v3788_v5 }
 0xaca   : > { %4053 = vmatprep.mubr.f32.mxu0 %v3827_v39  ;;  %8459 = vrcp.f32 %v11467_v18  ;;  %v7415_v39 = vpack.c.bf16 %v5134_v31, %v5133_v38 }
 0xacb   : > { %v8454_v45 = vpop.eup %8453  ;;  %4054 = vmatmul.mubr.f32.gmra.mrb[116].mxu0 %v3826_v4 }
 0xacc   : > { %v3791_v50 = vpop.xlane.xlu0 %3790  ;;  %v3830_v6 = vmul.f32 %v8454_v45, %v11413_v17  ;;  %v3829_v11 = vmul.f32 %v8454_v45, %v11409_v57 }
 0xacd   : > { %8461 = vrcp.f32 %v3791_v50 }
 0xace   : > { %4058 = vmatprep.mubr.f32.mxu0 %v3830_v6  ;;  %8463 = vrcp.f32 %v4832_v37 }
 0xacf   : > { %v8456_v14 = vpop.eup %8455  ;;  %4059 = vmatmul.mubr.f32.gmra.mrb[118].mxu0 %v3829_v11 }
 0xad0   : > { %v4829_v36 = vpop.xlane.xlu0 %4828  ;;  %v3833_v30 = vmul.f32 %v8456_v14, %v11421_v26  ;;  %v3832_v3 = vmul.f32 %v8456_v14, %v11417_v55 }
 0xad1   : > { %8465 = vrcp.f32 %v4829_v36 }
 0xad2   : > { %4063 = vmatprep.mubr.f32.mxu0 %v3833_v30 }
 0xad3   : > { %v8458_v34 = vpop.eup %8457  ;;  %4064 = vmatmul.mubr.f32.gmra.mrb[120].mxu0 %v3832_v3 }
 0xad4   : > { %v4835_v18 = vpop.xlane.xlu0 %4834  ;;  %v3836_v17 = vmul.f32 %v8458_v34, %v11429_v24  ;;  %v3835_v57 = vmul.f32 %v8458_v34, %v11425_v8  ;;  %v8460_v7 = vpop.eup %8459  ;;  %v12036_v24 = vld [vmem:[#allocation35_spill] sm:$0xff] }
 0xad5   : > { %8467 = vrcp.f32 %v4835_v18  ;;  %v3842_v25 = vmul.f32 %v8460_v7, %v11244_v56  ;;  %v3841_v54 = vmul.f32 %v8460_v7, %v12037_v16  ;;  %v12040_v56 = vld [vmem:[#allocation48_spill] sm:$0xff] }
 0xad6   : > { %4068 = vmatprep.mubr.f32.mxu0 %v3836_v17  ;;  %8469 = vrcp.f32 %v4838_v21 }
 0xad7   : > { %v8462_v58 = vpop.eup %8461  ;;  %4069 = vmatmul.mubr.f32.gmra.mrb[122].mxu0 %v3835_v57 }
 0xad8   : > { %v3839_v2 = vmul.f32 %v8462_v58, %v11435_v51  ;;  %v3838_v26 = vmul.f32 %v8462_v58, %v11431_v61  ;;  %v8464_v55 = vpop.eup %8463  ;;  %v4841_v46 = vpop.xlane.xlu0 %4840  ;;  %v12038_v51 = vld [vmem:[#allocation49_spill] sm:$0xff] }
 0xad9   : > { %8471 = vrcp.f32 %v4841_v46  ;;  %v4880_v53 = vmul.f32 %v8464_v55, %v12038_v51  ;;  %v4879_v35 = vmul.f32 %v8464_v55, %v12039_v49 }
 0xada   : > { %4073 = vmatprep.mubr.f32.mxu0 %v3839_v2 }
 0xadb   : > { %v8466_v32 = vpop.eup %8465  ;;  %4074 = vmatmul.mubr.f32.gmra.mrb[124].mxu0 %v3838_v26 }
 0xadc   : > { %4078 = vmatprep.mubr.f32.mxu0 %v3842_v25  ;;  %v4877_v8 = vmul.f32 %v8466_v32, %v11441_v40  ;;  %v4876_v47 = vmul.f32 %v8466_v32, %v12036_v24  ;;  %v12041_v40 = vld [vmem:[#allocation36_spill] sm:$0xff] }
 0xade   : > { %5105 = vmatprep.mubr.f32.mxu1 %v4877_v8 }
 0xadf   : > { %v8468_v61 = vpop.eup %8467  ;;  %4079 = vmatmul.mubr.f32.gmra.mrb[126].mxu0 %v3841_v54  ;;  %5106 = vmatmul.mubr.f32.gmra.mrb[150].mxu1 %v4876_v47 }
 0xae0   : > { %5110 = vmatprep.mubr.f32.mxu1 %v4880_v53  ;;  %v4883_v52 = vmul.f32 %v8468_v61, %v12040_v56  ;;  %v8470_v15 = vpop.eup %8469  ;;  %v4882_v1 = vmul.f32 %v8468_v61, %v12041_v40 }
 0xae1   : > { %v4886_v29 = vmul.f32 %v8470_v15, %v12042_v33  ;;  %v4885_v19 = vmul.f32 %v8470_v15, %v12043_v42 }
 0xae3   : > { %5111 = vmatmul.mubr.f32.gmra.mrb[152].mxu1 %v4879_v35  ;;  %v8472_v48 = vpop.eup %8471 }
 0xae4   : > { %5115 = vmatprep.mubr.f32.mxu1 %v4883_v52  ;;  %v4889_v13 = vmul.f32 %v8472_v48, %v12044_v23  ;;  %v4888_v44 = vmul.f32 %v8472_v48, %v12045_v60 }
 0xae7   : > { %5116 = vmatmul.mubr.f32.gmra.mrb[154].mxu1 %v4882_v1 }
 0xae8   : > { %5120 = vmatprep.mubr.f32.mxu1 %v4886_v29 }
 0xaeb   : > { %5121 = vmatmul.mubr.f32.gmra.mrb[156].mxu1 %v4885_v19 }
 0xaec   : > { %5125 = vmatprep.mubr.f32.mxu1 %v4889_v13 }
 0xaef   : > { %5126 = vmatmul.mubr.f32.gmra.mrb[158].mxu1 %v4888_v44 }
 0xb1c   : > { %v6395_v28 = vpop.f32.mrb[96].mxu0 }
 0xb1d   : > { %v6396_v9 = vpop.f32.mrb[97].mxu0 }
 0xb1e   : > { %v6397_v20 = vadd.f32 %v6396_v9, %v6395_v28 }
 0xb20   : > { %v6398_v12 = vpop.f32.mrb[98].mxu0  ;;  %6915 = vmatprep.mubr.msk.f32.mxu0 %vm1299_vm0, %v6397_v20 }
 0xb21   : > { %v6399_v22 = vpop.f32.mrb[99].mxu0 }
 0xb22   : > { %v6400_v41 = vadd.f32 %v6399_v22, %v6398_v12 }
 0xb24   : > { %v6401_v10 = vpop.f32.mrb[100].mxu0  ;;  %6916 = vmatmul.mubr.msk.f32.vlgmr.msra.gmra.mrb[80].mxu0 %vm1299_vm0, %v6400_v41 }
 0xb25   : > { %v6402_v63 = vpop.f32.mrb[101].mxu0  ;;  %7414 = vmatpush3.bf16.msra.mxu0 %v7411_v0 }
 0xb26   : > { %v6403_v27 = vadd.f32 %v6402_v63, %v6401_v10  ;;  %7416 = vmatprep.subr.bf16.mxu0 %v7415_v39 }
 0xb28   : > { %v6404_v62 = vpop.f32.mrb[102].mxu0  ;;  %6918 = vmatprep.mubr.msk.f32.mxu0 %vm1299_vm0, %v6403_v27 }
 0xb29   : > { %v6405_v5 = vpop.f32.mrb[103].mxu0  ;;  %7418 = vmatpush3.bf16.msra.mxu0 %v7415_v39 }
 0xb2a   : > { %v6406_v4 = vadd.f32 %v6405_v5, %v6404_v62 }
 0xb2c   : > { %v6407_v45 = vpop.f32.mrb[104].mxu0  ;;  %6919 = vmatmul.mubr.msk.f32.gmra.mrb[82].mxu0 %vm1299_vm0, %v6406_v4 }
 0xb2d   : > { %v6408_v50 = vpop.f32.mrb[105].mxu0 }
 0xb2e   : > { %v6409_v6 = vadd.f32 %v6408_v50, %v6407_v45 }
 0xb30   : > { %6921 = vmatprep.mubr.msk.f32.mxu0 %vm1299_vm0, %v6409_v6 }
 0xb5d   : > { %v6410_v11 = vpop.f32.mrb[106].mxu0 }
 0xb5e   : > { %v6411_v37 = vpop.f32.mrb[107].mxu0 }
 0xb5f   : > { %v6412_v14 = vadd.f32 %v6411_v37, %v6410_v11 }
 0xb61   : > { %v6413_v36 = vpop.f32.mrb[108].mxu0  ;;  %6922 = vmatmul.mubr.msk.f32.gmra.mrb[84].mxu0 %vm1299_vm0, %v6412_v14 }
 0xb62   : > { %v6414_v30 = vpop.f32.mrb[109].mxu0 }
 0xb63   : > { %v6415_v3 = vadd.f32 %v6414_v30, %v6413_v36 }
 0xb65   : > { %v6416_v34 = vpop.f32.mrb[110].mxu0  ;;  %6924 = vmatprep.mubr.msk.f32.mxu0 %vm1299_vm0, %v6415_v3 }
 0xb66   : > { %v6417_v18 = vpop.f32.mrb[111].mxu0 }
 0xb67   : > { %v6418_v17 = vadd.f32 %v6417_v18, %v6416_v34 }
 0xb69   : > { %6925 = vmatmul.mubr.msk.f32.gmra.mrb[86].mxu0 %vm1299_vm0, %v6418_v17  ;;  %v6559_v57 = vpop.f32.mrb[128].mxu1 }
 0xb6a   : > { %v6560_v7 = vpop.f32.mrb[129].mxu1 }
 0xb6b   : > { %v11532_v21 = vadd.f32 %v6560_v7, %v6559_v57 }
 0xb6d   : > { %v6562_v58 = vpop.f32.mrb[130].mxu1 }
 0xb6e   : > { %v6563_v2 = vpop.f32.mrb[131].mxu1 }
 0xb6f   : > { %v11534_v26 = vadd.f32 %v6563_v2, %v6562_v58 }
 0xb71   : > { %v6565_v55 = vpop.f32.mrb[132].mxu1 }
 0xb72   : > { %v6566_v46 = vpop.f32.mrb[133].mxu1 }
 0xb73   : > { %v11536_v25 = vadd.f32 %v6566_v46, %v6565_v55 }
 0xb75   : > { %v6568_v32 = vpop.f32.mrb[134].mxu1 }
 0xb76   : > { %v6569_v8 = vpop.f32.mrb[135].mxu1 }
 0xb77   : > { %v11538_v24 = vadd.f32 %v6569_v8, %v6568_v32 }
 0xb79   : > { %v6571_v47 = vpop.f32.mrb[136].mxu1 }
 0xb7a   : > { %v6572_v16 = vpop.f32.mrb[137].mxu1 }
 0xb7b   : > { %v11540_v54 = vadd.f32 %v6572_v16, %v6571_v47 }
 0xb7d   : > { %v6574_v51 = vpop.f32.mrb[138].mxu1 }
 0xb7e   : > { %v6575_v53 = vpop.f32.mrb[139].mxu1 }
 0xb7f   : > { %v11542_v61 = vadd.f32 %v6575_v53, %v6574_v51 }
 0xb81   : > { %v6577_v49 = vpop.f32.mrb[140].mxu1 }
 0xb82   : > { %v6578_v35 = vpop.f32.mrb[141].mxu1 }
 0xb83   : > { %v11544_v56 = vadd.f32 %v6578_v35, %v6577_v49 }
 0xb85   : > { %v6580_v52 = vpop.f32.mrb[142].mxu1 }
 0xb86   : > { %v6581_v15 = vpop.f32.mrb[143].mxu1 }
 0xb87   : > { %v11546_v40 = vadd.f32 %v6581_v15, %v6580_v52 }
 0xb89   : > { %v6583_v1 = vpop.f32.mrb[144].mxu1 }
 0xb8a   : > { %v6584_v33 = vpop.f32.mrb[145].mxu1 }
 0xb8b   : > { %v6585_v29 = vadd.f32 %v6584_v33, %v6583_v1 }
 0xb8d   : > { %v6586_v48 = vpop.f32.mrb[146].mxu1 }
 0xb8e   : > { %v6587_v42 = vpop.f32.mrb[147].mxu1 }
 0xb8f   : > { %v6588_v19 = vadd.f32 %v6587_v42, %v6586_v48 }
 0xb91   : > { %v6589_v23 = vpop.f32.mrb[148].mxu1 }
 0xb92   : > { %v6590_v13 = vpop.f32.mrb[149].mxu1 }
 0xb93   : > { %v6591_v60 = vadd.f32 %v6590_v13, %v6589_v23 }
 0xb96   : > { %v6419_v44 = vpop.f32.mrb[112].mxu0 }
 0xb97   : > { %v6420_v43 = vpop.f32.mrb[113].mxu0 }
 0xb98   : > { %v6421_v59 = vadd.f32 %v6420_v43, %v6419_v44 }
 0xb9a   : > { %v6422_v0 = vpop.f32.mrb[114].mxu0  ;;  %6927 = vmatprep.mubr.msk.f32.mxu0 %vm1299_vm0, %v6421_v59 }
 0xb9b   : > { %v6423_v28 = vpop.f32.mrb[115].mxu0 }
 0xb9c   : > { %v6424_v9 = vadd.f32 %v6423_v28, %v6422_v0 }
 0xb9e   : > { %v6425_v20 = vpop.f32.mrb[116].mxu0  ;;  %6928 = vmatmul.mubr.msk.f32.gmra.mrb[88].mxu0 %vm1299_vm0, %v6424_v9 }
 0xb9f   : > { %v6426_v12 = vpop.f32.mrb[117].mxu0 }
 0xba0   : > { %v6427_v22 = vadd.f32 %v6426_v12, %v6425_v20 }
 0xba2   : > { %v6428_v41 = vpop.f32.mrb[118].mxu0  ;;  %6930 = vmatprep.mubr.msk.f32.mxu0 %vm1299_vm0, %v6427_v22 }
 0xba3   : > { %v6429_v10 = vpop.f32.mrb[119].mxu0 }
 0xba4   : > { %v6430_v63 = vadd.f32 %v6429_v10, %v6428_v41 }
 0xba6   : > { %v6431_v27 = vpop.f32.mrb[120].mxu0  ;;  %6931 = vmatmul.mubr.msk.f32.gmra.mrb[90].mxu0 %vm1299_vm0, %v6430_v63 }
 0xba7   : > { %v6432_v62 = vpop.f32.mrb[121].mxu0 }
 0xba8   : > { %v6433_v38 = vadd.f32 %v6432_v62, %v6431_v27 }
 0xbaa   : > { %v6434_v31 = vpop.f32.mrb[122].mxu0  ;;  %6933 = vmatprep.mubr.msk.f32.mxu0 %vm1299_vm0, %v6433_v38 }
 0xbab   : > { %v6435_v5 = vpop.f32.mrb[123].mxu0 }
 0xbac   : > { %v6436_v39 = vadd.f32 %v6435_v5, %v6434_v31 }
 0xbae   : > { %v6437_v4 = vpop.f32.mrb[124].mxu0  ;;  %6934 = vmatmul.mubr.msk.f32.gmra.mrb[92].mxu0 %vm1299_vm0, %v6436_v39 }
 0xbaf   : > { %v6438_v45 = vpop.f32.mrb[125].mxu0 }
 0xbb0   : > { %v6439_v50 = vadd.f32 %v6438_v45, %v6437_v4 }
 0xbb2   : > { %v6440_v6 = vpop.f32.mrb[126].mxu0  ;;  %6936 = vmatprep.mubr.msk.f32.mxu0 %vm1299_vm0, %v6439_v50  ;;  %v6592_v11 = vpop.f32.mrb[150].mxu1 }
 0xbb3   : > { %v6441_v37 = vpop.f32.mrb[127].mxu0  ;;  %v6593_v14 = vpop.f32.mrb[151].mxu1 }
 0xbb4   : > { %v6442_v36 = vadd.f32 %v6441_v37, %v6440_v6  ;;  %v6594_v30 = vadd.f32 %v6593_v14, %v6592_v11 }
 0xbb6   : > { %6937 = vmatmul.mubr.msk.f32.gmra.mrb[94].mxu0 %vm1299_vm0, %v6442_v36  ;;  %v6595_v3 = vpop.f32.mrb[152].mxu1 }
 0xbb7   : > { %v6596_v34 = vpop.f32.mrb[153].mxu1  ;;  %6947 = vmatprep.mubr.msk.f32.mxu0 %vm1299_vm0, %v11532_v21 }
 0xbb8   : > { %v6597_v18 = vadd.f32 %v6596_v34, %v6595_v3 }
 0xbba   : > { %v6598_v17 = vpop.f32.mrb[154].mxu1  ;;  %6948 = vmatmul.mubr.msk.f32.vlgmr.msra.gmra.mrb[80].mxu0 %vm1299_vm0, %v11534_v26 }
 0xbbb   : > { %v6599_v57 = vpop.f32.mrb[155].mxu1  ;;  %6950 = vmatprep.mubr.msk.f32.mxu0 %vm1299_vm0, %v11536_v25  ;;  %v5834_v25 = vld [vmem:[%s12046_s1] ss:$0 sm:$0xff] }
 0xbbc   : > { %v6600_v7 = vadd.f32 %v6599_v57, %v6598_v17 }
 0xbbe   : > { %v6601_v58 = vpop.f32.mrb[156].mxu1  ;;  %6951 = vmatmul.mubr.msk.f32.gmra.mrb[82].mxu0 %vm1299_vm0, %v11538_v24 }
 0xbbf   : > { %v6602_v2 = vpop.f32.mrb[157].mxu1  ;;  %6953 = vmatprep.mubr.msk.f32.mxu0 %vm1299_vm0, %v11540_v54 }
 0xbc0   : > { %v6603_v55 = vadd.f32 %v6602_v2, %v6601_v58 }
 0xbc2   : > { %v6604_v21 = vpop.f32.mrb[158].mxu1  ;;  %6954 = vmatmul.mubr.msk.f32.gmra.mrb[84].mxu0 %vm1299_vm0, %v11542_v61 }
 0xbc3   : > { %v6605_v46 = vpop.f32.mrb[159].mxu1  ;;  %6956 = vmatprep.mubr.msk.f32.mxu0 %vm1299_vm0, %v11544_v56 }
 0xbc4   : > { %v6606_v26 = vadd.f32 %v6605_v46, %v6604_v21 }
 0xbc6   : > { %6957 = vmatmul.mubr.msk.f32.gmra.mrb[86].mxu0 %vm1299_vm0, %v11546_v40 }
 0xbc7   : > { %6959 = vmatprep.mubr.msk.f32.mxu0 %vm1299_vm0, %v6585_v29 }
 0xbca   : > { %6960 = vmatmul.mubr.msk.f32.gmra.mrb[88].mxu0 %vm1299_vm0, %v6588_v19 }
 0xbcb   : > { %6962 = vmatprep.mubr.msk.f32.mxu0 %vm1299_vm0, %v6591_v60 }
 0xbce   : > { %6963 = vmatmul.mubr.msk.f32.gmra.mrb[90].mxu0 %vm1299_vm0, %v6594_v30 }
 0xbcf   : > { %6965 = vmatprep.mubr.msk.f32.mxu0 %vm1299_vm0, %v6597_v18 }
 0xbd2   : > { %6966 = vmatmul.mubr.msk.f32.gmra.mrb[92].mxu0 %vm1299_vm0, %v6600_v7 }
 0xbd3   : > { %6968 = vmatprep.mubr.msk.f32.mxu0 %vm1299_vm0, %v6603_v55 }
 0xbd6   : > { %6969 = vmatmul.mubr.msk.f32.gmra.mrb[94].mxu0 %vm1299_vm0, %v6606_v26 }
 0xc8d   : > { %v6949_v32 = vpop.f32.mrb[80].mxu0 }
 0xc8e   : > { %v5352_v8 = vadd.f32 %v6949_v32, %v5834_v25  ;;  %v5249_v24 = vpop.f32.mrb[81].mxu0 }
 0xc8f   : > { %v5351_v47 = vadd.f32 %v5834_v25, %v5249_v24 }
 0xc90   : > { %5368 = vst [vmem:[%s9257_s14 + $0x8] sm:$0xff] %v5352_v8 }
 0xc91   : > { %5367 = vst [vmem:[%s9257_s14] sm:$0xff] %v5351_v47  ;;  %v6952_v16 = vpop.f32.mrb[82].mxu0 }
 0xc92   : > { %v5354_v54 = vadd.f32 %v6952_v16, %v5834_v25  ;;  %v5259_v51 = vpop.f32.mrb[83].mxu0 }
 0xc93   : > { %v5353_v53 = vadd.f32 %v5834_v25, %v5259_v51 }
 0xc94   : > { %5370 = vst [vmem:[%s9257_s14 + $0x18] sm:$0xff] %v5354_v54 }
 0xc95   : > { %5369 = vst [vmem:[%s9257_s14 + $0x10] sm:$0xff] %v5353_v53  ;;  %v6955_v61 = vpop.f32.mrb[84].mxu0 }
 0xc96   : > { %v5356_v49 = vadd.f32 %v6955_v61, %v5834_v25  ;;  %v5269_v35 = vpop.f32.mrb[85].mxu0 }
 0xc97   : > { %v5355_v56 = vadd.f32 %v5834_v25, %v5269_v35 }
 0xc98   : > { %5372 = vst [vmem:[%s9257_s14 + $0x28] sm:$0xff] %v5356_v49 }
 0xc99   : > { %5371 = vst [vmem:[%s9257_s14 + $0x20] sm:$0xff] %v5355_v56  ;;  %v6958_v52 = vpop.f32.mrb[86].mxu0 }
 0xc9a   : > { %v5358_v15 = vadd.f32 %v6958_v52, %v5834_v25  ;;  %v5279_v40 = vpop.f32.mrb[87].mxu0 }
 0xc9b   : > { %v5357_v1 = vadd.f32 %v5834_v25, %v5279_v40 }
 0xc9c   : > { %5374 = vst [vmem:[%s9257_s14 + $0x38] sm:$0xff] %v5358_v15 }
 0xc9d   : > { %5373 = vst [vmem:[%s9257_s14 + $0x30] sm:$0xff] %v5357_v1  ;;  %v6961_v33 = vpop.f32.mrb[88].mxu0 }
 0xc9e   : > { %v5360_v29 = vadd.f32 %v6961_v33, %v5834_v25  ;;  %v5289_v48 = vpop.f32.mrb[89].mxu0 }
 0xc9f   : > { %v5359_v42 = vadd.f32 %v5834_v25, %v5289_v48 }
 0xca0   : > { %5376 = vst [vmem:[%s9257_s14 + $0x48] sm:$0xff] %v5360_v29 }
 0xca1   : > { %5375 = vst [vmem:[%s9257_s14 + $0x40] sm:$0xff] %v5359_v42  ;;  %v6964_v19 = vpop.f32.mrb[90].mxu0 }
 0xca2   : > { %v5362_v23 = vadd.f32 %v6964_v19, %v5834_v25  ;;  %v5299_v13 = vpop.f32.mrb[91].mxu0 }
 0xca3   : > { %v5361_v60 = vadd.f32 %v5834_v25, %v5299_v13 }
 0xca4   : > { %5378 = vst [vmem:[%s9257_s14 + $0x58] sm:$0xff] %v5362_v23 }
 0xca5   : > { %5377 = vst [vmem:[%s9257_s14 + $0x50] sm:$0xff] %v5361_v60  ;;  %v6967_v44 = vpop.f32.mrb[92].mxu0 }
 0xca6   : > { %v5364_v43 = vadd.f32 %v6967_v44, %v5834_v25  ;;  %v5309_v59 = vpop.f32.mrb[93].mxu0 }
 0xca7   : > { %v5363_v0 = vadd.f32 %v5834_v25, %v5309_v59 }
 0xca8   : > { %5380 = vst [vmem:[%s9257_s14 + $0x68] sm:$0xff] %v5364_v43 }
 0xca9   : > { %5379 = vst [vmem:[%s9257_s14 + $0x60] sm:$0xff] %v5363_v0  ;;  %v6970_v28 = vpop.f32.mrb[94].mxu0 }
 0xcaa   : > { %v5366_v9 = vadd.f32 %v6970_v28, %v5834_v25  ;;  %v5319_v20 = vpop.f32.mrb[95].mxu0 }
 0xcab   : > { %v5365_v12 = vadd.f32 %v5834_v25, %v5319_v20 }
 0xcac   : > { %5382 = vst [vmem:[%s9257_s14 + $0x78] sm:$0xff] %v5366_v9 }
 0xcad   : > { %5381 = vst [vmem:[%s9257_s14 + $0x70] sm:$0xff] %v5365_v12 }
 0xcae   : > { %8734 = shalt.err (!%p8731_p10)
}
 0xcaf   : > { %s8735_s14 = scalar_lea.hbm %s11603_s30, 2048  ;;  %s8739_s8 = scalar_lea.hbm %s12051_s7, 8192 }
 0xcb0   : > { %p8736_p13 = scmp.ne.s32.totalorder %s11603_s30, %s8735_s14  ;;  %p8740_p2 = scmp.lt.u32.totalorder %s11603_s30, %s12051_s7 }
 0xcb1   : > { %p8741_p8 = scmp.lt.u32.totalorder %s8739_s8, %s8735_s14  ;;  %p8743_p9 = scmp.lt.u32.totalorder %s8735_s14, %s11603_s30 }
 0xcb2   : > { %p8737_p7 = pnand %p8736_p13, %p12052_p1 }
 0xcb3   : > { %p8742_p0 = por %p8741_p8, %p8740_p2 }
 0xcb4   : > { %p8738_p6 = pneg %p8737_p7 }
 0xcb5   : > { %p8744_p11 = por %p8743_p9, %p8742_p0 }
 0xcb7   : > { %p8745_p3 = pnand %p8744_p11, %p8738_p6 }
 0xcb9   : > { %8748 = shalt.err (!%p8745_p3)
}
 0xcba   : > { %s8866_s20 = smov 128   ;;  %s8867_s27 = smov 8  }
 0xcbb   : > { %7481 = dma.vmem_to_hbm [thread:$0]  (%p12052_p1), %s11605_s22, 2048, %s11603_s30, %s5384_s23, %s8866_s20, %s8866_s20, %s8867_s27  }
 0xcbc PF: > { %s12053_s13 = sld [smem:[#allocation19_spill]]  ;;  %s12054_s19 = sld [smem:[#allocation25_spill]] }
 0xcbd   : > { %p7509_p5 = scmp.ge.s32.totalorder %s8851_s11, 2 }
 0xcc2   : > { %s5414_s24 = sand.u32 1, %s12053_s13   ;;  %p12055_p4 = scmp.ne.s32.totalorder %s12054_s19, 0 }
 0xcc3   : > { %s5415_s16 = scalar_lea.sflag [#allocation6], %s5414_s24 }
 0xcc4   : > { %p7501_p12 = pnand %p7509_p5, %p12055_p4 }
 0xcc6   : > { %8806 = dma.done.wait (!%p7501_p12), %s5415_s16, 2048  }
 0xcc7   : > { %8808 = vsyncadd (!%p7501_p12), %s5415_s16, 4294965248  ;;  %s27_s11 = sadd.s32 1, %s8851_s11   ;;  %s12056_s24 = sld [smem:[#allocation18_spill]] }
 0xcc8   : > { %p24_p10 = scmp.ge.s32.totalorder %s27_s11, 6   ;;  %s12057_s30 = sld [smem:[#allocation22_spill]] }
 0xcc9   : > { %s12058_s9 = sld [smem:[#allocation28_spill]]  ;;  %s12059_s25 = smov %s8819_s26 }
 0xcca   : > { %s12060_s26 = smov %s9150_s6  ;;  %s12061_s27 = smov %s8827_s28 }
 0xccb   : > { %s12062_s28 = smov %s8831_s29  ;;  %s12063_s29 = smov %s9153_s5 }
 0xccc   : > { %s12064_s8 = smov %s8847_s10  ;;  %s12065_s10 = smov %s12071_s18 }
 0xccd   :  { %26 = sbr.rel (!%p24_p10) target bundleno = 19 (0x13), region = 129 }
 0xcd4   :  { %5420 = vsyncpa [#allocation5], 1 }
 0xcd5   :  { %5422 = vsyncpa [#allocation5 + $0x1], 1 }
 0xcd6   :  { %5423 = vsyncpa [#allocation8], 1 }
 0xcd7   :  { %5425 = vsyncpa [#allocation8 + $0x1], 1 }
 0xcd8   :  { %5426 = vsyncpa [#allocation11], 1 }
 0xcd9   :  { %5427 = vsyncpa [#allocation6], 1 }
 0xcda   :  { %5429 = vsyncpa [#allocation6 + $0x1], 1 }

</bundles_post_ra>
